<compile_context>
chip_gen: v6e
topology: v6e:2x2x1
jax: 0.10.0
libtpu: 0.0.40
codegen_flags: <defaults>
</compile_context>

<pallas_src>
from functools import partial

import numpy as np
import jax
import jax.numpy as jnp
from jax.experimental import pallas as pl
from jax.experimental.pallas import tpu as pltpu

# ----------------------------- model config (small) -------------------------
B = 2                 # batch
IN_CH = 3             # image channels
IMG_SIZE = 16
PATCH = 8
GRID = IMG_SIZE // PATCH
NUM_PATCHES = GRID * GRID                      # 4
VIS_WIDTH = 64                                 # clip_dim == vision width
VIS_HEADS = 2
VIS_MLP = 256
VIS_LAYERS = 2
CLIP_DIM = VIS_WIDTH
NUM_TASKS = 4
EMBED_DIM = 64
VIS_SEQ = 1 + 1 + NUM_PATCHES                  # task + cls + patches = 6
VIS_SEQ_PAD = 8                                # padded to a sublane tile

VOCAB = 50
CTX_LEN = 8
TXT_WIDTH = 64
TXT_HEADS = 2
TXT_MLP = 256
TXT_LAYERS = 2

LN_EPS = 1e-5
NEG_INF = -1e30


# ----------------------------- in-kernel math helpers -----------------------
def _erf_approx(x):
    # Abramowitz & Stegun 7.1.26 rational approximation (|err| < 1.5e-7).
    a = jnp.abs(x)
    t = 1.0 / (1.0 + 0.3275911 * a)
    poly = ((((1.061405429 * t - 1.453152027) * t + 1.421413741) * t
             - 0.284496736) * t + 0.254829592) * t
    y = 1.0 - poly * jnp.exp(-a * a)
    return jnp.where(x >= 0, y, -y)


def _gelu_exact(x):
    # PyTorch nn.GELU() default = exact (erf-based) GELU.
    return 0.5 * x * (1.0 + _erf_approx(x * (1.0 / np.sqrt(2.0))))


def _layernorm(x, g, b):
    x = x.astype(jnp.float32)
    mu = jnp.mean(x, axis=-1, keepdims=True)
    var = jnp.mean(jnp.square(x - mu), axis=-1, keepdims=True)
    return (x - mu) * jax.lax.rsqrt(var + LN_EPS) * g + b


def _l2_normalize(feat):
    # F.normalize(dim=-1): x / max(||x||, 1e-12)
    n = jnp.sqrt(jnp.sum(feat * feat, axis=-1, keepdims=True))
    return feat / jnp.maximum(n, 1e-12)


def _block_mask(n_batch, seq, *, causal, valid):
    """(n_batch*seq, n_batch*seq) additive mask: block-diag over batch, plus
    causal / key-padding inside each block. seq must be a power of two so the
    block / in-block indices come from cheap bit ops (no integer div)."""
    assert seq & (seq - 1) == 0, "seq must be a power of two"
    n = n_batch * seq
    row = jax.lax.broadcasted_iota(jnp.int32, (n, n), 0)
    col = jax.lax.broadcasted_iota(jnp.int32, (n, n), 1)
    ok = jnp.bitwise_xor(row, col) < seq          # same batch block (pow2 blocks)
    rin = jnp.bitwise_and(row, seq - 1)
    cin = jnp.bitwise_and(col, seq - 1)
    if causal:
        ok = jnp.logical_and(ok, cin <= rin)
    if valid is not None and valid < seq:
        ok = jnp.logical_and(ok, cin < valid)     # pad columns never act as keys
    return jnp.where(ok, 0.0, NEG_INF).astype(jnp.float32)


def _mha(x_ln, w_qkv, b_qkv, w_out, b_out, *, heads, mask):
    """Multi-head attention on the flat (B*S, D) slab (batch fused via block-diag
    mask). w_qkv is (D, 3*H*128) with each head's q/k/v in its own zero-padded
    128-lane block (scale folded into q); w_out is (H*128, D) with 128-row blocks
    per head. All head slices below are full-tile views."""
    qkv = jnp.dot(x_ln.astype(jnp.bfloat16), w_qkv,
                  preferred_element_type=jnp.float32) + b_qkv          # (N, 3H*128)
    dn = (((1,), (1,)), ((), ()))     # q @ k^T without materializing a transpose
    acc = None
    for h in range(heads):
        q = qkv[:, h * 128:(h + 1) * 128]
        k = qkv[:, (heads + h) * 128:(heads + h + 1) * 128]
        v = qkv[:, (2 * heads + h) * 128:(2 * heads + h + 1) * 128]
        s = jax.lax.dot_general(q, k, dn, preferred_element_type=jnp.float32) + mask
        s = s - jnp.max(s, axis=-1, keepdims=True)
        p = jnp.exp(s)
        p = p * pl.reciprocal(jnp.sum(p, axis=-1, keepdims=True), approx=True)
        o_h = jnp.dot(p, v, preferred_element_type=jnp.float32)        # (N, 128), pad lanes 0
        contrib = jnp.dot(o_h.astype(jnp.bfloat16), w_out[h * 128:(h + 1) * 128, :],
                          preferred_element_type=jnp.float32)          # (N, D)
        acc = contrib if acc is None else acc + contrib
    return acc + b_out


def _tower(x, vecs, vec_base, bias, wqkv, wout, wfc, wproj, *, n_layers, heads, mask):
    """vecs rows per layer (starting at vec_base): ln1_g, ln1_b, b_out, ln2_g,
    ln2_b, b_proj. bias[l,0]=packed qkv bias, bias[l,1,:mlp]=fc bias."""
    mlp = wfc.shape[-1]
    for l in range(n_layers):                     # static unroll over layers
        r = vec_base + 6 * l
        h = _layernorm(x, vecs[r:r + 1], vecs[r + 1:r + 2])
        x = x + _mha(h, wqkv[l], bias[l, 0:1, :], wout[l], vecs[r + 2:r + 3],
                     heads=heads, mask=mask)
        h = _layernorm(x, vecs[r + 3:r + 4], vecs[r + 4:r + 5])
        h = _gelu_exact(jnp.dot(h.astype(jnp.bfloat16), wfc[l],
                                preferred_element_type=jnp.float32)
                        + bias[l, 1:2, :mlp])
        x = x + jnp.dot(h.astype(jnp.bfloat16), wproj[l],
                        preferred_element_type=jnp.float32) + vecs[r + 5:r + 6]
    return x


# ----------------------------- fused CLIP kernel -----------------------------
def _fused_clip_kernel(patches_ref, conv_w_ref, base_ref, vi_vec_ref, vi_bias_ref,
                       vi_qkv_ref, vi_out_ref, vi_fc_ref, vi_proj_ref, vproj_ref,
                       x0t_ref, selt_ref, tx_vec_ref, tx_bias_ref,
                       tx_qkv_ref, tx_out_ref, tx_fc_ref, tx_proj_ref, tproj_ref,
                       o_ref, *, n_batch, vis_heads, txt_heads,
                       vis_layers, txt_layers, vis_seq, vis_valid, txt_seq):
    # TODO(synk): on v7x the image/text halves below are independent and could run
    # on separate TensorCores via pl.core_map(create_tensorcore_mesh); kept on one
    # core here so the same kernel runs on v5e/v6e unchanged.

    # ----------------------------- image encoder -----------------------------
    vvec = vi_vec_ref[...]                                              # (4+6L, D)
    pe = jnp.dot(patches_ref[...], conv_w_ref[...],
                 preferred_element_type=jnp.float32)                    # conv1 as matmul
    xi = base_ref[...] + pe                                             # task/cls/pos + patches
    mask_i = _block_mask(n_batch, vis_seq, causal=False, valid=vis_valid)
    xi = _layernorm(xi, vvec[0:1], vvec[1:2])                           # ln_pre
    xi = _tower(xi, vvec, 4, vi_bias_ref[...], vi_qkv_ref[...], vi_out_ref[...],
                vi_fc_ref[...], vi_proj_ref[...],
                n_layers=vis_layers, heads=vis_heads, mask=mask_i)
    # 'tok' pool (row 0 = task token of each block); LN commutes with row select,
    # so pool first then ln_post on the (B, D) slab.
    pr = jax.lax.broadcasted_iota(jnp.int32, (n_batch, n_batch * vis_seq), 0)
    pc = jax.lax.broadcasted_iota(jnp.int32, (n_batch, n_batch * vis_seq), 1)
    pool = (pc == pr * vis_seq).astype(jnp.float32)
    pooled_i = jnp.dot(pool, xi, preferred_element_type=jnp.float32)
    pooled_i = _layernorm(pooled_i, vvec[2:3], vvec[3:4])               # ln_post
    feat_i = jnp.dot(pooled_i.astype(jnp.bfloat16), vproj_ref[...],
                     preferred_element_type=jnp.float32)                # @ visual.proj
    feat_i = _l2_normalize(feat_i)

    # ----------------------------- text encoder ------------------------------
    tvec = tx_vec_ref[...]                                              # (2+6L, D)
    xt = x0t_ref[...].astype(jnp.float32)                               # tok_emb + pos
    mask_t = _block_mask(n_batch, txt_seq, causal=True, valid=None)
    xt = _tower(xt, tvec, 2, tx_bias_ref[...], tx_qkv_ref[...], tx_out_ref[...],
                tx_fc_ref[...], tx_proj_ref[...],
                n_layers=txt_layers, heads=txt_heads, mask=mask_t)
    pooled_t = jnp.dot(selt_ref[...], xt, preferred_element_type=jnp.float32)  # EOT pool
    pooled_t = _layernorm(pooled_t, tvec[0:1], tvec[1:2])               # ln_final
    feat_t = jnp.dot(pooled_t.astype(jnp.bfloat16), tproj_ref[...],
                     preferred_element_type=jnp.float32)                # @ text_projection
    feat_t = _l2_normalize(feat_t)

    # lane-dense (B, 2E) = (2, 128) store; wrapper splits the halves.
    o_ref[...] = jnp.concatenate([feat_i, feat_t], axis=-1).astype(o_ref.dtype)


# ----------------------------- parameter packing ------------------------------
def _pack_qkv(w_qkv, b_qkv, heads, scale):
    """(L,D,3D)/(L,1,3D) -> (L,D,3H*128) bf16 / (L,3H*128) f32; per-head q/k/v in
    zero-padded 128-lane blocks (comp-major: q_h..., k_h..., v_h...); 1/sqrt(Dh)
    folded into the q columns and q bias."""
    L, D, _ = w_qkv.shape
    Dh = D // heads
    s = jnp.asarray([scale, 1.0, 1.0], jnp.float32)
    w = w_qkv.reshape(L, D, 3, heads, Dh) * s.reshape(1, 1, 3, 1, 1)
    b = b_qkv.reshape(L, 3, heads, Dh) * s.reshape(1, 3, 1, 1)
    w = jnp.pad(w, ((0, 0), (0, 0), (0, 0), (0, 0), (0, 128 - Dh)))
    b = jnp.pad(b, ((0, 0), (0, 0), (0, 0), (0, 128 - Dh)))
    return (w.reshape(L, D, 3 * heads * 128).astype(jnp.bfloat16),
            b.reshape(L, 3 * heads * 128).astype(jnp.float32))


def _pack_wout(w_out, heads):
    """(L,D,D) -> (L,H*128,D) bf16 with each head's rows in a 128-row block."""
    L, D, Dout = w_out.shape
    Dh = D // heads
    w = w_out.reshape(L, heads, Dh, Dout)
    w = jnp.pad(w, ((0, 0), (0, 0), (0, 128 - Dh), (0, 0)))
    return w.reshape(L, heads * 128, Dout).astype(jnp.bfloat16)


def _pack_bias(b_qkv_packed, b_fc):
    """-> (L, 2, 3H*128): row 0 = packed qkv bias, row 1[:mlp] = fc bias."""
    L, W = b_qkv_packed.shape
    bf = b_fc.reshape(L, -1)
    bf = jnp.pad(bf, ((0, 0), (0, W - bf.shape[-1])))
    return jnp.stack([b_qkv_packed, bf], axis=1).astype(jnp.float32)


def _pack_vecs(extra_rows, blk, n_layers):
    """One (rows, D) f32 slab: extra rows first, then per layer
    [ln1_g, ln1_b, b_out, ln2_g, ln2_b, b_proj]."""
    rows = [r.reshape(1, -1) for r in extra_rows]
    for l in range(n_layers):
        rows += [blk["ln1_g"][l], blk["ln1_b"][l], blk["b_out"][l],
                 blk["ln2_g"][l], blk["ln2_b"][l], blk["b_proj"][l]]
    return jnp.concatenate(rows, axis=0).astype(jnp.float32)


def pack_params(p):
    """One-time weight repack (outside jit): slabs + bf16 MXU operands."""
    vb, tb = p["vis_blocks"], p["txt_blocks"]
    vi_wqkv, vi_bqkv = _pack_qkv(vb["w_qkv"], vb["b_qkv"], VIS_HEADS,
                                 1.0 / np.sqrt(VIS_WIDTH // VIS_HEADS))
    tx_wqkv, tx_bqkv = _pack_qkv(tb["w_qkv"], tb["b_qkv"], TXT_HEADS,
                                 1.0 / np.sqrt(TXT_WIDTH // TXT_HEADS))
    return dict(
        # raw embeddings (gathers happen in the XLA wrapper)
        task_emb=p["task_emb"], class_emb=p["class_emb"], pos_emb=p["pos_emb"],
        tok_emb=p["tok_emb"], txt_pos=p["txt_pos"], logit_scale=p["logit_scale"],
        # image slabs
        conv_w=p["conv1_w"].reshape(VIS_WIDTH, -1).T.astype(jnp.bfloat16),
        vi_vecs=_pack_vecs([p["ln_pre_g"], p["ln_pre_b"], p["ln_post_g"], p["ln_post_b"]],
                           vb, VIS_LAYERS),
        vi_bias=_pack_bias(vi_bqkv, vb["b_fc"]),
        vi_wqkv=vi_wqkv,
        vi_wout=_pack_wout(vb["w_out"], VIS_HEADS),
        vi_wfc=vb["w_fc"].astype(jnp.bfloat16),
        vi_wproj=vb["w_proj"].astype(jnp.bfloat16),
        vproj=p["visual_proj"].astype(jnp.bfloat16),
        # text slabs
        tx_vecs=_pack_vecs([p["ln_final_g"], p["ln_final_b"]], tb, TXT_LAYERS),
        tx_bias=_pack_bias(tx_bqkv, tb["b_fc"]),
        tx_wqkv=tx_wqkv,
        tx_wout=_pack_wout(tb["w_out"], TXT_HEADS),
        tx_wfc=tb["w_fc"].astype(jnp.bfloat16),
        tx_wproj=tb["w_proj"].astype(jnp.bfloat16),
        tproj=p["text_proj"].astype(jnp.bfloat16),
    )


# ----------------------------- forward wrapper --------------------------------
def _vmem_specs(n):
    return [pl.BlockSpec(memory_space=pltpu.MemorySpace.VMEM) for _ in range(n)]


def clip_wrapper_forward(pk, images, texts, tasks):
    Bq = images.shape[0]
    # image activations: patchify NCHW, pre-place patch rows at rows 2..5 of each
    # 8-row block (zero rows elsewhere) so the kernel does base + conv1(patches).
    patches = images.reshape(Bq, IN_CH, GRID, PATCH, GRID, PATCH)
    patches = patches.transpose(0, 2, 4, 1, 3, 5).reshape(
        Bq, NUM_PATCHES, IN_CH * PATCH * PATCH)
    zpre = jnp.zeros((Bq, 2, IN_CH * PATCH * PATCH), patches.dtype)
    zpost = jnp.zeros((Bq, VIS_SEQ_PAD - 2 - NUM_PATCHES, IN_CH * PATCH * PATCH),
                      patches.dtype)
    patches_pad = jnp.concatenate([zpre, patches, zpost], axis=1)
    patches_pad = patches_pad.reshape(Bq * VIS_SEQ_PAD, -1).astype(jnp.bfloat16)

    # base rows per batch element: [task_b, cls+pos0, pos1..posNP, 0-pad]
    task_tok = pk["task_emb"][tasks]                                   # (B, D)
    cls_pos0 = (pk["class_emb"] + pk["pos_emb"][0])[None, :]
    pos_rest = pk["pos_emb"][1:]
    pad_rows = jnp.zeros((VIS_SEQ_PAD - VIS_SEQ, VIS_WIDTH), jnp.float32)
    base_img = jnp.concatenate(
        [jnp.concatenate([task_tok[b:b + 1], cls_pos0, pos_rest, pad_rows], axis=0)
         for b in range(Bq)], axis=0)

    # text activations: embedding gather + pos; EOT (argmax id) pooling selector.
    Lc = texts.shape[1]
    x0_txt = (pk["tok_emb"][texts] + pk["txt_pos"][None]
              ).reshape(Bq * Lc, TXT_WIDTH).astype(jnp.float32)
    eot = jnp.argmax(texts, axis=-1)
    sel_txt = jax.nn.one_hot(jnp.arange(Bq) * Lc + eot, Bq * Lc, dtype=jnp.float32)

    kernel = partial(_fused_clip_kernel, n_batch=Bq,
                     vis_heads=VIS_HEADS, txt_heads=TXT_HEADS,
                     vis_layers=VIS_LAYERS, txt_layers=TXT_LAYERS,
                     vis_seq=VIS_SEQ_PAD, vis_valid=VIS_SEQ, txt_seq=Lc)
    args = (patches_pad, pk["conv_w"], base_img, pk["vi_vecs"], pk["vi_bias"],
            pk["vi_wqkv"], pk["vi_wout"], pk["vi_wfc"], pk["vi_wproj"], pk["vproj"],
            x0_txt, sel_txt, pk["tx_vecs"], pk["tx_bias"],
            pk["tx_wqkv"], pk["tx_wout"], pk["tx_wfc"], pk["tx_wproj"], pk["tproj"])
    feats = pl.pallas_call(
        kernel,
        out_shape=jax.ShapeDtypeStruct((Bq, 2 * EMBED_DIM), jnp.float32),
        in_specs=_vmem_specs(len(args)),
        out_specs=pl.BlockSpec(memory_space=pltpu.MemorySpace.VMEM),
    )(*args)

    image_features = feats[:, :EMBED_DIM]
    text_features = feats[:, EMBED_DIM:]
    # output_dict=False, logit_bias=None -> 3-tuple
    return image_features, text_features, jnp.exp(pk["logit_scale"])


# ----------------------------- parameter init --------------------------------
def init_blocks(key, n_layers, D, mlp):
    ks = jax.random.split(key, 4)
    std = 0.02
    return dict(
        ln1_g=jnp.ones((n_layers, 1, D), jnp.float32),
        ln1_b=jnp.zeros((n_layers, 1, D), jnp.float32),
        w_qkv=jax.random.normal(ks[0], (n_layers, D, 3 * D), jnp.float32) * std,
        b_qkv=jnp.zeros((n_layers, 1, 3 * D), jnp.float32),
        w_out=jax.random.normal(ks[1], (n_layers, D, D), jnp.float32) * std,
        b_out=jnp.zeros((n_layers, 1, D), jnp.float32),
        ln2_g=jnp.ones((n_layers, 1, D), jnp.float32),
        ln2_b=jnp.zeros((n_layers, 1, D), jnp.float32),
        w_fc=jax.random.normal(ks[2], (n_layers, D, mlp), jnp.float32) * std,
        b_fc=jnp.zeros((n_layers, 1, mlp), jnp.float32),
        w_proj=jax.random.normal(ks[3], (n_layers, mlp, D), jnp.float32) * std,
        b_proj=jnp.zeros((n_layers, 1, D), jnp.float32),
    )


def init_params(key):
    ks = jax.random.split(key, 12)
    std = 0.02
    p = {}
    p["conv1_w"] = jax.random.normal(ks[0], (VIS_WIDTH, IN_CH, PATCH, PATCH), jnp.float32) * std
    p["class_emb"] = jax.random.normal(ks[1], (VIS_WIDTH,), jnp.float32) * std
    p["pos_emb"] = jax.random.normal(ks[2], (NUM_PATCHES + 1, VIS_WIDTH), jnp.float32) * std
    p["ln_pre_g"] = jnp.ones((VIS_WIDTH,), jnp.float32)
    p["ln_pre_b"] = jnp.zeros((VIS_WIDTH,), jnp.float32)
    p["vis_blocks"] = init_blocks(ks[3], VIS_LAYERS, VIS_WIDTH, VIS_MLP)
    p["ln_post_g"] = jnp.ones((VIS_WIDTH,), jnp.float32)
    p["ln_post_b"] = jnp.zeros((VIS_WIDTH,), jnp.float32)
    p["visual_proj"] = jax.random.normal(ks[4], (VIS_WIDTH, EMBED_DIM), jnp.float32) * std
    p["task_emb"] = jax.random.normal(ks[5], (NUM_TASKS, CLIP_DIM), jnp.float32) * std
    p["tok_emb"] = jax.random.normal(ks[6], (VOCAB, TXT_WIDTH), jnp.float32) * std
    p["txt_pos"] = jax.random.normal(ks[7], (CTX_LEN, TXT_WIDTH), jnp.float32) * std
    p["txt_blocks"] = init_blocks(ks[8], TXT_LAYERS, TXT_WIDTH, TXT_MLP)
    p["ln_final_g"] = jnp.ones((TXT_WIDTH,), jnp.float32)
    p["ln_final_b"] = jnp.zeros((TXT_WIDTH,), jnp.float32)
    p["text_proj"] = jax.random.normal(ks[9], (TXT_WIDTH, EMBED_DIM), jnp.float32) * std
    p["logit_scale"] = jnp.asarray(np.log(1.0 / 0.07), jnp.float32)
    return p


# ----------------------------- main -------------------------------------------
if __name__ == "__main__":
    root = jax.random.PRNGKey(0)
    k_params, k_img, k_txt = jax.random.split(root, 3)

    params = init_params(k_params)
    packed = pack_params(params)                 # one-time repack outside jit
    images = jax.random.normal(k_img, (B, IN_CH, IMG_SIZE, IMG_SIZE), jnp.float32)  # NCHW
    texts = jax.random.randint(k_txt, (B, CTX_LEN), 1, VOCAB, dtype=jnp.int32)
    tasks = jnp.array([0, 1], dtype=jnp.int32)

    fwd = jax.jit(clip_wrapper_forward)
    img_feat, txt_feat, logit_scale = fwd(packed, images, texts, tasks)
    jax.block_until_ready((img_feat, txt_feat, logit_scale))

    assert img_feat.shape == (B, EMBED_DIM)
    assert txt_feat.shape == (B, EMBED_DIM)
    assert np.all(np.isfinite(np.asarray(img_feat)))
    assert np.all(np.isfinite(np.asarray(txt_feat)))
    # normalized features -> unit norm
    assert np.allclose(np.linalg.norm(np.asarray(img_feat), axis=-1), 1.0, atol=1e-4)
    assert np.allclose(np.linalg.norm(np.asarray(txt_feat), axis=-1), 1.0, atol=1e-4)
    assert np.isfinite(float(logit_scale))

    print("KERNEL_OK")
</pallas_src>

<mosaic_0001>
module attributes {stable_mosaic.version = 11 : i64} {
  func.func @_fused_clip_kernel(%arg0: memref<16x192xbf16, #tpu.memory_space<vmem>>, %arg1: memref<192x64xbf16, #tpu.memory_space<vmem>>, %arg2: memref<16x64xf32, #tpu.memory_space<vmem>>, %arg3: memref<16x64xf32, #tpu.memory_space<vmem>>, %arg4: memref<2x2x768xf32, #tpu.memory_space<vmem>>, %arg5: memref<2x64x768xbf16, #tpu.memory_space<vmem>>, %arg6: memref<2x256x64xbf16, #tpu.memory_space<vmem>>, %arg7: memref<2x64x256xbf16, #tpu.memory_space<vmem>>, %arg8: memref<2x256x64xbf16, #tpu.memory_space<vmem>>, %arg9: memref<64x64xbf16, #tpu.memory_space<vmem>>, %arg10: memref<16x64xf32, #tpu.memory_space<vmem>>, %arg11: memref<2x16xf32, #tpu.memory_space<vmem>>, %arg12: memref<14x64xf32, #tpu.memory_space<vmem>>, %arg13: memref<2x2x768xf32, #tpu.memory_space<vmem>>, %arg14: memref<2x64x768xbf16, #tpu.memory_space<vmem>>, %arg15: memref<2x256x64xbf16, #tpu.memory_space<vmem>>, %arg16: memref<2x64x256xbf16, #tpu.memory_space<vmem>>, %arg17: memref<2x256x64xbf16, #tpu.memory_space<vmem>>, %arg18: memref<64x64xbf16, #tpu.memory_space<vmem>>, %arg19: memref<2x128xf32, #tpu.memory_space<vmem>>) attributes {dimension_semantics = [], scalar_prefetch = 0 : i64, scratch_operands = 0 : i64, tpu.core_type = #tpu.core_type<tc>} {
    %c0 = arith.constant 0 : index
    %c0_0 = arith.constant 0 : index
    %0 = vector.load %arg3[%c0, %c0_0] : memref<16x64xf32, #tpu.memory_space<vmem>>, vector<16x64xf32>
    %c0_1 = arith.constant 0 : index
    %c0_2 = arith.constant 0 : index
    %1 = vector.load %arg0[%c0_1, %c0_2] : memref<16x192xbf16, #tpu.memory_space<vmem>>, vector<16x192xbf16>
    %c0_3 = arith.constant 0 : index
    %c0_4 = arith.constant 0 : index
    %2 = vector.load %arg1[%c0_3, %c0_4] : memref<192x64xbf16, #tpu.memory_space<vmem>>, vector<192x64xbf16>
    %cst = arith.constant dense<0.000000e+00> : vector<16x64xf32>
    %3 = tpu.matmul %1, %2, %cst {dimension_numbers = #tpu.dot_dimension_numbers<[1], [0], [0], [1], [0, 0, 1, 1], [], []>} : vector<16x192xbf16>, vector<192x64xbf16>, vector<16x64xf32> -> vector<16x64xf32>
    %c0_5 = arith.constant 0 : index
    %c0_6 = arith.constant 0 : index
    %4 = vector.load %arg2[%c0_5, %c0_6] : memref<16x64xf32, #tpu.memory_space<vmem>>, vector<16x64xf32>
    %5 = arith.addf %4, %3 : vector<16x64xf32>
    %6 = tpu.iota {dimensions = array<i32: 0>} : vector<16x16xi32>
    %7 = tpu.iota {dimensions = array<i32: 1>} : vector<16x16xi32>
    %8 = arith.xori %6, %7 : vector<16x16xi32>
    %c8_i32 = arith.constant 8 : i32
    %9 = vector.broadcast %c8_i32 : i32 to vector<16x16xi32>
    %10 = arith.cmpi slt, %8, %9 : vector<16x16xi32>
    %c7_i32 = arith.constant 7 : i32
    %11 = vector.broadcast %c7_i32 : i32 to vector<16x16xi32>
    %12 = arith.andi %7, %11 : vector<16x16xi32>
    %c6_i32 = arith.constant 6 : i32
    %13 = vector.broadcast %c6_i32 : i32 to vector<16x16xi32>
    %14 = arith.cmpi slt, %12, %13 : vector<16x16xi32>
    %15 = arith.andi %10, %14 : vector<16x16xi1>
    %cst_7 = arith.constant 0.000000e+00 : f32
    %cst_8 = arith.constant -1.000000e+30 : f32
    %16 = vector.broadcast %cst_7 : f32 to vector<16x16xf32>
    %17 = vector.broadcast %cst_8 : f32 to vector<16x16xf32>
    %18 = arith.select %15, %16, %17 : vector<16x16xi1>, vector<16x16xf32>
    %19 = vector.extract_strided_slice %0 {offsets = [0, 0], sizes = [1, 64], strides = [1, 1]} : vector<16x64xf32> to vector<1x64xf32>
    %20 = vector.extract_strided_slice %0 {offsets = [1, 0], sizes = [1, 64], strides = [1, 1]} : vector<16x64xf32> to vector<1x64xf32>
    %cst_9 = arith.constant dense<0.000000e+00> : vector<16xf32>
    %21 = vector.multi_reduction <add>, %5, %cst_9 [1] : vector<16x64xf32> to vector<16xf32>
    %22 = vector.shape_cast %21 : vector<16xf32> to vector<16x1xf32>
    %cst_10 = arith.constant 6.400000e+01 : f32
    %23 = vector.broadcast %cst_10 : f32 to vector<16x1xf32>
    %24 = arith.divf %22, %23 : vector<16x1xf32>
    %25 = vector.broadcast %24 : vector<16x1xf32> to vector<16x64xf32>
    %26 = arith.subf %5, %25 : vector<16x64xf32>
    %27 = arith.mulf %26, %26 : vector<16x64xf32>
    %cst_11 = arith.constant dense<0.000000e+00> : vector<16xf32>
    %28 = vector.multi_reduction <add>, %27, %cst_11 [1] : vector<16x64xf32> to vector<16xf32>
    %29 = vector.shape_cast %28 : vector<16xf32> to vector<16x1xf32>
    %cst_12 = arith.constant 6.400000e+01 : f32
    %30 = vector.broadcast %cst_12 : f32 to vector<16x1xf32>
    %31 = arith.divf %29, %30 : vector<16x1xf32>
    %32 = vector.broadcast %24 : vector<16x1xf32> to vector<16x64xf32>
    %33 = arith.subf %5, %32 : vector<16x64xf32>
    %cst_13 = arith.constant 9.99999974E-6 : f32
    %34 = vector.broadcast %cst_13 : f32 to vector<16x1xf32>
    %35 = arith.addf %31, %34 : vector<16x1xf32>
    %36 = math.rsqrt %35 : vector<16x1xf32>
    %37 = vector.broadcast %36 : vector<16x1xf32> to vector<16x64xf32>
    %38 = arith.mulf %33, %37 : vector<16x64xf32>
    %39 = vector.broadcast %19 : vector<1x64xf32> to vector<16x64xf32>
    %40 = arith.mulf %38, %39 : vector<16x64xf32>
    %41 = vector.broadcast %20 : vector<1x64xf32> to vector<16x64xf32>
    %42 = arith.addf %40, %41 : vector<16x64xf32>
    %c0_14 = arith.constant 0 : index
    %c0_15 = arith.constant 0 : index
    %c0_16 = arith.constant 0 : index
    %43 = vector.load %arg4[%c0_14, %c0_15, %c0_16] : memref<2x2x768xf32, #tpu.memory_space<vmem>>, vector<2x2x768xf32>
    %c0_17 = arith.constant 0 : index
    %c0_18 = arith.constant 0 : index
    %c0_19 = arith.constant 0 : index
    %44 = vector.load %arg5[%c0_17, %c0_18, %c0_19] : memref<2x64x768xbf16, #tpu.memory_space<vmem>>, vector<2x64x768xbf16>
    %c0_20 = arith.constant 0 : index
    %c0_21 = arith.constant 0 : index
    %c0_22 = arith.constant 0 : index
    %45 = vector.load %arg6[%c0_20, %c0_21, %c0_22] : memref<2x256x64xbf16, #tpu.memory_space<vmem>>, vector<2x256x64xbf16>
    %c0_23 = arith.constant 0 : index
    %c0_24 = arith.constant 0 : index
    %c0_25 = arith.constant 0 : index
    %46 = vector.load %arg7[%c0_23, %c0_24, %c0_25] : memref<2x64x256xbf16, #tpu.memory_space<vmem>>, vector<2x64x256xbf16>
    %c0_26 = arith.constant 0 : index
    %c0_27 = arith.constant 0 : index
    %c0_28 = arith.constant 0 : index
    %47 = vector.load %arg8[%c0_26, %c0_27, %c0_28] : memref<2x256x64xbf16, #tpu.memory_space<vmem>>, vector<2x256x64xbf16>
    %48 = vector.extract_strided_slice %0 {offsets = [4, 0], sizes = [1, 64], strides = [1, 1]} : vector<16x64xf32> to vector<1x64xf32>
    %49 = vector.extract_strided_slice %0 {offsets = [5, 0], sizes = [1, 64], strides = [1, 1]} : vector<16x64xf32> to vector<1x64xf32>
    %cst_29 = arith.constant dense<0.000000e+00> : vector<16xf32>
    %50 = vector.multi_reduction <add>, %42, %cst_29 [1] : vector<16x64xf32> to vector<16xf32>
    %51 = vector.shape_cast %50 : vector<16xf32> to vector<16x1xf32>
    %cst_30 = arith.constant 6.400000e+01 : f32
    %52 = vector.broadcast %cst_30 : f32 to vector<16x1xf32>
    %53 = arith.divf %51, %52 : vector<16x1xf32>
    %54 = vector.broadcast %53 : vector<16x1xf32> to vector<16x64xf32>
    %55 = arith.subf %42, %54 : vector<16x64xf32>
    %56 = arith.mulf %55, %55 : vector<16x64xf32>
    %cst_31 = arith.constant dense<0.000000e+00> : vector<16xf32>
    %57 = vector.multi_reduction <add>, %56, %cst_31 [1] : vector<16x64xf32> to vector<16xf32>
    %58 = vector.shape_cast %57 : vector<16xf32> to vector<16x1xf32>
    %cst_32 = arith.constant 6.400000e+01 : f32
    %59 = vector.broadcast %cst_32 : f32 to vector<16x1xf32>
    %60 = arith.divf %58, %59 : vector<16x1xf32>
    %61 = vector.broadcast %53 : vector<16x1xf32> to vector<16x64xf32>
    %62 = arith.subf %42, %61 : vector<16x64xf32>
    %cst_33 = arith.constant 9.99999974E-6 : f32
    %63 = vector.broadcast %cst_33 : f32 to vector<16x1xf32>
    %64 = arith.addf %60, %63 : vector<16x1xf32>
    %65 = math.rsqrt %64 : vector<16x1xf32>
    %66 = vector.broadcast %65 : vector<16x1xf32> to vector<16x64xf32>
    %67 = arith.mulf %62, %66 : vector<16x64xf32>
    %68 = vector.broadcast %48 : vector<1x64xf32> to vector<16x64xf32>
    %69 = arith.mulf %67, %68 : vector<16x64xf32>
    %70 = vector.broadcast %49 : vector<1x64xf32> to vector<16x64xf32>
    %71 = arith.addf %69, %70 : vector<16x64xf32>
    %72 = vector.extract_strided_slice %44 {offsets = [0, 0, 0], sizes = [1, 64, 768], strides = [1, 1, 1]} : vector<2x64x768xbf16> to vector<1x64x768xbf16>
    %73 = vector.shape_cast %72 : vector<1x64x768xbf16> to vector<64x768xbf16>
    %74 = vector.extract_strided_slice %43 {offsets = [0, 0, 0], sizes = [1, 1, 768], strides = [1, 1, 1]} : vector<2x2x768xf32> to vector<1x1x768xf32>
    %75 = vector.shape_cast %74 : vector<1x1x768xf32> to vector<1x768xf32>
    %76 = vector.extract_strided_slice %45 {offsets = [0, 0, 0], sizes = [1, 256, 64], strides = [1, 1, 1]} : vector<2x256x64xbf16> to vector<1x256x64xbf16>
    %77 = vector.shape_cast %76 : vector<1x256x64xbf16> to vector<256x64xbf16>
    %78 = vector.extract_strided_slice %0 {offsets = [6, 0], sizes = [1, 64], strides = [1, 1]} : vector<16x64xf32> to vector<1x64xf32>
    %79 = arith.truncf %71 : vector<16x64xf32> to vector<16x64xbf16>
    %cst_34 = arith.constant dense<0.000000e+00> : vector<16x768xf32>
    %80 = tpu.matmul %79, %73, %cst_34 {dimension_numbers = #tpu.dot_dimension_numbers<[1], [0], [0], [1], [0, 0, 1, 1], [], []>} : vector<16x64xbf16>, vector<64x768xbf16>, vector<16x768xf32> -> vector<16x768xf32>
    %81 = vector.broadcast %75 : vector<1x768xf32> to vector<16x768xf32>
    %82 = arith.addf %80, %81 : vector<16x768xf32>
    %83 = vector.extract_strided_slice %82 {offsets = [0, 0], sizes = [16, 128], strides = [1, 1]} : vector<16x768xf32> to vector<16x128xf32>
    %84 = vector.extract_strided_slice %82 {offsets = [0, 256], sizes = [16, 128], strides = [1, 1]} : vector<16x768xf32> to vector<16x128xf32>
    %85 = vector.extract_strided_slice %82 {offsets = [0, 512], sizes = [16, 128], strides = [1, 1]} : vector<16x768xf32> to vector<16x128xf32>
    %cst_35 = arith.constant dense<0.000000e+00> : vector<16x16xf32>
    %86 = tpu.matmul %83, %84, %cst_35 {dimension_numbers = #tpu.dot_dimension_numbers<[1], [1], [0], [0], [0, 0, 1, 0], [], []>} : vector<16x128xf32>, vector<16x128xf32>, vector<16x16xf32> -> vector<16x16xf32>
    %87 = arith.addf %86, %18 : vector<16x16xf32>
    %cst_36 = arith.constant dense<0xFF800000> : vector<16xf32>
    %88 = vector.multi_reduction <maximumf>, %87, %cst_36 [1] : vector<16x16xf32> to vector<16xf32>
    %89 = vector.shape_cast %88 : vector<16xf32> to vector<16x1xf32>
    %90 = vector.broadcast %89 : vector<16x1xf32> to vector<16x16xf32>
    %91 = arith.subf %87, %90 : vector<16x16xf32>
    %92 = math.exp %91 : vector<16x16xf32>
    %cst_37 = arith.constant dense<0.000000e+00> : vector<16xf32>
    %93 = vector.multi_reduction <add>, %92, %cst_37 [1] : vector<16x16xf32> to vector<16xf32>
    %94 = vector.shape_cast %93 : vector<16xf32> to vector<16x1xf32>
    %95 = tpu.reciprocal %94 {approx = true} : vector<16x1xf32> -> vector<16x1xf32>
    %96 = vector.broadcast %95 : vector<16x1xf32> to vector<16x16xf32>
    %97 = arith.mulf %92, %96 : vector<16x16xf32>
    %cst_38 = arith.constant dense<0.000000e+00> : vector<16x128xf32>
    %98 = tpu.matmul %97, %85, %cst_38 {dimension_numbers = #tpu.dot_dimension_numbers<[1], [0], [0], [1], [0, 0, 1, 1], [], []>} : vector<16x16xf32>, vector<16x128xf32>, vector<16x128xf32> -> vector<16x128xf32>
    %99 = arith.truncf %98 : vector<16x128xf32> to vector<16x128xbf16>
    %100 = vector.extract_strided_slice %77 {offsets = [0, 0], sizes = [128, 64], strides = [1, 1]} : vector<256x64xbf16> to vector<128x64xbf16>
    %cst_39 = arith.constant dense<0.000000e+00> : vector<16x64xf32>
    %101 = tpu.matmul %99, %100, %cst_39 {dimension_numbers = #tpu.dot_dimension_numbers<[1], [0], [0], [1], [0, 0, 1, 1], [], []>} : vector<16x128xbf16>, vector<128x64xbf16>, vector<16x64xf32> -> vector<16x64xf32>
    %102 = vector.extract_strided_slice %82 {offsets = [0, 128], sizes = [16, 128], strides = [1, 1]} : vector<16x768xf32> to vector<16x128xf32>
    %103 = vector.extract_strided_slice %82 {offsets = [0, 384], sizes = [16, 128], strides = [1, 1]} : vector<16x768xf32> to vector<16x128xf32>
    %104 = vector.extract_strided_slice %82 {offsets = [0, 640], sizes = [16, 128], strides = [1, 1]} : vector<16x768xf32> to vector<16x128xf32>
    %cst_40 = arith.constant dense<0.000000e+00> : vector<16x16xf32>
    %105 = tpu.matmul %102, %103, %cst_40 {dimension_numbers = #tpu.dot_dimension_numbers<[1], [1], [0], [0], [0, 0, 1, 0], [], []>} : vector<16x128xf32>, vector<16x128xf32>, vector<16x16xf32> -> vector<16x16xf32>
    %106 = arith.addf %105, %18 : vector<16x16xf32>
    %cst_41 = arith.constant dense<0xFF800000> : vector<16xf32>
    %107 = vector.multi_reduction <maximumf>, %106, %cst_41 [1] : vector<16x16xf32> to vector<16xf32>
    %108 = vector.shape_cast %107 : vector<16xf32> to vector<16x1xf32>
    %109 = vector.broadcast %108 : vector<16x1xf32> to vector<16x16xf32>
    %110 = arith.subf %106, %109 : vector<16x16xf32>
    %111 = math.exp %110 : vector<16x16xf32>
    %cst_42 = arith.constant dense<0.000000e+00> : vector<16xf32>
    %112 = vector.multi_reduction <add>, %111, %cst_42 [1] : vector<16x16xf32> to vector<16xf32>
    %113 = vector.shape_cast %112 : vector<16xf32> to vector<16x1xf32>
    %114 = tpu.reciprocal %113 {approx = true} : vector<16x1xf32> -> vector<16x1xf32>
    %115 = vector.broadcast %114 : vector<16x1xf32> to vector<16x16xf32>
    %116 = arith.mulf %111, %115 : vector<16x16xf32>
    %cst_43 = arith.constant dense<0.000000e+00> : vector<16x128xf32>
    %117 = tpu.matmul %116, %104, %cst_43 {dimension_numbers = #tpu.dot_dimension_numbers<[1], [0], [0], [1], [0, 0, 1, 1], [], []>} : vector<16x16xf32>, vector<16x128xf32>, vector<16x128xf32> -> vector<16x128xf32>
    %118 = arith.truncf %117 : vector<16x128xf32> to vector<16x128xbf16>
    %119 = vector.extract_strided_slice %77 {offsets = [128, 0], sizes = [128, 64], strides = [1, 1]} : vector<256x64xbf16> to vector<128x64xbf16>
    %cst_44 = arith.constant dense<0.000000e+00> : vector<16x64xf32>
    %120 = tpu.matmul %118, %119, %cst_44 {dimension_numbers = #tpu.dot_dimension_numbers<[1], [0], [0], [1], [0, 0, 1, 1], [], []>} : vector<16x128xbf16>, vector<128x64xbf16>, vector<16x64xf32> -> vector<16x64xf32>
    %121 = arith.addf %101, %120 : vector<16x64xf32>
    %122 = vector.broadcast %78 : vector<1x64xf32> to vector<16x64xf32>
    %123 = arith.addf %121, %122 : vector<16x64xf32>
    %124 = arith.addf %42, %123 : vector<16x64xf32>
    %125 = vector.extract_strided_slice %0 {offsets = [7, 0], sizes = [1, 64], strides = [1, 1]} : vector<16x64xf32> to vector<1x64xf32>
    %126 = vector.extract_strided_slice %0 {offsets = [8, 0], sizes = [1, 64], strides = [1, 1]} : vector<16x64xf32> to vector<1x64xf32>
    %cst_45 = arith.constant dense<0.000000e+00> : vector<16xf32>
    %127 = vector.multi_reduction <add>, %124, %cst_45 [1] : vector<16x64xf32> to vector<16xf32>
    %128 = vector.shape_cast %127 : vector<16xf32> to vector<16x1xf32>
    %cst_46 = arith.constant 6.400000e+01 : f32
    %129 = vector.broadcast %cst_46 : f32 to vector<16x1xf32>
    %130 = arith.divf %128, %129 : vector<16x1xf32>
    %131 = vector.broadcast %130 : vector<16x1xf32> to vector<16x64xf32>
    %132 = arith.subf %124, %131 : vector<16x64xf32>
    %133 = arith.mulf %132, %132 : vector<16x64xf32>
    %cst_47 = arith.constant dense<0.000000e+00> : vector<16xf32>
    %134 = vector.multi_reduction <add>, %133, %cst_47 [1] : vector<16x64xf32> to vector<16xf32>
    %135 = vector.shape_cast %134 : vector<16xf32> to vector<16x1xf32>
    %cst_48 = arith.constant 6.400000e+01 : f32
    %136 = vector.broadcast %cst_48 : f32 to vector<16x1xf32>
    %137 = arith.divf %135, %136 : vector<16x1xf32>
    %138 = vector.broadcast %130 : vector<16x1xf32> to vector<16x64xf32>
    %139 = arith.subf %124, %138 : vector<16x64xf32>
    %cst_49 = arith.constant 9.99999974E-6 : f32
    %140 = vector.broadcast %cst_49 : f32 to vector<16x1xf32>
    %141 = arith.addf %137, %140 : vector<16x1xf32>
    %142 = math.rsqrt %141 : vector<16x1xf32>
    %143 = vector.broadcast %142 : vector<16x1xf32> to vector<16x64xf32>
    %144 = arith.mulf %139, %143 : vector<16x64xf32>
    %145 = vector.broadcast %125 : vector<1x64xf32> to vector<16x64xf32>
    %146 = arith.mulf %144, %145 : vector<16x64xf32>
    %147 = vector.broadcast %126 : vector<1x64xf32> to vector<16x64xf32>
    %148 = arith.addf %146, %147 : vector<16x64xf32>
    %149 = arith.truncf %148 : vector<16x64xf32> to vector<16x64xbf16>
    %150 = vector.extract_strided_slice %46 {offsets = [0, 0, 0], sizes = [1, 64, 256], strides = [1, 1, 1]} : vector<2x64x256xbf16> to vector<1x64x256xbf16>
    %151 = vector.shape_cast %150 : vector<1x64x256xbf16> to vector<64x256xbf16>
    %cst_50 = arith.constant dense<0.000000e+00> : vector<16x256xf32>
    %152 = tpu.matmul %149, %151, %cst_50 {dimension_numbers = #tpu.dot_dimension_numbers<[1], [0], [0], [1], [0, 0, 1, 1], [], []>} : vector<16x64xbf16>, vector<64x256xbf16>, vector<16x256xf32> -> vector<16x256xf32>
    %153 = vector.extract_strided_slice %43 {offsets = [0, 1, 0], sizes = [1, 1, 256], strides = [1, 1, 1]} : vector<2x2x768xf32> to vector<1x1x256xf32>
    %154 = vector.shape_cast %153 : vector<1x1x256xf32> to vector<1x256xf32>
    %155 = vector.broadcast %154 : vector<1x256xf32> to vector<16x256xf32>
    %156 = arith.addf %152, %155 : vector<16x256xf32>
    %cst_51 = arith.constant 5.000000e-01 : f32
    %157 = vector.broadcast %cst_51 : f32 to vector<16x256xf32>
    %158 = arith.mulf %157, %156 : vector<16x256xf32>
    %cst_52 = arith.constant 0.707106769 : f32
    %159 = vector.broadcast %cst_52 : f32 to vector<16x256xf32>
    %160 = arith.mulf %156, %159 : vector<16x256xf32>
    %161 = math.absf %160 : vector<16x256xf32>
    %cst_53 = arith.constant 0.327591091 : f32
    %162 = vector.broadcast %cst_53 : f32 to vector<16x256xf32>
    %163 = arith.mulf %162, %161 : vector<16x256xf32>
    %cst_54 = arith.constant 1.000000e+00 : f32
    %164 = vector.broadcast %cst_54 : f32 to vector<16x256xf32>
    %165 = arith.addf %164, %163 : vector<16x256xf32>
    %cst_55 = arith.constant 1.000000e+00 : f32
    %166 = vector.broadcast %cst_55 : f32 to vector<16x256xf32>
    %167 = arith.divf %166, %165 : vector<16x256xf32>
    %cst_56 = arith.constant 1.06140542 : f32
    %168 = vector.broadcast %cst_56 : f32 to vector<16x256xf32>
    %169 = arith.mulf %168, %167 : vector<16x256xf32>
    %cst_57 = arith.constant 1.45315206 : f32
    %170 = vector.broadcast %cst_57 : f32 to vector<16x256xf32>
    %171 = arith.subf %169, %170 : vector<16x256xf32>
    %172 = arith.mulf %171, %167 : vector<16x256xf32>
    %cst_58 = arith.constant 1.42141378 : f32
    %173 = vector.broadcast %cst_58 : f32 to vector<16x256xf32>
    %174 = arith.addf %172, %173 : vector<16x256xf32>
    %175 = arith.mulf %174, %167 : vector<16x256xf32>
    %cst_59 = arith.constant 0.284496725 : f32
    %176 = vector.broadcast %cst_59 : f32 to vector<16x256xf32>
    %177 = arith.subf %175, %176 : vector<16x256xf32>
    %178 = arith.mulf %177, %167 : vector<16x256xf32>
    %cst_60 = arith.constant 0.254829586 : f32
    %179 = vector.broadcast %cst_60 : f32 to vector<16x256xf32>
    %180 = arith.addf %178, %179 : vector<16x256xf32>
    %181 = arith.mulf %180, %167 : vector<16x256xf32>
    %cst_61 = arith.constant 0.000000e+00 : f32
    %182 = vector.broadcast %cst_61 : f32 to vector<16x256xf32>
    %183 = arith.subf %182, %161 : vector<16x256xf32>
    %184 = arith.mulf %183, %161 : vector<16x256xf32>
    %185 = math.exp %184 : vector<16x256xf32>
    %186 = arith.mulf %181, %185 : vector<16x256xf32>
    %cst_62 = arith.constant 1.000000e+00 : f32
    %187 = vector.broadcast %cst_62 : f32 to vector<16x256xf32>
    %188 = arith.subf %187, %186 : vector<16x256xf32>
    %cst_63 = arith.constant 0.000000e+00 : f32
    %189 = vector.broadcast %cst_63 : f32 to vector<16x256xf32>
    %190 = arith.cmpf oge, %160, %189 : vector<16x256xf32>
    %cst_64 = arith.constant 0.000000e+00 : f32
    %191 = vector.broadcast %cst_64 : f32 to vector<16x256xf32>
    %192 = arith.subf %191, %188 : vector<16x256xf32>
    %193 = arith.select %190, %188, %192 : vector<16x256xi1>, vector<16x256xf32>
    %cst_65 = arith.constant 1.000000e+00 : f32
    %194 = vector.broadcast %cst_65 : f32 to vector<16x256xf32>
    %195 = arith.addf %194, %193 : vector<16x256xf32>
    %196 = arith.mulf %158, %195 : vector<16x256xf32>
    %197 = arith.truncf %196 : vector<16x256xf32> to vector<16x256xbf16>
    %198 = vector.extract_strided_slice %47 {offsets = [0, 0, 0], sizes = [1, 256, 64], strides = [1, 1, 1]} : vector<2x256x64xbf16> to vector<1x256x64xbf16>
    %199 = vector.shape_cast %198 : vector<1x256x64xbf16> to vector<256x64xbf16>
    %cst_66 = arith.constant dense<0.000000e+00> : vector<16x64xf32>
    %200 = tpu.matmul %197, %199, %cst_66 {dimension_numbers = #tpu.dot_dimension_numbers<[1], [0], [0], [1], [0, 0, 1, 1], [], []>} : vector<16x256xbf16>, vector<256x64xbf16>, vector<16x64xf32> -> vector<16x64xf32>
    %201 = arith.addf %124, %200 : vector<16x64xf32>
    %202 = vector.extract_strided_slice %0 {offsets = [9, 0], sizes = [1, 64], strides = [1, 1]} : vector<16x64xf32> to vector<1x64xf32>
    %203 = vector.broadcast %202 : vector<1x64xf32> to vector<16x64xf32>
    %204 = arith.addf %201, %203 : vector<16x64xf32>
    %205 = vector.extract_strided_slice %0 {offsets = [10, 0], sizes = [1, 64], strides = [1, 1]} : vector<16x64xf32> to vector<1x64xf32>
    %206 = vector.extract_strided_slice %0 {offsets = [11, 0], sizes = [1, 64], strides = [1, 1]} : vector<16x64xf32> to vector<1x64xf32>
    %cst_67 = arith.constant dense<0.000000e+00> : vector<16xf32>
    %207 = vector.multi_reduction <add>, %204, %cst_67 [1] : vector<16x64xf32> to vector<16xf32>
    %208 = vector.shape_cast %207 : vector<16xf32> to vector<16x1xf32>
    %cst_68 = arith.constant 6.400000e+01 : f32
    %209 = vector.broadcast %cst_68 : f32 to vector<16x1xf32>
    %210 = arith.divf %208, %209 : vector<16x1xf32>
    %211 = vector.broadcast %210 : vector<16x1xf32> to vector<16x64xf32>
    %212 = arith.subf %204, %211 : vector<16x64xf32>
    %213 = arith.mulf %212, %212 : vector<16x64xf32>
    %cst_69 = arith.constant dense<0.000000e+00> : vector<16xf32>
    %214 = vector.multi_reduction <add>, %213, %cst_69 [1] : vector<16x64xf32> to vector<16xf32>
    %215 = vector.shape_cast %214 : vector<16xf32> to vector<16x1xf32>
    %cst_70 = arith.constant 6.400000e+01 : f32
    %216 = vector.broadcast %cst_70 : f32 to vector<16x1xf32>
    %217 = arith.divf %215, %216 : vector<16x1xf32>
    %218 = vector.broadcast %210 : vector<16x1xf32> to vector<16x64xf32>
    %219 = arith.subf %204, %218 : vector<16x64xf32>
    %cst_71 = arith.constant 9.99999974E-6 : f32
    %220 = vector.broadcast %cst_71 : f32 to vector<16x1xf32>
    %221 = arith.addf %217, %220 : vector<16x1xf32>
    %222 = math.rsqrt %221 : vector<16x1xf32>
    %223 = vector.broadcast %222 : vector<16x1xf32> to vector<16x64xf32>
    %224 = arith.mulf %219, %223 : vector<16x64xf32>
    %225 = vector.broadcast %205 : vector<1x64xf32> to vector<16x64xf32>
    %226 = arith.mulf %224, %225 : vector<16x64xf32>
    %227 = vector.broadcast %206 : vector<1x64xf32> to vector<16x64xf32>
    %228 = arith.addf %226, %227 : vector<16x64xf32>
    %229 = vector.extract_strided_slice %44 {offsets = [1, 0, 0], sizes = [1, 64, 768], strides = [1, 1, 1]} : vector<2x64x768xbf16> to vector<1x64x768xbf16>
    %230 = vector.shape_cast %229 : vector<1x64x768xbf16> to vector<64x768xbf16>
    %231 = vector.extract_strided_slice %43 {offsets = [1, 0, 0], sizes = [1, 1, 768], strides = [1, 1, 1]} : vector<2x2x768xf32> to vector<1x1x768xf32>
    %232 = vector.shape_cast %231 : vector<1x1x768xf32> to vector<1x768xf32>
    %233 = vector.extract_strided_slice %45 {offsets = [1, 0, 0], sizes = [1, 256, 64], strides = [1, 1, 1]} : vector<2x256x64xbf16> to vector<1x256x64xbf16>
    %234 = vector.shape_cast %233 : vector<1x256x64xbf16> to vector<256x64xbf16>
    %235 = vector.extract_strided_slice %0 {offsets = [12, 0], sizes = [1, 64], strides = [1, 1]} : vector<16x64xf32> to vector<1x64xf32>
    %236 = arith.truncf %228 : vector<16x64xf32> to vector<16x64xbf16>
    %cst_72 = arith.constant dense<0.000000e+00> : vector<16x768xf32>
    %237 = tpu.matmul %236, %230, %cst_72 {dimension_numbers = #tpu.dot_dimension_numbers<[1], [0], [0], [1], [0, 0, 1, 1], [], []>} : vector<16x64xbf16>, vector<64x768xbf16>, vector<16x768xf32> -> vector<16x768xf32>
    %238 = vector.broadcast %232 : vector<1x768xf32> to vector<16x768xf32>
    %239 = arith.addf %237, %238 : vector<16x768xf32>
    %240 = vector.extract_strided_slice %239 {offsets = [0, 0], sizes = [16, 128], strides = [1, 1]} : vector<16x768xf32> to vector<16x128xf32>
    %241 = vector.extract_strided_slice %239 {offsets = [0, 256], sizes = [16, 128], strides = [1, 1]} : vector<16x768xf32> to vector<16x128xf32>
    %242 = vector.extract_strided_slice %239 {offsets = [0, 512], sizes = [16, 128], strides = [1, 1]} : vector<16x768xf32> to vector<16x128xf32>
    %cst_73 = arith.constant dense<0.000000e+00> : vector<16x16xf32>
    %243 = tpu.matmul %240, %241, %cst_73 {dimension_numbers = #tpu.dot_dimension_numbers<[1], [1], [0], [0], [0, 0, 1, 0], [], []>} : vector<16x128xf32>, vector<16x128xf32>, vector<16x16xf32> -> vector<16x16xf32>
    %244 = arith.addf %243, %18 : vector<16x16xf32>
    %cst_74 = arith.constant dense<0xFF800000> : vector<16xf32>
    %245 = vector.multi_reduction <maximumf>, %244, %cst_74 [1] : vector<16x16xf32> to vector<16xf32>
    %246 = vector.shape_cast %245 : vector<16xf32> to vector<16x1xf32>
    %247 = vector.broadcast %246 : vector<16x1xf32> to vector<16x16xf32>
    %248 = arith.subf %244, %247 : vector<16x16xf32>
    %249 = math.exp %248 : vector<16x16xf32>
    %cst_75 = arith.constant dense<0.000000e+00> : vector<16xf32>
    %250 = vector.multi_reduction <add>, %249, %cst_75 [1] : vector<16x16xf32> to vector<16xf32>
    %251 = vector.shape_cast %250 : vector<16xf32> to vector<16x1xf32>
    %252 = tpu.reciprocal %251 {approx = true} : vector<16x1xf32> -> vector<16x1xf32>
    %253 = vector.broadcast %252 : vector<16x1xf32> to vector<16x16xf32>
    %254 = arith.mulf %249, %253 : vector<16x16xf32>
    %cst_76 = arith.constant dense<0.000000e+00> : vector<16x128xf32>
    %255 = tpu.matmul %254, %242, %cst_76 {dimension_numbers = #tpu.dot_dimension_numbers<[1], [0], [0], [1], [0, 0, 1, 1], [], []>} : vector<16x16xf32>, vector<16x128xf32>, vector<16x128xf32> -> vector<16x128xf32>
    %256 = arith.truncf %255 : vector<16x128xf32> to vector<16x128xbf16>
    %257 = vector.extract_strided_slice %234 {offsets = [0, 0], sizes = [128, 64], strides = [1, 1]} : vector<256x64xbf16> to vector<128x64xbf16>
    %cst_77 = arith.constant dense<0.000000e+00> : vector<16x64xf32>
    %258 = tpu.matmul %256, %257, %cst_77 {dimension_numbers = #tpu.dot_dimension_numbers<[1], [0], [0], [1], [0, 0, 1, 1], [], []>} : vector<16x128xbf16>, vector<128x64xbf16>, vector<16x64xf32> -> vector<16x64xf32>
    %259 = vector.extract_strided_slice %239 {offsets = [0, 128], sizes = [16, 128], strides = [1, 1]} : vector<16x768xf32> to vector<16x128xf32>
    %260 = vector.extract_strided_slice %239 {offsets = [0, 384], sizes = [16, 128], strides = [1, 1]} : vector<16x768xf32> to vector<16x128xf32>
    %261 = vector.extract_strided_slice %239 {offsets = [0, 640], sizes = [16, 128], strides = [1, 1]} : vector<16x768xf32> to vector<16x128xf32>
    %cst_78 = arith.constant dense<0.000000e+00> : vector<16x16xf32>
    %262 = tpu.matmul %259, %260, %cst_78 {dimension_numbers = #tpu.dot_dimension_numbers<[1], [1], [0], [0], [0, 0, 1, 0], [], []>} : vector<16x128xf32>, vector<16x128xf32>, vector<16x16xf32> -> vector<16x16xf32>
    %263 = arith.addf %262, %18 : vector<16x16xf32>
    %cst_79 = arith.constant dense<0xFF800000> : vector<16xf32>
    %264 = vector.multi_reduction <maximumf>, %263, %cst_79 [1] : vector<16x16xf32> to vector<16xf32>
    %265 = vector.shape_cast %264 : vector<16xf32> to vector<16x1xf32>
    %266 = vector.broadcast %265 : vector<16x1xf32> to vector<16x16xf32>
    %267 = arith.subf %263, %266 : vector<16x16xf32>
    %268 = math.exp %267 : vector<16x16xf32>
    %cst_80 = arith.constant dense<0.000000e+00> : vector<16xf32>
    %269 = vector.multi_reduction <add>, %268, %cst_80 [1] : vector<16x16xf32> to vector<16xf32>
    %270 = vector.shape_cast %269 : vector<16xf32> to vector<16x1xf32>
    %271 = tpu.reciprocal %270 {approx = true} : vector<16x1xf32> -> vector<16x1xf32>
    %272 = vector.broadcast %271 : vector<16x1xf32> to vector<16x16xf32>
    %273 = arith.mulf %268, %272 : vector<16x16xf32>
    %cst_81 = arith.constant dense<0.000000e+00> : vector<16x128xf32>
    %274 = tpu.matmul %273, %261, %cst_81 {dimension_numbers = #tpu.dot_dimension_numbers<[1], [0], [0], [1], [0, 0, 1, 1], [], []>} : vector<16x16xf32>, vector<16x128xf32>, vector<16x128xf32> -> vector<16x128xf32>
    %275 = arith.truncf %274 : vector<16x128xf32> to vector<16x128xbf16>
    %276 = vector.extract_strided_slice %234 {offsets = [128, 0], sizes = [128, 64], strides = [1, 1]} : vector<256x64xbf16> to vector<128x64xbf16>
    %cst_82 = arith.constant dense<0.000000e+00> : vector<16x64xf32>
    %277 = tpu.matmul %275, %276, %cst_82 {dimension_numbers = #tpu.dot_dimension_numbers<[1], [0], [0], [1], [0, 0, 1, 1], [], []>} : vector<16x128xbf16>, vector<128x64xbf16>, vector<16x64xf32> -> vector<16x64xf32>
    %278 = arith.addf %258, %277 : vector<16x64xf32>
    %279 = vector.broadcast %235 : vector<1x64xf32> to vector<16x64xf32>
    %280 = arith.addf %278, %279 : vector<16x64xf32>
    %281 = arith.addf %204, %280 : vector<16x64xf32>
    %282 = vector.extract_strided_slice %0 {offsets = [13, 0], sizes = [1, 64], strides = [1, 1]} : vector<16x64xf32> to vector<1x64xf32>
    %283 = vector.extract_strided_slice %0 {offsets = [14, 0], sizes = [1, 64], strides = [1, 1]} : vector<16x64xf32> to vector<1x64xf32>
    %cst_83 = arith.constant dense<0.000000e+00> : vector<16xf32>
    %284 = vector.multi_reduction <add>, %281, %cst_83 [1] : vector<16x64xf32> to vector<16xf32>
    %285 = vector.shape_cast %284 : vector<16xf32> to vector<16x1xf32>
    %cst_84 = arith.constant 6.400000e+01 : f32
    %286 = vector.broadcast %cst_84 : f32 to vector<16x1xf32>
    %287 = arith.divf %285, %286 : vector<16x1xf32>
    %288 = vector.broadcast %287 : vector<16x1xf32> to vector<16x64xf32>
    %289 = arith.subf %281, %288 : vector<16x64xf32>
    %290 = arith.mulf %289, %289 : vector<16x64xf32>
    %cst_85 = arith.constant dense<0.000000e+00> : vector<16xf32>
    %291 = vector.multi_reduction <add>, %290, %cst_85 [1] : vector<16x64xf32> to vector<16xf32>
    %292 = vector.shape_cast %291 : vector<16xf32> to vector<16x1xf32>
    %cst_86 = arith.constant 6.400000e+01 : f32
    %293 = vector.broadcast %cst_86 : f32 to vector<16x1xf32>
    %294 = arith.divf %292, %293 : vector<16x1xf32>
    %295 = vector.broadcast %287 : vector<16x1xf32> to vector<16x64xf32>
    %296 = arith.subf %281, %295 : vector<16x64xf32>
    %cst_87 = arith.constant 9.99999974E-6 : f32
    %297 = vector.broadcast %cst_87 : f32 to vector<16x1xf32>
    %298 = arith.addf %294, %297 : vector<16x1xf32>
    %299 = math.rsqrt %298 : vector<16x1xf32>
    %300 = vector.broadcast %299 : vector<16x1xf32> to vector<16x64xf32>
    %301 = arith.mulf %296, %300 : vector<16x64xf32>
    %302 = vector.broadcast %282 : vector<1x64xf32> to vector<16x64xf32>
    %303 = arith.mulf %301, %302 : vector<16x64xf32>
    %304 = vector.broadcast %283 : vector<1x64xf32> to vector<16x64xf32>
    %305 = arith.addf %303, %304 : vector<16x64xf32>
    %306 = arith.truncf %305 : vector<16x64xf32> to vector<16x64xbf16>
    %307 = vector.extract_strided_slice %46 {offsets = [1, 0, 0], sizes = [1, 64, 256], strides = [1, 1, 1]} : vector<2x64x256xbf16> to vector<1x64x256xbf16>
    %308 = vector.shape_cast %307 : vector<1x64x256xbf16> to vector<64x256xbf16>
    %cst_88 = arith.constant dense<0.000000e+00> : vector<16x256xf32>
    %309 = tpu.matmul %306, %308, %cst_88 {dimension_numbers = #tpu.dot_dimension_numbers<[1], [0], [0], [1], [0, 0, 1, 1], [], []>} : vector<16x64xbf16>, vector<64x256xbf16>, vector<16x256xf32> -> vector<16x256xf32>
    %310 = vector.extract_strided_slice %43 {offsets = [1, 1, 0], sizes = [1, 1, 256], strides = [1, 1, 1]} : vector<2x2x768xf32> to vector<1x1x256xf32>
    %311 = vector.shape_cast %310 : vector<1x1x256xf32> to vector<1x256xf32>
    %312 = vector.broadcast %311 : vector<1x256xf32> to vector<16x256xf32>
    %313 = arith.addf %309, %312 : vector<16x256xf32>
    %cst_89 = arith.constant 5.000000e-01 : f32
    %314 = vector.broadcast %cst_89 : f32 to vector<16x256xf32>
    %315 = arith.mulf %314, %313 : vector<16x256xf32>
    %cst_90 = arith.constant 0.707106769 : f32
    %316 = vector.broadcast %cst_90 : f32 to vector<16x256xf32>
    %317 = arith.mulf %313, %316 : vector<16x256xf32>
    %318 = math.absf %317 : vector<16x256xf32>
    %cst_91 = arith.constant 0.327591091 : f32
    %319 = vector.broadcast %cst_91 : f32 to vector<16x256xf32>
    %320 = arith.mulf %319, %318 : vector<16x256xf32>
    %cst_92 = arith.constant 1.000000e+00 : f32
    %321 = vector.broadcast %cst_92 : f32 to vector<16x256xf32>
    %322 = arith.addf %321, %320 : vector<16x256xf32>
    %cst_93 = arith.constant 1.000000e+00 : f32
    %323 = vector.broadcast %cst_93 : f32 to vector<16x256xf32>
    %324 = arith.divf %323, %322 : vector<16x256xf32>
    %cst_94 = arith.constant 1.06140542 : f32
    %325 = vector.broadcast %cst_94 : f32 to vector<16x256xf32>
    %326 = arith.mulf %325, %324 : vector<16x256xf32>
    %cst_95 = arith.constant 1.45315206 : f32
    %327 = vector.broadcast %cst_95 : f32 to vector<16x256xf32>
    %328 = arith.subf %326, %327 : vector<16x256xf32>
    %329 = arith.mulf %328, %324 : vector<16x256xf32>
    %cst_96 = arith.constant 1.42141378 : f32
    %330 = vector.broadcast %cst_96 : f32 to vector<16x256xf32>
    %331 = arith.addf %329, %330 : vector<16x256xf32>
    %332 = arith.mulf %331, %324 : vector<16x256xf32>
    %cst_97 = arith.constant 0.284496725 : f32
    %333 = vector.broadcast %cst_97 : f32 to vector<16x256xf32>
    %334 = arith.subf %332, %333 : vector<16x256xf32>
    %335 = arith.mulf %334, %324 : vector<16x256xf32>
    %cst_98 = arith.constant 0.254829586 : f32
    %336 = vector.broadcast %cst_98 : f32 to vector<16x256xf32>
    %337 = arith.addf %335, %336 : vector<16x256xf32>
    %338 = arith.mulf %337, %324 : vector<16x256xf32>
    %cst_99 = arith.constant 0.000000e+00 : f32
    %339 = vector.broadcast %cst_99 : f32 to vector<16x256xf32>
    %340 = arith.subf %339, %318 : vector<16x256xf32>
    %341 = arith.mulf %340, %318 : vector<16x256xf32>
    %342 = math.exp %341 : vector<16x256xf32>
    %343 = arith.mulf %338, %342 : vector<16x256xf32>
    %cst_100 = arith.constant 1.000000e+00 : f32
    %344 = vector.broadcast %cst_100 : f32 to vector<16x256xf32>
    %345 = arith.subf %344, %343 : vector<16x256xf32>
    %cst_101 = arith.constant 0.000000e+00 : f32
    %346 = vector.broadcast %cst_101 : f32 to vector<16x256xf32>
    %347 = arith.cmpf oge, %317, %346 : vector<16x256xf32>
    %cst_102 = arith.constant 0.000000e+00 : f32
    %348 = vector.broadcast %cst_102 : f32 to vector<16x256xf32>
    %349 = arith.subf %348, %345 : vector<16x256xf32>
    %350 = arith.select %347, %345, %349 : vector<16x256xi1>, vector<16x256xf32>
    %cst_103 = arith.constant 1.000000e+00 : f32
    %351 = vector.broadcast %cst_103 : f32 to vector<16x256xf32>
    %352 = arith.addf %351, %350 : vector<16x256xf32>
    %353 = arith.mulf %315, %352 : vector<16x256xf32>
    %354 = arith.truncf %353 : vector<16x256xf32> to vector<16x256xbf16>
    %355 = vector.extract_strided_slice %47 {offsets = [1, 0, 0], sizes = [1, 256, 64], strides = [1, 1, 1]} : vector<2x256x64xbf16> to vector<1x256x64xbf16>
    %356 = vector.shape_cast %355 : vector<1x256x64xbf16> to vector<256x64xbf16>
    %cst_104 = arith.constant dense<0.000000e+00> : vector<16x64xf32>
    %357 = tpu.matmul %354, %356, %cst_104 {dimension_numbers = #tpu.dot_dimension_numbers<[1], [0], [0], [1], [0, 0, 1, 1], [], []>} : vector<16x256xbf16>, vector<256x64xbf16>, vector<16x64xf32> -> vector<16x64xf32>
    %358 = arith.addf %281, %357 : vector<16x64xf32>
    %359 = vector.extract_strided_slice %0 {offsets = [15, 0], sizes = [1, 64], strides = [1, 1]} : vector<16x64xf32> to vector<1x64xf32>
    %360 = vector.broadcast %359 : vector<1x64xf32> to vector<16x64xf32>
    %361 = arith.addf %358, %360 : vector<16x64xf32>
    %362 = tpu.iota {dimensions = array<i32: 0>} : vector<2x16xi32>
    %363 = tpu.iota {dimensions = array<i32: 1>} : vector<2x16xi32>
    %c8_i32_105 = arith.constant 8 : i32
    %364 = vector.broadcast %c8_i32_105 : i32 to vector<2x16xi32>
    %365 = arith.muli %362, %364 : vector<2x16xi32>
    %366 = arith.cmpi eq, %363, %365 : vector<2x16xi32>
    %367 = arith.extui %366 : vector<2x16xi1> to vector<2x16xi32>
    %368 = arith.sitofp %367 : vector<2x16xi32> to vector<2x16xf32>
    %cst_106 = arith.constant dense<0.000000e+00> : vector<2x64xf32>
    %369 = tpu.matmul %368, %361, %cst_106 {dimension_numbers = #tpu.dot_dimension_numbers<[1], [0], [0], [1], [0, 0, 1, 1], [], []>} : vector<2x16xf32>, vector<16x64xf32>, vector<2x64xf32> -> vector<2x64xf32>
    %370 = vector.extract_strided_slice %0 {offsets = [2, 0], sizes = [1, 64], strides = [1, 1]} : vector<16x64xf32> to vector<1x64xf32>
    %371 = vector.extract_strided_slice %0 {offsets = [3, 0], sizes = [1, 64], strides = [1, 1]} : vector<16x64xf32> to vector<1x64xf32>
    %cst_107 = arith.constant dense<0.000000e+00> : vector<2xf32>
    %372 = vector.multi_reduction <add>, %369, %cst_107 [1] : vector<2x64xf32> to vector<2xf32>
    %373 = vector.shape_cast %372 : vector<2xf32> to vector<2x1xf32>
    %cst_108 = arith.constant 6.400000e+01 : f32
    %374 = vector.broadcast %cst_108 : f32 to vector<2x1xf32>
    %375 = arith.divf %373, %374 : vector<2x1xf32>
    %376 = vector.broadcast %375 : vector<2x1xf32> to vector<2x64xf32>
    %377 = arith.subf %369, %376 : vector<2x64xf32>
    %378 = arith.mulf %377, %377 : vector<2x64xf32>
    %cst_109 = arith.constant dense<0.000000e+00> : vector<2xf32>
    %379 = vector.multi_reduction <add>, %378, %cst_109 [1] : vector<2x64xf32> to vector<2xf32>
    %380 = vector.shape_cast %379 : vector<2xf32> to vector<2x1xf32>
    %cst_110 = arith.constant 6.400000e+01 : f32
    %381 = vector.broadcast %cst_110 : f32 to vector<2x1xf32>
    %382 = arith.divf %380, %381 : vector<2x1xf32>
    %383 = vector.broadcast %375 : vector<2x1xf32> to vector<2x64xf32>
    %384 = arith.subf %369, %383 : vector<2x64xf32>
    %cst_111 = arith.constant 9.99999974E-6 : f32
    %385 = vector.broadcast %cst_111 : f32 to vector<2x1xf32>
    %386 = arith.addf %382, %385 : vector<2x1xf32>
    %387 = math.rsqrt %386 : vector<2x1xf32>
    %388 = vector.broadcast %387 : vector<2x1xf32> to vector<2x64xf32>
    %389 = arith.mulf %384, %388 : vector<2x64xf32>
    %390 = vector.broadcast %370 : vector<1x64xf32> to vector<2x64xf32>
    %391 = arith.mulf %389, %390 : vector<2x64xf32>
    %392 = vector.broadcast %371 : vector<1x64xf32> to vector<2x64xf32>
    %393 = arith.addf %391, %392 : vector<2x64xf32>
    %394 = arith.truncf %393 : vector<2x64xf32> to vector<2x64xbf16>
    %c0_112 = arith.constant 0 : index
    %c0_113 = arith.constant 0 : index
    %395 = vector.load %arg9[%c0_112, %c0_113] : memref<64x64xbf16, #tpu.memory_space<vmem>>, vector<64x64xbf16>
    %cst_114 = arith.constant dense<0.000000e+00> : vector<2x64xf32>
    %396 = tpu.matmul %394, %395, %cst_114 {dimension_numbers = #tpu.dot_dimension_numbers<[1], [0], [0], [1], [0, 0, 1, 1], [], []>} : vector<2x64xbf16>, vector<64x64xbf16>, vector<2x64xf32> -> vector<2x64xf32>
    %397 = arith.mulf %396, %396 : vector<2x64xf32>
    %cst_115 = arith.constant dense<0.000000e+00> : vector<2xf32>
    %398 = vector.multi_reduction <add>, %397, %cst_115 [1] : vector<2x64xf32> to vector<2xf32>
    %399 = vector.shape_cast %398 : vector<2xf32> to vector<2x1xf32>
    %400 = math.sqrt %399 : vector<2x1xf32>
    %cst_116 = arith.constant 9.99999996E-13 : f32
    %401 = vector.broadcast %cst_116 : f32 to vector<2x1xf32>
    %402 = arith.maximumf %400, %401 : vector<2x1xf32>
    %403 = vector.broadcast %402 : vector<2x1xf32> to vector<2x64xf32>
    %404 = arith.divf %396, %403 : vector<2x64xf32>
    %c0_117 = arith.constant 0 : index
    %c0_118 = arith.constant 0 : index
    %405 = vector.load %arg12[%c0_117, %c0_118] : memref<14x64xf32, #tpu.memory_space<vmem>>, vector<14x64xf32>
    %c0_119 = arith.constant 0 : index
    %c0_120 = arith.constant 0 : index
    %406 = vector.load %arg10[%c0_119, %c0_120] : memref<16x64xf32, #tpu.memory_space<vmem>>, vector<16x64xf32>
    %407 = tpu.iota {dimensions = array<i32: 0>} : vector<16x16xi32>
    %408 = tpu.iota {dimensions = array<i32: 1>} : vector<16x16xi32>
    %409 = arith.xori %407, %408 : vector<16x16xi32>
    %c8_i32_121 = arith.constant 8 : i32
    %410 = vector.broadcast %c8_i32_121 : i32 to vector<16x16xi32>
    %411 = arith.cmpi slt, %409, %410 : vector<16x16xi32>
    %c7_i32_122 = arith.constant 7 : i32
    %412 = vector.broadcast %c7_i32_122 : i32 to vector<16x16xi32>
    %413 = arith.andi %407, %412 : vector<16x16xi32>
    %c7_i32_123 = arith.constant 7 : i32
    %414 = vector.broadcast %c7_i32_123 : i32 to vector<16x16xi32>
    %415 = arith.andi %408, %414 : vector<16x16xi32>
    %416 = arith.cmpi sle, %415, %413 : vector<16x16xi32>
    %417 = arith.andi %411, %416 : vector<16x16xi1>
    %cst_124 = arith.constant 0.000000e+00 : f32
    %cst_125 = arith.constant -1.000000e+30 : f32
    %418 = vector.broadcast %cst_124 : f32 to vector<16x16xf32>
    %419 = vector.broadcast %cst_125 : f32 to vector<16x16xf32>
    %420 = arith.select %417, %418, %419 : vector<16x16xi1>, vector<16x16xf32>
    %c0_126 = arith.constant 0 : index
    %c0_127 = arith.constant 0 : index
    %c0_128 = arith.constant 0 : index
    %421 = vector.load %arg13[%c0_126, %c0_127, %c0_128] : memref<2x2x768xf32, #tpu.memory_space<vmem>>, vector<2x2x768xf32>
    %c0_129 = arith.constant 0 : index
    %c0_130 = arith.constant 0 : index
    %c0_131 = arith.constant 0 : index
    %422 = vector.load %arg14[%c0_129, %c0_130, %c0_131] : memref<2x64x768xbf16, #tpu.memory_space<vmem>>, vector<2x64x768xbf16>
    %c0_132 = arith.constant 0 : index
    %c0_133 = arith.constant 0 : index
    %c0_134 = arith.constant 0 : index
    %423 = vector.load %arg15[%c0_132, %c0_133, %c0_134] : memref<2x256x64xbf16, #tpu.memory_space<vmem>>, vector<2x256x64xbf16>
    %c0_135 = arith.constant 0 : index
    %c0_136 = arith.constant 0 : index
    %c0_137 = arith.constant 0 : index
    %424 = vector.load %arg16[%c0_135, %c0_136, %c0_137] : memref<2x64x256xbf16, #tpu.memory_space<vmem>>, vector<2x64x256xbf16>
    %c0_138 = arith.constant 0 : index
    %c0_139 = arith.constant 0 : index
    %c0_140 = arith.constant 0 : index
    %425 = vector.load %arg17[%c0_138, %c0_139, %c0_140] : memref<2x256x64xbf16, #tpu.memory_space<vmem>>, vector<2x256x64xbf16>
    %426 = vector.extract_strided_slice %405 {offsets = [2, 0], sizes = [1, 64], strides = [1, 1]} : vector<14x64xf32> to vector<1x64xf32>
    %427 = vector.extract_strided_slice %405 {offsets = [3, 0], sizes = [1, 64], strides = [1, 1]} : vector<14x64xf32> to vector<1x64xf32>
    %cst_141 = arith.constant dense<0.000000e+00> : vector<16xf32>
    %428 = vector.multi_reduction <add>, %406, %cst_141 [1] : vector<16x64xf32> to vector<16xf32>
    %429 = vector.shape_cast %428 : vector<16xf32> to vector<16x1xf32>
    %cst_142 = arith.constant 6.400000e+01 : f32
    %430 = vector.broadcast %cst_142 : f32 to vector<16x1xf32>
    %431 = arith.divf %429, %430 : vector<16x1xf32>
    %432 = vector.broadcast %431 : vector<16x1xf32> to vector<16x64xf32>
    %433 = arith.subf %406, %432 : vector<16x64xf32>
    %434 = arith.mulf %433, %433 : vector<16x64xf32>
    %cst_143 = arith.constant dense<0.000000e+00> : vector<16xf32>
    %435 = vector.multi_reduction <add>, %434, %cst_143 [1] : vector<16x64xf32> to vector<16xf32>
    %436 = vector.shape_cast %435 : vector<16xf32> to vector<16x1xf32>
    %cst_144 = arith.constant 6.400000e+01 : f32
    %437 = vector.broadcast %cst_144 : f32 to vector<16x1xf32>
    %438 = arith.divf %436, %437 : vector<16x1xf32>
    %439 = vector.broadcast %431 : vector<16x1xf32> to vector<16x64xf32>
    %440 = arith.subf %406, %439 : vector<16x64xf32>
    %cst_145 = arith.constant 9.99999974E-6 : f32
    %441 = vector.broadcast %cst_145 : f32 to vector<16x1xf32>
    %442 = arith.addf %438, %441 : vector<16x1xf32>
    %443 = math.rsqrt %442 : vector<16x1xf32>
    %444 = vector.broadcast %443 : vector<16x1xf32> to vector<16x64xf32>
    %445 = arith.mulf %440, %444 : vector<16x64xf32>
    %446 = vector.broadcast %426 : vector<1x64xf32> to vector<16x64xf32>
    %447 = arith.mulf %445, %446 : vector<16x64xf32>
    %448 = vector.broadcast %427 : vector<1x64xf32> to vector<16x64xf32>
    %449 = arith.addf %447, %448 : vector<16x64xf32>
    %450 = vector.extract_strided_slice %422 {offsets = [0, 0, 0], sizes = [1, 64, 768], strides = [1, 1, 1]} : vector<2x64x768xbf16> to vector<1x64x768xbf16>
    %451 = vector.shape_cast %450 : vector<1x64x768xbf16> to vector<64x768xbf16>
    %452 = vector.extract_strided_slice %421 {offsets = [0, 0, 0], sizes = [1, 1, 768], strides = [1, 1, 1]} : vector<2x2x768xf32> to vector<1x1x768xf32>
    %453 = vector.shape_cast %452 : vector<1x1x768xf32> to vector<1x768xf32>
    %454 = vector.extract_strided_slice %423 {offsets = [0, 0, 0], sizes = [1, 256, 64], strides = [1, 1, 1]} : vector<2x256x64xbf16> to vector<1x256x64xbf16>
    %455 = vector.shape_cast %454 : vector<1x256x64xbf16> to vector<256x64xbf16>
    %456 = vector.extract_strided_slice %405 {offsets = [4, 0], sizes = [1, 64], strides = [1, 1]} : vector<14x64xf32> to vector<1x64xf32>
    %457 = arith.truncf %449 : vector<16x64xf32> to vector<16x64xbf16>
    %cst_146 = arith.constant dense<0.000000e+00> : vector<16x768xf32>
    %458 = tpu.matmul %457, %451, %cst_146 {dimension_numbers = #tpu.dot_dimension_numbers<[1], [0], [0], [1], [0, 0, 1, 1], [], []>} : vector<16x64xbf16>, vector<64x768xbf16>, vector<16x768xf32> -> vector<16x768xf32>
    %459 = vector.broadcast %453 : vector<1x768xf32> to vector<16x768xf32>
    %460 = arith.addf %458, %459 : vector<16x768xf32>
    %461 = vector.extract_strided_slice %460 {offsets = [0, 0], sizes = [16, 128], strides = [1, 1]} : vector<16x768xf32> to vector<16x128xf32>
    %462 = vector.extract_strided_slice %460 {offsets = [0, 256], sizes = [16, 128], strides = [1, 1]} : vector<16x768xf32> to vector<16x128xf32>
    %463 = vector.extract_strided_slice %460 {offsets = [0, 512], sizes = [16, 128], strides = [1, 1]} : vector<16x768xf32> to vector<16x128xf32>
    %cst_147 = arith.constant dense<0.000000e+00> : vector<16x16xf32>
    %464 = tpu.matmul %461, %462, %cst_147 {dimension_numbers = #tpu.dot_dimension_numbers<[1], [1], [0], [0], [0, 0, 1, 0], [], []>} : vector<16x128xf32>, vector<16x128xf32>, vector<16x16xf32> -> vector<16x16xf32>
    %465 = arith.addf %464, %420 : vector<16x16xf32>
    %cst_148 = arith.constant dense<0xFF800000> : vector<16xf32>
    %466 = vector.multi_reduction <maximumf>, %465, %cst_148 [1] : vector<16x16xf32> to vector<16xf32>
    %467 = vector.shape_cast %466 : vector<16xf32> to vector<16x1xf32>
    %468 = vector.broadcast %467 : vector<16x1xf32> to vector<16x16xf32>
    %469 = arith.subf %465, %468 : vector<16x16xf32>
    %470 = math.exp %469 : vector<16x16xf32>
    %cst_149 = arith.constant dense<0.000000e+00> : vector<16xf32>
    %471 = vector.multi_reduction <add>, %470, %cst_149 [1] : vector<16x16xf32> to vector<16xf32>
    %472 = vector.shape_cast %471 : vector<16xf32> to vector<16x1xf32>
    %473 = tpu.reciprocal %472 {approx = true} : vector<16x1xf32> -> vector<16x1xf32>
    %474 = vector.broadcast %473 : vector<16x1xf32> to vector<16x16xf32>
    %475 = arith.mulf %470, %474 : vector<16x16xf32>
    %cst_150 = arith.constant dense<0.000000e+00> : vector<16x128xf32>
    %476 = tpu.matmul %475, %463, %cst_150 {dimension_numbers = #tpu.dot_dimension_numbers<[1], [0], [0], [1], [0, 0, 1, 1], [], []>} : vector<16x16xf32>, vector<16x128xf32>, vector<16x128xf32> -> vector<16x128xf32>
    %477 = arith.truncf %476 : vector<16x128xf32> to vector<16x128xbf16>
    %478 = vector.extract_strided_slice %455 {offsets = [0, 0], sizes = [128, 64], strides = [1, 1]} : vector<256x64xbf16> to vector<128x64xbf16>
    %cst_151 = arith.constant dense<0.000000e+00> : vector<16x64xf32>
    %479 = tpu.matmul %477, %478, %cst_151 {dimension_numbers = #tpu.dot_dimension_numbers<[1], [0], [0], [1], [0, 0, 1, 1], [], []>} : vector<16x128xbf16>, vector<128x64xbf16>, vector<16x64xf32> -> vector<16x64xf32>
    %480 = vector.extract_strided_slice %460 {offsets = [0, 128], sizes = [16, 128], strides = [1, 1]} : vector<16x768xf32> to vector<16x128xf32>
    %481 = vector.extract_strided_slice %460 {offsets = [0, 384], sizes = [16, 128], strides = [1, 1]} : vector<16x768xf32> to vector<16x128xf32>
    %482 = vector.extract_strided_slice %460 {offsets = [0, 640], sizes = [16, 128], strides = [1, 1]} : vector<16x768xf32> to vector<16x128xf32>
    %cst_152 = arith.constant dense<0.000000e+00> : vector<16x16xf32>
    %483 = tpu.matmul %480, %481, %cst_152 {dimension_numbers = #tpu.dot_dimension_numbers<[1], [1], [0], [0], [0, 0, 1, 0], [], []>} : vector<16x128xf32>, vector<16x128xf32>, vector<16x16xf32> -> vector<16x16xf32>
    %484 = arith.addf %483, %420 : vector<16x16xf32>
    %cst_153 = arith.constant dense<0xFF800000> : vector<16xf32>
    %485 = vector.multi_reduction <maximumf>, %484, %cst_153 [1] : vector<16x16xf32> to vector<16xf32>
    %486 = vector.shape_cast %485 : vector<16xf32> to vector<16x1xf32>
    %487 = vector.broadcast %486 : vector<16x1xf32> to vector<16x16xf32>
    %488 = arith.subf %484, %487 : vector<16x16xf32>
    %489 = math.exp %488 : vector<16x16xf32>
    %cst_154 = arith.constant dense<0.000000e+00> : vector<16xf32>
    %490 = vector.multi_reduction <add>, %489, %cst_154 [1] : vector<16x16xf32> to vector<16xf32>
    %491 = vector.shape_cast %490 : vector<16xf32> to vector<16x1xf32>
    %492 = tpu.reciprocal %491 {approx = true} : vector<16x1xf32> -> vector<16x1xf32>
    %493 = vector.broadcast %492 : vector<16x1xf32> to vector<16x16xf32>
    %494 = arith.mulf %489, %493 : vector<16x16xf32>
    %cst_155 = arith.constant dense<0.000000e+00> : vector<16x128xf32>
    %495 = tpu.matmul %494, %482, %cst_155 {dimension_numbers = #tpu.dot_dimension_numbers<[1], [0], [0], [1], [0, 0, 1, 1], [], []>} : vector<16x16xf32>, vector<16x128xf32>, vector<16x128xf32> -> vector<16x128xf32>
    %496 = arith.truncf %495 : vector<16x128xf32> to vector<16x128xbf16>
    %497 = vector.extract_strided_slice %455 {offsets = [128, 0], sizes = [128, 64], strides = [1, 1]} : vector<256x64xbf16> to vector<128x64xbf16>
    %cst_156 = arith.constant dense<0.000000e+00> : vector<16x64xf32>
    %498 = tpu.matmul %496, %497, %cst_156 {dimension_numbers = #tpu.dot_dimension_numbers<[1], [0], [0], [1], [0, 0, 1, 1], [], []>} : vector<16x128xbf16>, vector<128x64xbf16>, vector<16x64xf32> -> vector<16x64xf32>
    %499 = arith.addf %479, %498 : vector<16x64xf32>
    %500 = vector.broadcast %456 : vector<1x64xf32> to vector<16x64xf32>
    %501 = arith.addf %499, %500 : vector<16x64xf32>
    %502 = arith.addf %406, %501 : vector<16x64xf32>
    %503 = vector.extract_strided_slice %405 {offsets = [5, 0], sizes = [1, 64], strides = [1, 1]} : vector<14x64xf32> to vector<1x64xf32>
    %504 = vector.extract_strided_slice %405 {offsets = [6, 0], sizes = [1, 64], strides = [1, 1]} : vector<14x64xf32> to vector<1x64xf32>
    %cst_157 = arith.constant dense<0.000000e+00> : vector<16xf32>
    %505 = vector.multi_reduction <add>, %502, %cst_157 [1] : vector<16x64xf32> to vector<16xf32>
    %506 = vector.shape_cast %505 : vector<16xf32> to vector<16x1xf32>
    %cst_158 = arith.constant 6.400000e+01 : f32
    %507 = vector.broadcast %cst_158 : f32 to vector<16x1xf32>
    %508 = arith.divf %506, %507 : vector<16x1xf32>
    %509 = vector.broadcast %508 : vector<16x1xf32> to vector<16x64xf32>
    %510 = arith.subf %502, %509 : vector<16x64xf32>
    %511 = arith.mulf %510, %510 : vector<16x64xf32>
    %cst_159 = arith.constant dense<0.000000e+00> : vector<16xf32>
    %512 = vector.multi_reduction <add>, %511, %cst_159 [1] : vector<16x64xf32> to vector<16xf32>
    %513 = vector.shape_cast %512 : vector<16xf32> to vector<16x1xf32>
    %cst_160 = arith.constant 6.400000e+01 : f32
    %514 = vector.broadcast %cst_160 : f32 to vector<16x1xf32>
    %515 = arith.divf %513, %514 : vector<16x1xf32>
    %516 = vector.broadcast %508 : vector<16x1xf32> to vector<16x64xf32>
    %517 = arith.subf %502, %516 : vector<16x64xf32>
    %cst_161 = arith.constant 9.99999974E-6 : f32
    %518 = vector.broadcast %cst_161 : f32 to vector<16x1xf32>
    %519 = arith.addf %515, %518 : vector<16x1xf32>
    %520 = math.rsqrt %519 : vector<16x1xf32>
    %521 = vector.broadcast %520 : vector<16x1xf32> to vector<16x64xf32>
    %522 = arith.mulf %517, %521 : vector<16x64xf32>
    %523 = vector.broadcast %503 : vector<1x64xf32> to vector<16x64xf32>
    %524 = arith.mulf %522, %523 : vector<16x64xf32>
    %525 = vector.broadcast %504 : vector<1x64xf32> to vector<16x64xf32>
    %526 = arith.addf %524, %525 : vector<16x64xf32>
    %527 = arith.truncf %526 : vector<16x64xf32> to vector<16x64xbf16>
    %528 = vector.extract_strided_slice %424 {offsets = [0, 0, 0], sizes = [1, 64, 256], strides = [1, 1, 1]} : vector<2x64x256xbf16> to vector<1x64x256xbf16>
    %529 = vector.shape_cast %528 : vector<1x64x256xbf16> to vector<64x256xbf16>
    %cst_162 = arith.constant dense<0.000000e+00> : vector<16x256xf32>
    %530 = tpu.matmul %527, %529, %cst_162 {dimension_numbers = #tpu.dot_dimension_numbers<[1], [0], [0], [1], [0, 0, 1, 1], [], []>} : vector<16x64xbf16>, vector<64x256xbf16>, vector<16x256xf32> -> vector<16x256xf32>
    %531 = vector.extract_strided_slice %421 {offsets = [0, 1, 0], sizes = [1, 1, 256], strides = [1, 1, 1]} : vector<2x2x768xf32> to vector<1x1x256xf32>
    %532 = vector.shape_cast %531 : vector<1x1x256xf32> to vector<1x256xf32>
    %533 = vector.broadcast %532 : vector<1x256xf32> to vector<16x256xf32>
    %534 = arith.addf %530, %533 : vector<16x256xf32>
    %cst_163 = arith.constant 5.000000e-01 : f32
    %535 = vector.broadcast %cst_163 : f32 to vector<16x256xf32>
    %536 = arith.mulf %535, %534 : vector<16x256xf32>
    %cst_164 = arith.constant 0.707106769 : f32
    %537 = vector.broadcast %cst_164 : f32 to vector<16x256xf32>
    %538 = arith.mulf %534, %537 : vector<16x256xf32>
    %539 = math.absf %538 : vector<16x256xf32>
    %cst_165 = arith.constant 0.327591091 : f32
    %540 = vector.broadcast %cst_165 : f32 to vector<16x256xf32>
    %541 = arith.mulf %540, %539 : vector<16x256xf32>
    %cst_166 = arith.constant 1.000000e+00 : f32
    %542 = vector.broadcast %cst_166 : f32 to vector<16x256xf32>
    %543 = arith.addf %542, %541 : vector<16x256xf32>
    %cst_167 = arith.constant 1.000000e+00 : f32
    %544 = vector.broadcast %cst_167 : f32 to vector<16x256xf32>
    %545 = arith.divf %544, %543 : vector<16x256xf32>
    %cst_168 = arith.constant 1.06140542 : f32
    %546 = vector.broadcast %cst_168 : f32 to vector<16x256xf32>
    %547 = arith.mulf %546, %545 : vector<16x256xf32>
    %cst_169 = arith.constant 1.45315206 : f32
    %548 = vector.broadcast %cst_169 : f32 to vector<16x256xf32>
    %549 = arith.subf %547, %548 : vector<16x256xf32>
    %550 = arith.mulf %549, %545 : vector<16x256xf32>
    %cst_170 = arith.constant 1.42141378 : f32
    %551 = vector.broadcast %cst_170 : f32 to vector<16x256xf32>
    %552 = arith.addf %550, %551 : vector<16x256xf32>
    %553 = arith.mulf %552, %545 : vector<16x256xf32>
    %cst_171 = arith.constant 0.284496725 : f32
    %554 = vector.broadcast %cst_171 : f32 to vector<16x256xf32>
    %555 = arith.subf %553, %554 : vector<16x256xf32>
    %556 = arith.mulf %555, %545 : vector<16x256xf32>
    %cst_172 = arith.constant 0.254829586 : f32
    %557 = vector.broadcast %cst_172 : f32 to vector<16x256xf32>
    %558 = arith.addf %556, %557 : vector<16x256xf32>
    %559 = arith.mulf %558, %545 : vector<16x256xf32>
    %cst_173 = arith.constant 0.000000e+00 : f32
    %560 = vector.broadcast %cst_173 : f32 to vector<16x256xf32>
    %561 = arith.subf %560, %539 : vector<16x256xf32>
    %562 = arith.mulf %561, %539 : vector<16x256xf32>
    %563 = math.exp %562 : vector<16x256xf32>
    %564 = arith.mulf %559, %563 : vector<16x256xf32>
    %cst_174 = arith.constant 1.000000e+00 : f32
    %565 = vector.broadcast %cst_174 : f32 to vector<16x256xf32>
    %566 = arith.subf %565, %564 : vector<16x256xf32>
    %cst_175 = arith.constant 0.000000e+00 : f32
    %567 = vector.broadcast %cst_175 : f32 to vector<16x256xf32>
    %568 = arith.cmpf oge, %538, %567 : vector<16x256xf32>
    %cst_176 = arith.constant 0.000000e+00 : f32
    %569 = vector.broadcast %cst_176 : f32 to vector<16x256xf32>
    %570 = arith.subf %569, %566 : vector<16x256xf32>
    %571 = arith.select %568, %566, %570 : vector<16x256xi1>, vector<16x256xf32>
    %cst_177 = arith.constant 1.000000e+00 : f32
    %572 = vector.broadcast %cst_177 : f32 to vector<16x256xf32>
    %573 = arith.addf %572, %571 : vector<16x256xf32>
    %574 = arith.mulf %536, %573 : vector<16x256xf32>
    %575 = arith.truncf %574 : vector<16x256xf32> to vector<16x256xbf16>
    %576 = vector.extract_strided_slice %425 {offsets = [0, 0, 0], sizes = [1, 256, 64], strides = [1, 1, 1]} : vector<2x256x64xbf16> to vector<1x256x64xbf16>
    %577 = vector.shape_cast %576 : vector<1x256x64xbf16> to vector<256x64xbf16>
    %cst_178 = arith.constant dense<0.000000e+00> : vector<16x64xf32>
    %578 = tpu.matmul %575, %577, %cst_178 {dimension_numbers = #tpu.dot_dimension_numbers<[1], [0], [0], [1], [0, 0, 1, 1], [], []>} : vector<16x256xbf16>, vector<256x64xbf16>, vector<16x64xf32> -> vector<16x64xf32>
    %579 = arith.addf %502, %578 : vector<16x64xf32>
    %580 = vector.extract_strided_slice %405 {offsets = [7, 0], sizes = [1, 64], strides = [1, 1]} : vector<14x64xf32> to vector<1x64xf32>
    %581 = vector.broadcast %580 : vector<1x64xf32> to vector<16x64xf32>
    %582 = arith.addf %579, %581 : vector<16x64xf32>
    %583 = vector.extract_strided_slice %405 {offsets = [8, 0], sizes = [1, 64], strides = [1, 1]} : vector<14x64xf32> to vector<1x64xf32>
    %584 = vector.extract_strided_slice %405 {offsets = [9, 0], sizes = [1, 64], strides = [1, 1]} : vector<14x64xf32> to vector<1x64xf32>
    %cst_179 = arith.constant dense<0.000000e+00> : vector<16xf32>
    %585 = vector.multi_reduction <add>, %582, %cst_179 [1] : vector<16x64xf32> to vector<16xf32>
    %586 = vector.shape_cast %585 : vector<16xf32> to vector<16x1xf32>
    %cst_180 = arith.constant 6.400000e+01 : f32
    %587 = vector.broadcast %cst_180 : f32 to vector<16x1xf32>
    %588 = arith.divf %586, %587 : vector<16x1xf32>
    %589 = vector.broadcast %588 : vector<16x1xf32> to vector<16x64xf32>
    %590 = arith.subf %582, %589 : vector<16x64xf32>
    %591 = arith.mulf %590, %590 : vector<16x64xf32>
    %cst_181 = arith.constant dense<0.000000e+00> : vector<16xf32>
    %592 = vector.multi_reduction <add>, %591, %cst_181 [1] : vector<16x64xf32> to vector<16xf32>
    %593 = vector.shape_cast %592 : vector<16xf32> to vector<16x1xf32>
    %cst_182 = arith.constant 6.400000e+01 : f32
    %594 = vector.broadcast %cst_182 : f32 to vector<16x1xf32>
    %595 = arith.divf %593, %594 : vector<16x1xf32>
    %596 = vector.broadcast %588 : vector<16x1xf32> to vector<16x64xf32>
    %597 = arith.subf %582, %596 : vector<16x64xf32>
    %cst_183 = arith.constant 9.99999974E-6 : f32
    %598 = vector.broadcast %cst_183 : f32 to vector<16x1xf32>
    %599 = arith.addf %595, %598 : vector<16x1xf32>
    %600 = math.rsqrt %599 : vector<16x1xf32>
    %601 = vector.broadcast %600 : vector<16x1xf32> to vector<16x64xf32>
    %602 = arith.mulf %597, %601 : vector<16x64xf32>
    %603 = vector.broadcast %583 : vector<1x64xf32> to vector<16x64xf32>
    %604 = arith.mulf %602, %603 : vector<16x64xf32>
    %605 = vector.broadcast %584 : vector<1x64xf32> to vector<16x64xf32>
    %606 = arith.addf %604, %605 : vector<16x64xf32>
    %607 = vector.extract_strided_slice %422 {offsets = [1, 0, 0], sizes = [1, 64, 768], strides = [1, 1, 1]} : vector<2x64x768xbf16> to vector<1x64x768xbf16>
    %608 = vector.shape_cast %607 : vector<1x64x768xbf16> to vector<64x768xbf16>
    %609 = vector.extract_strided_slice %421 {offsets = [1, 0, 0], sizes = [1, 1, 768], strides = [1, 1, 1]} : vector<2x2x768xf32> to vector<1x1x768xf32>
    %610 = vector.shape_cast %609 : vector<1x1x768xf32> to vector<1x768xf32>
    %611 = vector.extract_strided_slice %423 {offsets = [1, 0, 0], sizes = [1, 256, 64], strides = [1, 1, 1]} : vector<2x256x64xbf16> to vector<1x256x64xbf16>
    %612 = vector.shape_cast %611 : vector<1x256x64xbf16> to vector<256x64xbf16>
    %613 = vector.extract_strided_slice %405 {offsets = [10, 0], sizes = [1, 64], strides = [1, 1]} : vector<14x64xf32> to vector<1x64xf32>
    %614 = arith.truncf %606 : vector<16x64xf32> to vector<16x64xbf16>
    %cst_184 = arith.constant dense<0.000000e+00> : vector<16x768xf32>
    %615 = tpu.matmul %614, %608, %cst_184 {dimension_numbers = #tpu.dot_dimension_numbers<[1], [0], [0], [1], [0, 0, 1, 1], [], []>} : vector<16x64xbf16>, vector<64x768xbf16>, vector<16x768xf32> -> vector<16x768xf32>
    %616 = vector.broadcast %610 : vector<1x768xf32> to vector<16x768xf32>
    %617 = arith.addf %615, %616 : vector<16x768xf32>
    %618 = vector.extract_strided_slice %617 {offsets = [0, 0], sizes = [16, 128], strides = [1, 1]} : vector<16x768xf32> to vector<16x128xf32>
    %619 = vector.extract_strided_slice %617 {offsets = [0, 256], sizes = [16, 128], strides = [1, 1]} : vector<16x768xf32> to vector<16x128xf32>
    %620 = vector.extract_strided_slice %617 {offsets = [0, 512], sizes = [16, 128], strides = [1, 1]} : vector<16x768xf32> to vector<16x128xf32>
    %cst_185 = arith.constant dense<0.000000e+00> : vector<16x16xf32>
    %621 = tpu.matmul %618, %619, %cst_185 {dimension_numbers = #tpu.dot_dimension_numbers<[1], [1], [0], [0], [0, 0, 1, 0], [], []>} : vector<16x128xf32>, vector<16x128xf32>, vector<16x16xf32> -> vector<16x16xf32>
    %622 = arith.addf %621, %420 : vector<16x16xf32>
    %cst_186 = arith.constant dense<0xFF800000> : vector<16xf32>
    %623 = vector.multi_reduction <maximumf>, %622, %cst_186 [1] : vector<16x16xf32> to vector<16xf32>
    %624 = vector.shape_cast %623 : vector<16xf32> to vector<16x1xf32>
    %625 = vector.broadcast %624 : vector<16x1xf32> to vector<16x16xf32>
    %626 = arith.subf %622, %625 : vector<16x16xf32>
    %627 = math.exp %626 : vector<16x16xf32>
    %cst_187 = arith.constant dense<0.000000e+00> : vector<16xf32>
    %628 = vector.multi_reduction <add>, %627, %cst_187 [1] : vector<16x16xf32> to vector<16xf32>
    %629 = vector.shape_cast %628 : vector<16xf32> to vector<16x1xf32>
    %630 = tpu.reciprocal %629 {approx = true} : vector<16x1xf32> -> vector<16x1xf32>
    %631 = vector.broadcast %630 : vector<16x1xf32> to vector<16x16xf32>
    %632 = arith.mulf %627, %631 : vector<16x16xf32>
    %cst_188 = arith.constant dense<0.000000e+00> : vector<16x128xf32>
    %633 = tpu.matmul %632, %620, %cst_188 {dimension_numbers = #tpu.dot_dimension_numbers<[1], [0], [0], [1], [0, 0, 1, 1], [], []>} : vector<16x16xf32>, vector<16x128xf32>, vector<16x128xf32> -> vector<16x128xf32>
    %634 = arith.truncf %633 : vector<16x128xf32> to vector<16x128xbf16>
    %635 = vector.extract_strided_slice %612 {offsets = [0, 0], sizes = [128, 64], strides = [1, 1]} : vector<256x64xbf16> to vector<128x64xbf16>
    %cst_189 = arith.constant dense<0.000000e+00> : vector<16x64xf32>
    %636 = tpu.matmul %634, %635, %cst_189 {dimension_numbers = #tpu.dot_dimension_numbers<[1], [0], [0], [1], [0, 0, 1, 1], [], []>} : vector<16x128xbf16>, vector<128x64xbf16>, vector<16x64xf32> -> vector<16x64xf32>
    %637 = vector.extract_strided_slice %617 {offsets = [0, 128], sizes = [16, 128], strides = [1, 1]} : vector<16x768xf32> to vector<16x128xf32>
    %638 = vector.extract_strided_slice %617 {offsets = [0, 384], sizes = [16, 128], strides = [1, 1]} : vector<16x768xf32> to vector<16x128xf32>
    %639 = vector.extract_strided_slice %617 {offsets = [0, 640], sizes = [16, 128], strides = [1, 1]} : vector<16x768xf32> to vector<16x128xf32>
    %cst_190 = arith.constant dense<0.000000e+00> : vector<16x16xf32>
    %640 = tpu.matmul %637, %638, %cst_190 {dimension_numbers = #tpu.dot_dimension_numbers<[1], [1], [0], [0], [0, 0, 1, 0], [], []>} : vector<16x128xf32>, vector<16x128xf32>, vector<16x16xf32> -> vector<16x16xf32>
    %641 = arith.addf %640, %420 : vector<16x16xf32>
    %cst_191 = arith.constant dense<0xFF800000> : vector<16xf32>
    %642 = vector.multi_reduction <maximumf>, %641, %cst_191 [1] : vector<16x16xf32> to vector<16xf32>
    %643 = vector.shape_cast %642 : vector<16xf32> to vector<16x1xf32>
    %644 = vector.broadcast %643 : vector<16x1xf32> to vector<16x16xf32>
    %645 = arith.subf %641, %644 : vector<16x16xf32>
    %646 = math.exp %645 : vector<16x16xf32>
    %cst_192 = arith.constant dense<0.000000e+00> : vector<16xf32>
    %647 = vector.multi_reduction <add>, %646, %cst_192 [1] : vector<16x16xf32> to vector<16xf32>
    %648 = vector.shape_cast %647 : vector<16xf32> to vector<16x1xf32>
    %649 = tpu.reciprocal %648 {approx = true} : vector<16x1xf32> -> vector<16x1xf32>
    %650 = vector.broadcast %649 : vector<16x1xf32> to vector<16x16xf32>
    %651 = arith.mulf %646, %650 : vector<16x16xf32>
    %cst_193 = arith.constant dense<0.000000e+00> : vector<16x128xf32>
    %652 = tpu.matmul %651, %639, %cst_193 {dimension_numbers = #tpu.dot_dimension_numbers<[1], [0], [0], [1], [0, 0, 1, 1], [], []>} : vector<16x16xf32>, vector<16x128xf32>, vector<16x128xf32> -> vector<16x128xf32>
    %653 = arith.truncf %652 : vector<16x128xf32> to vector<16x128xbf16>
    %654 = vector.extract_strided_slice %612 {offsets = [128, 0], sizes = [128, 64], strides = [1, 1]} : vector<256x64xbf16> to vector<128x64xbf16>
    %cst_194 = arith.constant dense<0.000000e+00> : vector<16x64xf32>
    %655 = tpu.matmul %653, %654, %cst_194 {dimension_numbers = #tpu.dot_dimension_numbers<[1], [0], [0], [1], [0, 0, 1, 1], [], []>} : vector<16x128xbf16>, vector<128x64xbf16>, vector<16x64xf32> -> vector<16x64xf32>
    %656 = arith.addf %636, %655 : vector<16x64xf32>
    %657 = vector.broadcast %613 : vector<1x64xf32> to vector<16x64xf32>
    %658 = arith.addf %656, %657 : vector<16x64xf32>
    %659 = arith.addf %582, %658 : vector<16x64xf32>
    %660 = vector.extract_strided_slice %405 {offsets = [11, 0], sizes = [1, 64], strides = [1, 1]} : vector<14x64xf32> to vector<1x64xf32>
    %661 = vector.extract_strided_slice %405 {offsets = [12, 0], sizes = [1, 64], strides = [1, 1]} : vector<14x64xf32> to vector<1x64xf32>
    %cst_195 = arith.constant dense<0.000000e+00> : vector<16xf32>
    %662 = vector.multi_reduction <add>, %659, %cst_195 [1] : vector<16x64xf32> to vector<16xf32>
    %663 = vector.shape_cast %662 : vector<16xf32> to vector<16x1xf32>
    %cst_196 = arith.constant 6.400000e+01 : f32
    %664 = vector.broadcast %cst_196 : f32 to vector<16x1xf32>
    %665 = arith.divf %663, %664 : vector<16x1xf32>
    %666 = vector.broadcast %665 : vector<16x1xf32> to vector<16x64xf32>
    %667 = arith.subf %659, %666 : vector<16x64xf32>
    %668 = arith.mulf %667, %667 : vector<16x64xf32>
    %cst_197 = arith.constant dense<0.000000e+00> : vector<16xf32>
    %669 = vector.multi_reduction <add>, %668, %cst_197 [1] : vector<16x64xf32> to vector<16xf32>
    %670 = vector.shape_cast %669 : vector<16xf32> to vector<16x1xf32>
    %cst_198 = arith.constant 6.400000e+01 : f32
    %671 = vector.broadcast %cst_198 : f32 to vector<16x1xf32>
    %672 = arith.divf %670, %671 : vector<16x1xf32>
    %673 = vector.broadcast %665 : vector<16x1xf32> to vector<16x64xf32>
    %674 = arith.subf %659, %673 : vector<16x64xf32>
    %cst_199 = arith.constant 9.99999974E-6 : f32
    %675 = vector.broadcast %cst_199 : f32 to vector<16x1xf32>
    %676 = arith.addf %672, %675 : vector<16x1xf32>
    %677 = math.rsqrt %676 : vector<16x1xf32>
    %678 = vector.broadcast %677 : vector<16x1xf32> to vector<16x64xf32>
    %679 = arith.mulf %674, %678 : vector<16x64xf32>
    %680 = vector.broadcast %660 : vector<1x64xf32> to vector<16x64xf32>
    %681 = arith.mulf %679, %680 : vector<16x64xf32>
    %682 = vector.broadcast %661 : vector<1x64xf32> to vector<16x64xf32>
    %683 = arith.addf %681, %682 : vector<16x64xf32>
    %684 = arith.truncf %683 : vector<16x64xf32> to vector<16x64xbf16>
    %685 = vector.extract_strided_slice %424 {offsets = [1, 0, 0], sizes = [1, 64, 256], strides = [1, 1, 1]} : vector<2x64x256xbf16> to vector<1x64x256xbf16>
    %686 = vector.shape_cast %685 : vector<1x64x256xbf16> to vector<64x256xbf16>
    %cst_200 = arith.constant dense<0.000000e+00> : vector<16x256xf32>
    %687 = tpu.matmul %684, %686, %cst_200 {dimension_numbers = #tpu.dot_dimension_numbers<[1], [0], [0], [1], [0, 0, 1, 1], [], []>} : vector<16x64xbf16>, vector<64x256xbf16>, vector<16x256xf32> -> vector<16x256xf32>
    %688 = vector.extract_strided_slice %421 {offsets = [1, 1, 0], sizes = [1, 1, 256], strides = [1, 1, 1]} : vector<2x2x768xf32> to vector<1x1x256xf32>
    %689 = vector.shape_cast %688 : vector<1x1x256xf32> to vector<1x256xf32>
    %690 = vector.broadcast %689 : vector<1x256xf32> to vector<16x256xf32>
    %691 = arith.addf %687, %690 : vector<16x256xf32>
    %cst_201 = arith.constant 5.000000e-01 : f32
    %692 = vector.broadcast %cst_201 : f32 to vector<16x256xf32>
    %693 = arith.mulf %692, %691 : vector<16x256xf32>
    %cst_202 = arith.constant 0.707106769 : f32
    %694 = vector.broadcast %cst_202 : f32 to vector<16x256xf32>
    %695 = arith.mulf %691, %694 : vector<16x256xf32>
    %696 = math.absf %695 : vector<16x256xf32>
    %cst_203 = arith.constant 0.327591091 : f32
    %697 = vector.broadcast %cst_203 : f32 to vector<16x256xf32>
    %698 = arith.mulf %697, %696 : vector<16x256xf32>
    %cst_204 = arith.constant 1.000000e+00 : f32
    %699 = vector.broadcast %cst_204 : f32 to vector<16x256xf32>
    %700 = arith.addf %699, %698 : vector<16x256xf32>
    %cst_205 = arith.constant 1.000000e+00 : f32
    %701 = vector.broadcast %cst_205 : f32 to vector<16x256xf32>
    %702 = arith.divf %701, %700 : vector<16x256xf32>
    %cst_206 = arith.constant 1.06140542 : f32
    %703 = vector.broadcast %cst_206 : f32 to vector<16x256xf32>
    %704 = arith.mulf %703, %702 : vector<16x256xf32>
    %cst_207 = arith.constant 1.45315206 : f32
    %705 = vector.broadcast %cst_207 : f32 to vector<16x256xf32>
    %706 = arith.subf %704, %705 : vector<16x256xf32>
    %707 = arith.mulf %706, %702 : vector<16x256xf32>
    %cst_208 = arith.constant 1.42141378 : f32
    %708 = vector.broadcast %cst_208 : f32 to vector<16x256xf32>
    %709 = arith.addf %707, %708 : vector<16x256xf32>
    %710 = arith.mulf %709, %702 : vector<16x256xf32>
    %cst_209 = arith.constant 0.284496725 : f32
    %711 = vector.broadcast %cst_209 : f32 to vector<16x256xf32>
    %712 = arith.subf %710, %711 : vector<16x256xf32>
    %713 = arith.mulf %712, %702 : vector<16x256xf32>
    %cst_210 = arith.constant 0.254829586 : f32
    %714 = vector.broadcast %cst_210 : f32 to vector<16x256xf32>
    %715 = arith.addf %713, %714 : vector<16x256xf32>
    %716 = arith.mulf %715, %702 : vector<16x256xf32>
    %cst_211 = arith.constant 0.000000e+00 : f32
    %717 = vector.broadcast %cst_211 : f32 to vector<16x256xf32>
    %718 = arith.subf %717, %696 : vector<16x256xf32>
    %719 = arith.mulf %718, %696 : vector<16x256xf32>
    %720 = math.exp %719 : vector<16x256xf32>
    %721 = arith.mulf %716, %720 : vector<16x256xf32>
    %cst_212 = arith.constant 1.000000e+00 : f32
    %722 = vector.broadcast %cst_212 : f32 to vector<16x256xf32>
    %723 = arith.subf %722, %721 : vector<16x256xf32>
    %cst_213 = arith.constant 0.000000e+00 : f32
    %724 = vector.broadcast %cst_213 : f32 to vector<16x256xf32>
    %725 = arith.cmpf oge, %695, %724 : vector<16x256xf32>
    %cst_214 = arith.constant 0.000000e+00 : f32
    %726 = vector.broadcast %cst_214 : f32 to vector<16x256xf32>
    %727 = arith.subf %726, %723 : vector<16x256xf32>
    %728 = arith.select %725, %723, %727 : vector<16x256xi1>, vector<16x256xf32>
    %cst_215 = arith.constant 1.000000e+00 : f32
    %729 = vector.broadcast %cst_215 : f32 to vector<16x256xf32>
    %730 = arith.addf %729, %728 : vector<16x256xf32>
    %731 = arith.mulf %693, %730 : vector<16x256xf32>
    %732 = arith.truncf %731 : vector<16x256xf32> to vector<16x256xbf16>
    %733 = vector.extract_strided_slice %425 {offsets = [1, 0, 0], sizes = [1, 256, 64], strides = [1, 1, 1]} : vector<2x256x64xbf16> to vector<1x256x64xbf16>
    %734 = vector.shape_cast %733 : vector<1x256x64xbf16> to vector<256x64xbf16>
    %cst_216 = arith.constant dense<0.000000e+00> : vector<16x64xf32>
    %735 = tpu.matmul %732, %734, %cst_216 {dimension_numbers = #tpu.dot_dimension_numbers<[1], [0], [0], [1], [0, 0, 1, 1], [], []>} : vector<16x256xbf16>, vector<256x64xbf16>, vector<16x64xf32> -> vector<16x64xf32>
    %736 = arith.addf %659, %735 : vector<16x64xf32>
    %737 = vector.extract_strided_slice %405 {offsets = [13, 0], sizes = [1, 64], strides = [1, 1]} : vector<14x64xf32> to vector<1x64xf32>
    %738 = vector.broadcast %737 : vector<1x64xf32> to vector<16x64xf32>
    %739 = arith.addf %736, %738 : vector<16x64xf32>
    %c0_217 = arith.constant 0 : index
    %c0_218 = arith.constant 0 : index
    %740 = vector.load %arg11[%c0_217, %c0_218] : memref<2x16xf32, #tpu.memory_space<vmem>>, vector<2x16xf32>
    %cst_219 = arith.constant dense<0.000000e+00> : vector<2x64xf32>
    %741 = tpu.matmul %740, %739, %cst_219 {dimension_numbers = #tpu.dot_dimension_numbers<[1], [0], [0], [1], [0, 0, 1, 1], [], []>} : vector<2x16xf32>, vector<16x64xf32>, vector<2x64xf32> -> vector<2x64xf32>
    %742 = vector.extract_strided_slice %405 {offsets = [0, 0], sizes = [1, 64], strides = [1, 1]} : vector<14x64xf32> to vector<1x64xf32>
    %743 = vector.extract_strided_slice %405 {offsets = [1, 0], sizes = [1, 64], strides = [1, 1]} : vector<14x64xf32> to vector<1x64xf32>
    %cst_220 = arith.constant dense<0.000000e+00> : vector<2xf32>
    %744 = vector.multi_reduction <add>, %741, %cst_220 [1] : vector<2x64xf32> to vector<2xf32>
    %745 = vector.shape_cast %744 : vector<2xf32> to vector<2x1xf32>
    %cst_221 = arith.constant 6.400000e+01 : f32
    %746 = vector.broadcast %cst_221 : f32 to vector<2x1xf32>
    %747 = arith.divf %745, %746 : vector<2x1xf32>
    %748 = vector.broadcast %747 : vector<2x1xf32> to vector<2x64xf32>
    %749 = arith.subf %741, %748 : vector<2x64xf32>
    %750 = arith.mulf %749, %749 : vector<2x64xf32>
    %cst_222 = arith.constant dense<0.000000e+00> : vector<2xf32>
    %751 = vector.multi_reduction <add>, %750, %cst_222 [1] : vector<2x64xf32> to vector<2xf32>
    %752 = vector.shape_cast %751 : vector<2xf32> to vector<2x1xf32>
    %cst_223 = arith.constant 6.400000e+01 : f32
    %753 = vector.broadcast %cst_223 : f32 to vector<2x1xf32>
    %754 = arith.divf %752, %753 : vector<2x1xf32>
    %755 = vector.broadcast %747 : vector<2x1xf32> to vector<2x64xf32>
    %756 = arith.subf %741, %755 : vector<2x64xf32>
    %cst_224 = arith.constant 9.99999974E-6 : f32
    %757 = vector.broadcast %cst_224 : f32 to vector<2x1xf32>
    %758 = arith.addf %754, %757 : vector<2x1xf32>
    %759 = math.rsqrt %758 : vector<2x1xf32>
    %760 = vector.broadcast %759 : vector<2x1xf32> to vector<2x64xf32>
    %761 = arith.mulf %756, %760 : vector<2x64xf32>
    %762 = vector.broadcast %742 : vector<1x64xf32> to vector<2x64xf32>
    %763 = arith.mulf %761, %762 : vector<2x64xf32>
    %764 = vector.broadcast %743 : vector<1x64xf32> to vector<2x64xf32>
    %765 = arith.addf %763, %764 : vector<2x64xf32>
    %766 = arith.truncf %765 : vector<2x64xf32> to vector<2x64xbf16>
    %c0_225 = arith.constant 0 : index
    %c0_226 = arith.constant 0 : index
    %767 = vector.load %arg18[%c0_225, %c0_226] : memref<64x64xbf16, #tpu.memory_space<vmem>>, vector<64x64xbf16>
    %cst_227 = arith.constant dense<0.000000e+00> : vector<2x64xf32>
    %768 = tpu.matmul %766, %767, %cst_227 {dimension_numbers = #tpu.dot_dimension_numbers<[1], [0], [0], [1], [0, 0, 1, 1], [], []>} : vector<2x64xbf16>, vector<64x64xbf16>, vector<2x64xf32> -> vector<2x64xf32>
    %769 = arith.mulf %768, %768 : vector<2x64xf32>
    %cst_228 = arith.constant dense<0.000000e+00> : vector<2xf32>
    %770 = vector.multi_reduction <add>, %769, %cst_228 [1] : vector<2x64xf32> to vector<2xf32>
    %771 = vector.shape_cast %770 : vector<2xf32> to vector<2x1xf32>
    %772 = math.sqrt %771 : vector<2x1xf32>
    %cst_229 = arith.constant 9.99999996E-13 : f32
    %773 = vector.broadcast %cst_229 : f32 to vector<2x1xf32>
    %774 = arith.maximumf %772, %773 : vector<2x1xf32>
    %775 = vector.broadcast %774 : vector<2x1xf32> to vector<2x64xf32>
    %776 = arith.divf %768, %775 : vector<2x64xf32>
    %777 = tpu.concatenate %404, %776 in 1 : vector<2x64xf32>, vector<2x64xf32> -> vector<2x128xf32>
    %c0_230 = arith.constant 0 : index
    %c0_231 = arith.constant 0 : index
    %778 = vector.load %arg19[%c0_230, %c0_231] : memref<2x128xf32, #tpu.memory_space<vmem>>, vector<2x128xf32>
    tpu.vector_store %arg19[%c0_230, %c0_231], %777 {strides = array<i32>} : memref<2x128xf32, #tpu.memory_space<vmem>>, vector<2x128xf32>,
    return
  }
}

</mosaic_0001>

<bundles_post_ra>
// kernel: clip_wrapper_forward.1
= control target key start
LH: loop header
LB: loop body
LE: loop exit
PB: predicated region body
PF: predicated region fallthrough
CT: control target
= control target key end

     0   :  { %v7650_v0 = vmov 0   ;;  %vm172_vm0 = vcmask 523264   ;;  %v221_v40 = vlaneseq  ;;  %vm893_vm6 = vcmask 130048   ;;  %s9403_s1 = inlined_call_operand.vmem [shape: bf16[192,64], index: 1, kind: input, shape index: {}]   ;;  %s9404_s0 = inlined_call_operand.vmem [shape: bf16[16,192], index: 0, kind: input, shape index: {}]   ;;  %s9405_s2 = inlined_call_operand.vmem [shape: f32[16,64], index: 2, kind: input, shape index: {}]   ;;  %s9406_s3 = inlined_call_operand.vmem [shape: f32[16,64], index: 3, kind: input, shape index: {}]   ;;  %s9407_s5 = inlined_call_operand.vmem [shape: bf16[2,64,768], index: 5, kind: input, shape index: {}]   ;;  %s9408_s4 = inlined_call_operand.vmem [shape: f32[2,2,768], index: 4, kind: input, shape index: {}]   ;;  %s9409_s6 = inlined_call_operand.vmem [shape: bf16[2,256,64], index: 6, kind: input, shape index: {}]   ;;  %s9410_s7 = inlined_call_operand.vmem [shape: bf16[2,64,256], index: 7, kind: input, shape index: {}]   ;;  %s9411_s8 = inlined_call_operand.vmem [shape: bf16[2,256,64], index: 8, kind: input, shape index: {}]   ;;  %s9412_s10 = inlined_call_operand.vmem [shape: f32[16,64], index: 10, kind: input, shape index: {}]   ;;  %s9413_s9 = inlined_call_operand.vmem [shape: bf16[64,64], index: 9, kind: input, shape index: {}]   ;;  %s9414_s14 = inlined_call_operand.vmem [shape: bf16[2,64,768], index: 14, kind: input, shape index: {}]   ;;  %s9415_s12 = inlined_call_operand.vmem [shape: f32[14,64], index: 12, kind: input, shape index: {}]   ;;  %s9416_s13 = inlined_call_operand.vmem [shape: f32[2,2,768], index: 13, kind: input, shape index: {}]   ;;  %s9417_s15 = inlined_call_operand.vmem [shape: bf16[2,256,64], index: 15, kind: input, shape index: {}]   ;;  %s9418_s16 = inlined_call_operand.vmem [shape: bf16[2,64,256], index: 16, kind: input, shape index: {}]   ;;  %s9419_s17 = inlined_call_operand.vmem [shape: bf16[2,256,64], index: 17, kind: input, shape index: {}]   ;;  %s9420_s11 = inlined_call_operand.vmem [shape: f32[2,16], index: 11, kind: input, shape index: {}]   ;;  %s9421_s18 = inlined_call_operand.vmem [shape: bf16[64,64], index: 18, kind: input, shape index: {}]   ;;  %s9422_s19 = inlined_call_operand.vmem [shape: f32[2,128], index: 19, kind: output, shape index: {}]  }
   0x1   :  { %9427 = sst [smem:[#allocation2_spill]] %s9403_s1  ;;  %176 = vmatprep.subr.bf16.mxu0 %v7650_v0  ;;  %721 = vmatprep.mubr.bf16.mxu1 %v7650_v0  ;;  %vm7653_vm7 = vmmov 0  }
   0x2   :  { %9428 = sst [smem:[#allocation3_spill]] %s9404_s0  ;;  %v7822_v42 = vshrl.u32 %v221_v40, 7 }
   0x3   :  { %9429 = sst [smem:[#allocation4_spill]] %s9405_s2 }
   0x4   :  { %9430 = sst [smem:[#allocation5_spill]] %s9406_s3  ;;  %v7825_v43 = vsub.s32 0, %v7822_v42  ;;  %v7833_v45 = vsub.s32 1, %v7822_v42 }
   0x5   :  { %s9431_s20 = sld [smem:[#allocation2_spill]] }
   0x6   :  { %s9432_s26 = sld [smem:[#allocation3_spill]] }
   0x7   :  { %s9433_s22 = sld [smem:[#allocation4_spill]] }
   0x8   :  { %s9434_s24 = sld [smem:[#allocation5_spill]] }
   0xb   :  { %v7127_v1 = vld [vmem:[%s9431_s20 + $0x38] sm:$0xff]   ;;  %v7128_v2 = vld [vmem:[%s9431_s20 + $0x30] sm:$0xff]   ;;  %v7129_v3 = vld [vmem:[%s9431_s20 + $0x28] sm:$0xff]  }
   0xc   :  { %177 = vmatpush1.bf16.msra.mxu0 %v7127_v1  ;;  %v7130_v4 = vld [vmem:[%s9431_s20 + $0x20] sm:$0xff]   ;;  %v7131_v6 = vld [vmem:[%s9431_s20 + $0x18] sm:$0xff]   ;;  %v7132_v7 = vld [vmem:[%s9431_s20 + $0x10] sm:$0xff]  }
   0xd   :  { %178 = vmatprep.subr.bf16.mxu0 %v7650_v0  ;;  %v7141_v5 = vld [vmem:[%s9432_s26 + $0x4] ss:$8 sps:$4 sm:$0xff]   ;;  %v7135_v10 = vld [vmem:[%s9431_s20 + $0x58] sm:$0xff]   ;;  %v7136_v11 = vld [vmem:[%s9431_s20 + $0x50] sm:$0xff]  }
   0xe   :  { %6238 = vmatprep.mubr.msk.bf16.mxu0 %vm172_vm0, %v7141_v5  ;;  %v7133_v8 = vld [vmem:[%s9431_s20 + $0x8] sm:$0xff]   ;;  %v7134_v9 = vld [vmem:[%s9431_s20] sm:$0xff]  }
   0xf   :  { %v7137_v12 = vld [vmem:[%s9431_s20 + $0x48] sm:$0xff]   ;;  %v7138_v13 = vld [vmem:[%s9431_s20 + $0x40] sm:$0xff]  }
  0x10   :  { %179 = vmatpush1.bf16.msra.mxu0 %v7128_v2  ;;  %v7139_v14 = vld [vmem:[%s9432_s26] ss:$8 sps:$4 sm:$0xff]   ;;  %v7142_v5 = vld [vmem:[%s9407_s5 + $0x94] ss:$24 sps:$4 sm:$0xff]  }
  0x11   :  { %180 = vmatprep.subr.bf16.mxu0 %v7650_v0  ;;  %v217_v15 = vld [vmem:[%s9433_s22] sm:$0xff]  ;;  %v218_v19 = vld [vmem:[%s9433_s22 + $0x8] sm:$0xff]  ;;  %697 = vmatprep.subr.bf16.mxu1 %v7142_v5 }
  0x12   :  { %v7830_v44 = vld [vmem:[%s9434_s24] sm:$0xff] }
  0x13   :  { %v266_v46 = vrot.slane %v7830_v44, %v7825_v43  ;;  %v272_v49 = vrot.slane %v7830_v44, %v7833_v45 }
  0x14   :  { %181 = vmatpush1.bf16.msra.mxu0 %v7129_v3 }
  0x15   :  { %182 = vmatprep.subr.bf16.mxu0 %v7650_v0 }
  0x18   :  { %183 = vmatpush1.bf16.msra.mxu0 %v7130_v4 }
  0x19   :  { %184 = vmatprep.subr.bf16.mxu0 %v7650_v0 }
  0x1c   :  { %185 = vmatpush1.bf16.msra.mxu0 %v7131_v6  ;;  %v7144_v6 = vld [vmem:[%s9407_s5 + $0x90] ss:$24 sps:$4 sm:$0xff]  }
  0x1d   :  { %186 = vmatprep.subr.bf16.mxu0 %v7650_v0  ;;  %698 = vmatpush1.bf16.msra.mxu1 %v7144_v6 }
  0x20   :  { %187 = vmatpush1.bf16.msra.mxu0 %v7132_v7  ;;  %v7145_v7 = vld [vmem:[%s9407_s5 + $0x64] ss:$24 sps:$4 sm:$0xff]  }
  0x21   :  { %188 = vmatprep.subr.bf16.mxu0 %v7650_v0  ;;  %699 = vmatprep.subr.bf16.mxu1 %v7145_v7 }
  0x24   :  { %189 = vmatpush1.bf16.msra.mxu0 %v7133_v8  ;;  %v7147_v8 = vld [vmem:[%s9407_s5 + $0x60] ss:$24 sps:$4 sm:$0xff]  }
  0x25   :  { %190 = vmatprep.subr.bf16.mxu0 %v7650_v0  ;;  %700 = vmatpush1.bf16.msra.mxu1 %v7147_v8 }
  0x28   :  { %191 = vmatpush1.bf16.msra.mxu0 %v7134_v9  ;;  %v7148_v9 = vld [vmem:[%s9407_s5 + $0x34] ss:$24 sps:$4 sm:$0xff]  }
  0x29   :  { %200 = vmatprep.subr.bf16.mxu0 %v7650_v0  ;;  %701 = vmatprep.subr.bf16.mxu1 %v7148_v9 }
  0x2c   :  { %201 = vmatpush2.bf16.msra.mxu0 %v7135_v10  ;;  %v7150_v10 = vld [vmem:[%s9407_s5 + $0x30] ss:$24 sps:$4 sm:$0xff]  }
  0x2d   :  { %202 = vmatprep.subr.bf16.mxu0 %v7650_v0  ;;  %702 = vmatpush1.bf16.msra.mxu1 %v7150_v10 }
  0x30   :  { %203 = vmatpush2.bf16.msra.mxu0 %v7136_v11  ;;  %v7151_v11 = vld [vmem:[%s9407_s5 + $0x4] ss:$24 sps:$4 sm:$0xff]  }
  0x31   :  { %204 = vmatprep.subr.bf16.mxu0 %v7650_v0  ;;  %703 = vmatprep.subr.bf16.mxu1 %v7151_v11 }
  0x34   :  { %205 = vmatpush2.bf16.msra.mxu0 %v7137_v12  ;;  %v7153_v12 = vld [vmem:[%s9407_s5] ss:$24 sps:$4 sm:$0xff]  }
  0x35   :  { %206 = vmatprep.subr.bf16.mxu0 %v7650_v0  ;;  %704 = vmatpush1.bf16.msra.mxu1 %v7153_v12 }
  0x38   :  { %207 = vmatpush2.bf16.msra.mxu0 %v7138_v13  ;;  %v7156_v13 = vld [vmem:[%s9407_s5 + $0x9c] ss:$24 sps:$4 sm:$0xff]  }
  0x39   :  { %740 = vmatprep.subr.bf16.mxu1 %v7156_v13 }
  0x3b   :  { %209 = vmatmul.mubr.bf16.vlgmr.msra.gmra.mxu0 %v7139_v14 }
  0xfb   :  { %v210_v16 = vpop.f32.mrf.mxu0 }
  0xfc   :  { %v219_v17 = vadd.f32 %v217_v15, %v210_v16 }
  0xfd   :  { %v212_v18 = vpop.f32.mrf.mxu0 }
  0xfe   :  { %v236_v20 = vsel %vm172_vm0, %v219_v17, 0.0 }
  0xff   :  { %237 = vadd.xlane.f32.xlu0 %v236_v20  ;;  %v213_v21 = vpop.f32.mrf.mxu0  ;;  %v7879_v20 = vsub.s32 4, %v7822_v42 }
 0x100   :  { %v220_v22 = vadd.f32 %v218_v19, %v213_v21 }
 0x101   :  { %v215_v23 = vpop.f32.mrf.mxu0 }
 0x102   :  { %v239_v24 = vsel %vm172_vm0, %v220_v22, 0.0  ;;  %v500_v23 = vrot.slane %v7830_v44, %v7879_v20 }
 0x103   :  { %240 = vadd.xlane.f32.xlu0 %v239_v24  ;;  %v7884_v24 = vsub.s32 5, %v7822_v42 }
 0x188   :  { %v238_v25 = vpop.xlane.xlu0 %237 }
 0x189   :  { %v243_v26 = vmul.f32 0.015625, %v238_v25 }
 0x18b   :  { %v245_v27 = vsub.f32 %v219_v17, %v243_v26 }
 0x18c   :  { %v241_v28 = vpop.xlane.xlu0 %240 }
 0x18d   :  { %v244_v29 = vmul.f32 0.015625, %v241_v28  ;;  %v247_v30 = vmul.f32 %v245_v27, %v245_v27  ;;  %v506_v28 = vrot.slane %v7830_v44, %v7884_v24 }
 0x18f   :  { %v246_v31 = vsub.f32 %v220_v22, %v244_v29  ;;  %v249_v32 = vsel %vm172_vm0, %v247_v30, 0.0 }
 0x190   :  { %250 = vadd.xlane.f32.xlu1 %v249_v32  ;;  %v7154_v32 = vld [vmem:[%s9407_s5 + $0x98] ss:$24 sps:$4 sm:$0xff]  }
 0x191   :  { %v248_v33 = vmul.f32 %v246_v31, %v246_v31 }
 0x193   :  { %v252_v34 = vsel %vm172_vm0, %v248_v33, 0.0 }
 0x194   :  { %253 = vadd.xlane.f32.xlu1 %v252_v34  ;;  %v7159_v34 = vld [vmem:[%s9407_s5 + $0x6c] ss:$24 sps:$4 sm:$0xff]  }
 0x219   :  { %v251_v35 = vpop.xlane.xlu1 %250 }
 0x21a   :  { %v255_v36 = vmul.f32 0.015625, %v251_v35  ;;  %v7157_v35 = vld [vmem:[%s9407_s5 + $0x68] ss:$24 sps:$4 sm:$0xff]  }
 0x21c   :  { %v257_v37 = vadd.f32 1e-05, %v255_v36  ;;  %v7162_v36 = vld [vmem:[%s9407_s5 + $0x3c] ss:$24 sps:$4 sm:$0xff]  }
 0x21d   :  { %v254_v38 = vpop.xlane.xlu1 %253 }
 0x21e   :  { %7470 = vrsqrt.f32 %v257_v37  ;;  %v256_v39 = vmul.f32 0.015625, %v254_v38  ;;  %v7160_v37 = vld [vmem:[%s9407_s5 + $0x38] ss:$24 sps:$4 sm:$0xff]   ;;  %v7165_v38 = vld [vmem:[%s9407_s5 + $0xc] ss:$24 sps:$4 sm:$0xff]  }
 0x220   :  { %v258_v41 = vadd.f32 1e-05, %v256_v39  ;;  %v7163_v39 = vld [vmem:[%s9407_s5 + $0x8] ss:$24 sps:$4 sm:$0xff]  }
 0x222   :  { %7472 = vrsqrt.f32 %v258_v41  ;;  %v7168_v41 = vld [vmem:[%s9407_s5 + $0xa4] ss:$24 sps:$4 sm:$0xff]  }
 0x22b   :  { %v7471_v47 = vpop.eup %7470 }
 0x22c   :  { %v261_v48 = vmul.f32 %v7471_v47, %v245_v27  ;;  %v7171_v47 = vld [vmem:[%s9407_s5 + $0x74] ss:$24 sps:$4 sm:$0xff]  }
 0x22e   :  { %v267_v50 = vmul.f32 %v266_v46, %v261_v48  ;;  %v7169_v48 = vld [vmem:[%s9407_s5 + $0x70] ss:$24 sps:$4 sm:$0xff]  }
 0x22f   :  { %v7473_v51 = vpop.eup %7472 }
 0x230   :  { %v7839_v52 = vadd.f32 %v272_v49, %v267_v50  ;;  %v262_v53 = vmul.f32 %v7473_v51, %v246_v31  ;;  %v7172_v50 = vld [vmem:[%s9407_s5 + $0x40] ss:$24 sps:$4 sm:$0xff]   ;;  %v7177_v51 = vld [vmem:[%s9407_s5 + $0x14] ss:$24 sps:$4 sm:$0xff]  }
 0x232   :  { %v471_v54 = vsel %vm172_vm0, %v7839_v52, 0.0  ;;  %v268_v55 = vmul.f32 %v266_v46, %v262_v53  ;;  %v7166_v46 = vld [vmem:[%s9407_s5 + $0xa0] ss:$24 sps:$4 sm:$0xff]   ;;  %v7175_v53 = vld [vmem:[%s9407_s5 + $0x10] ss:$24 sps:$4 sm:$0xff]  }
 0x233   :  { %472 = vadd.xlane.f32.xlu0 %v471_v54  ;;  %v7941_v54 = vld [vmem:[%s9408_s4] sm:$0xff] }
 0x234   :  { %v7843_v56 = vadd.f32 %v272_v49, %v268_v55  ;;  %v7174_v49 = vld [vmem:[%s9407_s5 + $0x44] ss:$24 sps:$4 sm:$0xff]   ;;  %v515_v55 = vrot.slane %v7941_v54, %v7825_v43 }
 0x236   :  { %v474_v57 = vsel %vm172_vm0, %v7843_v56, 0.0 }
 0x237   :  { %475 = vadd.xlane.f32.xlu1 %v474_v57  ;;  %v545_v57 = vrot.slane %v515_v55, %v7825_v43 }
 0x2bc   :  { %v473_v58 = vpop.xlane.xlu0 %472 }
 0x2bd   :  { %v477_v59 = vmul.f32 0.015625, %v473_v58 }
 0x2bf   :  { %v479_v60 = vsub.f32 %v7839_v52, %v477_v59 }
 0x2c0   :  { %v476_v61 = vpop.xlane.xlu1 %475 }
 0x2c1   :  { %v478_v62 = vmul.f32 0.015625, %v476_v61  ;;  %v481_v63 = vmul.f32 %v479_v60, %v479_v60 }
 0x2c3   :  { %v480_v1 = vsub.f32 %v7843_v56, %v478_v62  ;;  %v483_v2 = vsel %vm172_vm0, %v481_v63, 0.0  ;;  %v523_v63 = vrot.slane %v7941_v54, %v7879_v20 }
 0x2c4   :  { %484 = vadd.xlane.f32.xlu0 %v483_v2  ;;  %v7949_v2 = vsub.s32 6, %v7822_v42 }
 0x2c5   :  { %v482_v3 = vmul.f32 %v480_v1, %v480_v1  ;;  %v553_v5 = vrot.slane %v523_v63, %v7825_v43 }
 0x2c6   :  { %v527_v7 = vrot.slane %v7941_v54, %v7949_v2 }
 0x2c7   :  { %v486_v4 = vsel %vm172_vm0, %v482_v3, 0.0  ;;  %v7952_v3 = vsub.s32 2, %v7822_v42 }
 0x2c8   :  { %487 = vadd.xlane.f32.xlu1 %v486_v4  ;;  %v557_v12 = vrot.slane %v527_v7, %v7825_v43 }
 0x2c9   :  { %v519_v9 = vrot.slane %v7941_v54, %v7952_v3 }
 0x2cb   :  { %v549_v13 = vrot.slane %v519_v9, %v7825_v43 }
 0x34d   :  { %v485_v14 = vpop.xlane.xlu0 %484 }
 0x34e   :  { %v489_v15 = vmul.f32 0.015625, %v485_v14  ;;  %v276_v14 = vld [vmem:[%s9408_s4 + $0x8] sm:$0xf] }
 0x350   :  { %v491_v16 = vadd.f32 1e-05, %v489_v15 }
 0x351   :  { %v488_v17 = vpop.xlane.xlu1 %487 }
 0x352   :  { %7474 = vrsqrt.f32 %v491_v16  ;;  %v490_v18 = vmul.f32 0.015625, %v488_v17  ;;  %v535_v16 = vrot.slane %v276_v14, %v7952_v3 }
 0x354   :  { %v492_v19 = vadd.f32 1e-05, %v490_v18 }
 0x356   :  { %7476 = vrsqrt.f32 %v492_v19 }
 0x35f   :  { %v7475_v21 = vpop.eup %7474 }
 0x360   :  { %v495_v22 = vmul.f32 %v7475_v21, %v479_v60  ;;  %v531_v21 = vrot.slane %v276_v14, %v7825_v43 }
 0x362   :  { %v501_v27 = vmul.f32 %v500_v23, %v495_v22  ;;  %v565_v22 = vrot.slane %v535_v16, %v7825_v43 }
 0x363   :  { %v7477_v25 = vpop.eup %7476 }
 0x364   :  { %v496_v26 = vmul.f32 %v7477_v25, %v480_v1  ;;  %v507_v30 = vadd.f32 %v506_v28, %v501_v27 }
 0x366   :  { %v502_v29 = vmul.f32 %v500_v23, %v496_v26  ;;  %v561_v26 = vrot.slane %v531_v21, %v7825_v43 }
 0x368   :  { %v508_v31 = vadd.f32 %v506_v28, %v502_v29 }
 0x36a   :  { %v509_v33 = vpack.c.bf16 %v508_v31, %v507_v30 }
 0x36c   :  { %6263 = vmatmul.mubr.msk.bf16.vlgmr.msra.gmra.mxu1 %vm172_vm0, %v509_v33 }
 0x36d   :  { %741 = vmatpush1.bf16.msra.mxu1 %v7154_v32  ;;  %764 = vmatprep.mubr.bf16.mxu1 %v7650_v0 }
 0x36e   :  { %742 = vmatprep.subr.bf16.mxu1 %v7159_v34  ;;  %v7974_v34 = vadd.s32 8, %v7822_v42 }
 0x371   :  { %743 = vmatpush1.bf16.msra.mxu1 %v7157_v35  ;;  %v7977_v35 = vand.u32 127, %v221_v40  ;;  %v7651_v40 = vmov -1e+30  }
 0x372   :  { %744 = vmatprep.subr.bf16.mxu1 %v7162_v36 }
 0x373   :  { %v227_v36 = vxor.u32 %v7977_v35, %v7974_v34 }
 0x375   :  { %745 = vmatpush1.bf16.msra.mxu1 %v7160_v37  ;;  %v7982_v37 = vand.u32 7, %v7977_v35  ;;  %vm7986_vm1 = vcmp.lt.s32.totalorder %v227_v36, 8 }
 0x376   :  { %746 = vmatprep.subr.bf16.mxu1 %v7165_v38  ;;  %v226_v38 = vxor.u32 %v7977_v35, %v7822_v42 }
 0x377   :  { %vm231_vm2 = vcmp.lt.s32.totalorder %v7982_v37, 6 }
 0x378   :  { %vm7991_vm3 = vcmp.lt.s32.totalorder %v226_v38, 8  ;;  %vm233_vm4 = vmand %vm7986_vm1, %vm231_vm2 }
 0x379   :  { %747 = vmatpush1.bf16.msra.mxu1 %v7163_v39  ;;  %vm232_vm5 = vmand %vm7991_vm3, %vm231_vm2 }
 0x37a   :  { %783 = vmatprep.subr.bf16.mxu1 %v7168_v41 }
 0x37c   :  { %6264 = vmatmul.mubr.msk.bf16.vlgmr.msra.gmra.mxu1 %vm172_vm0, %v509_v33 }
 0x37d   :  { %784 = vmatpush1.bf16.msra.mxu1 %v7166_v46  ;;  %807 = vmatprep.mubr.bf16.mxu1 %v7650_v0  ;;  %v8000_v46 = vsel %vm233_vm4, 0.0, %v7651_v40  ;;  %vm3127_vm4 = vcmask 517120  }
 0x37e   :  { %785 = vmatprep.subr.bf16.mxu1 %v7171_v47 }
 0x381   :  { %786 = vmatpush1.bf16.msra.mxu1 %v7169_v48  ;;  %v8003_v48 = vsel %vm232_vm5, 0.0, %v7651_v40 }
 0x382   :  { %787 = vmatprep.subr.bf16.mxu1 %v7174_v49 }
 0x385   :  { %788 = vmatpush1.bf16.msra.mxu1 %v7172_v50 }
 0x386   :  { %789 = vmatprep.subr.bf16.mxu1 %v7177_v51 }
 0x389   :  { %790 = vmatpush1.bf16.msra.mxu1 %v7175_v53 }
 0x38c   :  { %6265 = vmatmul.mubr.msk.bf16.vlgmr.msra.gmra.mxu1 %vm172_vm0, %v509_v33 }
 0x42c   :  { %v723_v58 = vpop.f32.mrf.mxu1 }
 0x42d   :  { %v724_v59 = vadd.f32 %v723_v58, %v545_v57 }
 0x42e   :  { %v725_v60 = vpop.f32.mrf.mxu1 }
 0x42f   :  { %6816 = vmatprep.mubr.f32.mxu0 %v724_v59  ;;  %v726_v18 = vadd.f32 %v725_v60, %v549_v13 }
 0x430   :  { %v727_v61 = vpop.f32.mrf.mxu1 }
 0x431   :  { %v728_v17 = vadd.f32 %v727_v61, %v545_v57 }
 0x432   :  { %v729_v62 = vpop.f32.mrf.mxu1 }
 0x433   :  { %v730_v29 = vadd.f32 %v729_v62, %v549_v13 }
 0x43c   :  { %v766_v1 = vpop.f32.mrf.mxu1 }
 0x43d   :  { %v767_v10 = vadd.f32 %v766_v1, %v553_v5 }
 0x43e   :  { %v768_v4 = vpop.f32.mrf.mxu1 }
 0x43f   :  { %v769_v19 = vadd.f32 %v768_v4, %v557_v12 }
 0x440   :  { %v770_v6 = vpop.f32.mrf.mxu1 }
 0x441   :  { %v771_v8 = vadd.f32 %v770_v6, %v553_v5 }
 0x442   :  { %v772_v11 = vpop.f32.mrf.mxu1 }
 0x443   :  { %6812 = vmatprep.subr.mxu0 %v771_v8  ;;  %v773_v15 = vadd.f32 %v772_v11, %v557_v12 }
 0x444   :  { %6813 = vmatpush3.xpose.msra.mxu0 %v771_v8 }
 0x445   :  { %6814 = vmatprep.subr.mxu0 %v767_v10 }
 0x448   :  { %6815 = vmatpush3.xpose.msra.mxu0 %v767_v10 }
 0x449   :  { %6826 = vmatprep.subr.mxu0 %v773_v15 }
 0x44b   :  { %6817 = vmatmul.mubr.f32.vlgmr.msra.gmra.mxu0 %v728_v17 }
 0x44c   :  { %v809_v23 = vpop.f32.mrf.mxu1  ;;  %6827 = vmatpush3.xpose.msra.mxu0 %v773_v15  ;;  %6830 = vmatprep.mubr.f32.mxu0 %v726_v18 }
 0x44d   :  { %6828 = vmatprep.subr.mxu0 %v769_v19  ;;  %v810_v32 = vadd.f32 %v809_v23, %v561_v26  ;;  %v7652_v23 = vmov 0.0  }
 0x44e   :  { %v811_v25 = vpop.f32.mrf.mxu1 }
 0x44f   :  { %v7968_v27 = vadd.f32 %v811_v25, %v565_v22  ;;  %v7178_v25 = vld [vmem:[%s9409_s6 + $0x38] sm:$0xff]  }
 0x450   :  { %v813_v28 = vpop.f32.mrf.mxu1  ;;  %6829 = vmatpush3.xpose.msra.mxu0 %v769_v19 }
 0x451   :  { %v814_v30 = vadd.f32 %v813_v28, %v561_v26  ;;  %6860 = vmatprep.subr.bf16.mxu0 %v7652_v23  ;;  %v7179_v26 = vld [vmem:[%s9409_s6 + $0x30] sm:$0xff]   ;;  %v7181_v28 = vld [vmem:[%s9409_s6 + $0x28] sm:$0xff]  }
 0x452   :  { %v815_v31 = vpop.f32.mrf.mxu1 }
 0x453   :  { %6819 = vmatprep.subr.mxu1 %v814_v30  ;;  %6831 = vmatmul.mubr.f32.vlgmr.msra.gmra.mxu0 %v730_v29  ;;  %v7970_v33 = vadd.f32 %v815_v31, %v565_v22  ;;  %v7183_v29 = vld [vmem:[%s9409_s6 + $0x20] sm:$0xff]   ;;  %v7187_v31 = vld [vmem:[%s9409_s6 + $0x10] sm:$0xff]  }
 0x454   :  { %6820 = vmatpush3.msra.mxu1 %v814_v30  ;;  %6861 = vmatpush3.bf16.msra.mxu0 %v7178_v25  ;;  %v7185_v30 = vld [vmem:[%s9409_s6 + $0x18] sm:$0xff]  }
 0x455   :  { %6821 = vmatprep.subr.mxu1 %v810_v32  ;;  %6862 = vmatprep.subr.bf16.mxu0 %v7652_v23 }
 0x456   :  { %6822 = vmatpush3.msra.mxu1 %v810_v32  ;;  %v7189_v32 = vld [vmem:[%s9409_s6 + $0x8] sm:$0xff]   ;;  %6876 = vmatprep.mubr.msk.bf16.mxu0 %vm7653_vm7, %v7652_v23 }
 0x457   :  { %6833 = vmatprep.subr.mxu1 %v7970_v33 }
 0x458   :  { %6863 = vmatpush3.bf16.msra.mxu0 %v7179_v26 }
 0x459   :  { %6864 = vmatprep.subr.bf16.mxu0 %v7652_v23 }
 0x45c   :  { %6865 = vmatpush3.bf16.msra.mxu0 %v7181_v28 }
 0x45d   :  { %6866 = vmatprep.subr.bf16.mxu0 %v7652_v23 }
 0x460   :  { %6867 = vmatpush3.bf16.msra.mxu0 %v7183_v29 }
 0x461   :  { %6868 = vmatprep.subr.bf16.mxu0 %v7652_v23 }
 0x464   :  { %6869 = vmatpush3.bf16.msra.mxu0 %v7185_v30 }
 0x465   :  { %6870 = vmatprep.subr.bf16.mxu0 %v7652_v23 }
 0x468   :  { %6871 = vmatpush3.bf16.msra.mxu0 %v7187_v31 }
 0x469   :  { %6872 = vmatprep.subr.bf16.mxu0 %v7652_v23 }
 0x46c   :  { %6873 = vmatpush3.bf16.msra.mxu0 %v7189_v32 }
 0x46d   :  { %6874 = vmatprep.subr.bf16.mxu0 %v7652_v23 }
 0x50b   :  { %v6818_v47 = vpop.f32.mrf.mxu0 }
 0x50c   :  { %v890_v49 = vadd.f32 %v6818_v47, %v8000_v46 }
 0x50d   :  { %v884_v50 = vpop.f32.mrf.mxu0 }
 0x50e   :  { %v885_v51 = vadd.f32 %v884_v50, %v8003_v48  ;;  %v897_v53 = vsel %vm893_vm6, %v890_v49, -inf }
 0x50f   :  { %898 = vmax.xlane.f32.xlu1 %v897_v53 }
 0x510   :  { %v894_v55 = vsel %vm893_vm6, %v885_v51, -inf }
 0x511   :  { %895 = vmax.xlane.f32.xlu0 %v894_v55 }
 0x513   :  { %v6832_v57 = vpop.f32.mrf.mxu0 }
 0x514   :  { %v1070_v58 = vadd.f32 %v6832_v57, %v8000_v46 }
 0x515   :  { %v1064_v59 = vpop.f32.mrf.mxu0 }
 0x516   :  { %v1065_v60 = vadd.f32 %v1064_v59, %v8003_v48  ;;  %v1076_v61 = vsel %vm893_vm6, %v1070_v58, -inf }
 0x517   :  { %1077 = vmax.xlane.f32.xlu1 %v1076_v61 }
 0x518   :  { %v1073_v62 = vsel %vm893_vm6, %v1065_v60, -inf }
 0x519   :  { %1074 = vmax.xlane.f32.xlu0 %v1073_v62  ;;  %v7186_v62 = vld [vmem:[%s9409_s6 + $0x60] sm:$0xff]  }
 0x598   :  { %v899_v63 = vpop.xlane.xlu1 %898 }
 0x599   :  { %v901_v1 = vsub.f32 %v890_v49, %v899_v63  ;;  %v7188_v63 = vld [vmem:[%s9409_s6 + $0x58] sm:$0xff]  }
 0x59a   :  { %v896_v4 = vpop.xlane.xlu0 %895 }
 0x59b   :  { %v904_v5 = vmul.f32 1.442695, %v901_v1  ;;  %v900_v6 = vsub.f32 %v885_v51, %v896_v4  ;;  %v7190_v1 = vld [vmem:[%s9409_s6 + $0x50] sm:$0xff]   ;;  %v7191_v4 = vld [vmem:[%s9409_s6] sm:$0xff]  }
 0x59c   :  { %6875 = vmatpush3.bf16.msra.mxu0 %v7191_v4 }
 0x59d   :  { %7478 = vpow2.f32 %v904_v5  ;;  %v902_v7 = vmul.f32 1.442695, %v900_v6  ;;  %v7192_v5 = vld [vmem:[%s9409_s6 + $0x48] sm:$0xff]   ;;  %v7193_v6 = vld [vmem:[%s9409_s6 + $0x40] sm:$0xff]  }
 0x59f   :  { %7480 = vpow2.f32 %v902_v7 }
 0x5a0   :  { %v1078_v8 = vpop.xlane.xlu1 %1077 }
 0x5a1   :  { %v1080_v9 = vsub.f32 %v1070_v58, %v1078_v8 }
 0x5a2   :  { %v1075_v10 = vpop.xlane.xlu0 %1074 }
 0x5a3   :  { %v1083_v11 = vmul.f32 1.442695, %v1080_v9  ;;  %v1079_v12 = vsub.f32 %v1065_v60, %v1075_v10  ;;  %v7180_v60 = vld [vmem:[%s9409_s6 + $0x78] sm:$0xff]  }
 0x5a5   :  { %7482 = vpow2.f32 %v1083_v11  ;;  %v1081_v13 = vmul.f32 1.442695, %v1079_v12 }
 0x5a7   :  { %7484 = vpow2.f32 %v1081_v13 }
 0x5aa   :  { %v7479_v14 = vpop.eup %7478 }
 0x5ab   :  { %v909_v15 = vsel %vm893_vm6, %v7479_v14, 0.0 }
 0x5ac   :  { %v7481_v16 = vpop.eup %7480  ;;  %910 = vadd.xlane.f32.xlu1 %v909_v15 }
 0x5ad   :  { %v906_v17 = vsel %vm893_vm6, %v7481_v16, 0.0 }
 0x5ae   :  { %907 = vadd.xlane.f32.xlu0 %v906_v17  ;;  %v1358_v17 = vrot.slane %v7830_v44, %v7949_v2 }
 0x5b2   :  { %v7483_v18 = vpop.eup %7482 }
 0x5b3   :  { %v1088_v19 = vsel %vm893_vm6, %v7483_v18, 0.0 }
 0x5b4   :  { %v7485_v21 = vpop.eup %7484  ;;  %1089 = vadd.xlane.f32.xlu1 %v1088_v19 }
 0x5b5   :  { %v1085_v22 = vsel %vm893_vm6, %v7485_v21, 0.0 }
 0x5b6   :  { %1086 = vadd.xlane.f32.xlu0 %v1085_v22 }
 0x635   :  { %v911_v36 = vpop.xlane.xlu1 %910 }
 0x636   :  { %7486 = vrcp.f32 %v911_v36 }
 0x637   :  { %v908_v38 = vpop.xlane.xlu0 %907 }
 0x638   :  { %7488 = vrcp.f32 %v908_v38 }
 0x63d   :  { %v1090_v47 = vpop.xlane.xlu1 %1089 }
 0x63e   :  { %7490 = vrcp.f32 %v1090_v47 }
 0x63f   :  { %v1087_v49 = vpop.xlane.xlu0 %1086 }
 0x640   :  { %7492 = vrcp.f32 %v1087_v49 }
 0x643   :  { %v7487_v50 = vpop.eup %7486 }
 0x644   :  { %v915_v55 = vmul.f32 %v7487_v50, %v7479_v14 }
 0x645   :  { %v7489_v51 = vpop.eup %7488 }
 0x646   :  { %v914_v53 = vmul.f32 %v7489_v51, %v7481_v16 }
 0x648   :  { %6823 = vmatprep.mubr.msk.f32.mxu1 %vm893_vm6, %v914_v53 }
 0x649   :  { %6824 = vmatmul.mubr.msk.f32.vlgmr.msra.gmra.mxu1 %vm893_vm6, %v915_v55 }
 0x64a   :  { %6834 = vmatpush3.msra.mxu1 %v7970_v33  ;;  %v7182_v33 = vld [vmem:[%s9409_s6 + $0x70] sm:$0xff]  }
 0x64b   :  { %6835 = vmatprep.subr.mxu1 %v7968_v27  ;;  %v7491_v57 = vpop.eup %7490 }
 0x64c   :  { %6836 = vmatpush3.msra.mxu1 %v7968_v27  ;;  %v1094_v61 = vmul.f32 %v7491_v57, %v7483_v18  ;;  %v7184_v27 = vld [vmem:[%s9409_s6 + $0x68] sm:$0xff]  }
 0x64d   :  { %v7493_v58 = vpop.eup %7492  ;;  %6840 = vmatprep.subr.bf16.mxu1 %v7652_v23 }
 0x64e   :  { %v1093_v59 = vmul.f32 %v7493_v58, %v7485_v21  ;;  %v7196_v58 = vld [vmem:[%s9410_s7 + $0x34] ss:$8 sps:$4 sm:$0xff]  }
 0x650   :  { %6837 = vmatprep.mubr.msk.f32.mxu1 %vm893_vm6, %v1093_v59  ;;  %v7194_v59 = vld [vmem:[%s9410_s7 + $0x30] ss:$8 sps:$4 sm:$0xff]  }
 0x651   :  { %6838 = vmatmul.mubr.msk.f32.vlgmr.msra.gmra.mxu1 %vm893_vm6, %v1094_v61  ;;  %v7197_v61 = vld [vmem:[%s9410_s7 + $0x20] ss:$8 sps:$4 sm:$0xff]  }
 0x652   :  { %6841 = vmatpush3.bf16.msra.mxu1 %v7180_v60  ;;  %6856 = vmatprep.mubr.msk.bf16.mxu1 %vm7653_vm7, %v7652_v23  ;;  %v7199_v60 = vld [vmem:[%s9410_s7 + $0x24] ss:$8 sps:$4 sm:$0xff]  }
 0x653   :  { %6842 = vmatprep.subr.bf16.mxu1 %v7652_v23 }
 0x656   :  { %6843 = vmatpush3.bf16.msra.mxu1 %v7182_v33  ;;  %v7202_v33 = vld [vmem:[%s9410_s7 + $0x14] ss:$8 sps:$4 sm:$0xff]  }
 0x657   :  { %6844 = vmatprep.subr.bf16.mxu1 %v7652_v23 }
 0x65a   :  { %6845 = vmatpush3.bf16.msra.mxu1 %v7184_v27  ;;  %v7200_v27 = vld [vmem:[%s9410_s7 + $0x10] ss:$8 sps:$4 sm:$0xff]  }
 0x65b   :  { %6846 = vmatprep.subr.bf16.mxu1 %v7652_v23 }
 0x65e   :  { %6847 = vmatpush3.bf16.msra.mxu1 %v7186_v62  ;;  %v7205_v62 = vld [vmem:[%s9410_s7 + $0x4] ss:$8 sps:$4 sm:$0xff]  }
 0x65f   :  { %6848 = vmatprep.subr.bf16.mxu1 %v7652_v23 }
 0x662   :  { %6849 = vmatpush3.bf16.msra.mxu1 %v7188_v63  ;;  %v7203_v63 = vld [vmem:[%s9410_s7] ss:$8 sps:$4 sm:$0xff]  }
 0x663   :  { %6850 = vmatprep.subr.bf16.mxu1 %v7652_v23 }
 0x666   :  { %6851 = vmatpush3.bf16.msra.mxu1 %v7190_v1 }
 0x667   :  { %6852 = vmatprep.subr.bf16.mxu1 %v7652_v23 }
 0x66a   :  { %6853 = vmatpush3.bf16.msra.mxu1 %v7192_v5 }
 0x66b   :  { %6854 = vmatprep.subr.bf16.mxu1 %v7652_v23 }
 0x66e   :  { %6855 = vmatpush3.bf16.msra.mxu1 %v7193_v6 }
 0x66f   :  { %1471 = vmatprep.subr.bf16.mxu1 %v7196_v58  ;;  %v1405_v58 = vrot.slane %v7941_v54, %v7833_v45 }
 0x709   :  { %v6825_v7 = vpop.f32.mrf.mxu1 }
 0x70b   :  { %v988_v8 = vpop.f32.mrf.mxu1 }
 0x70c   :  { %v997_v9 = vpack.c.bf16 %v6825_v7, %v988_v8 }
 0x70e   :  { %6877 = vmatmul.mubr.bf16.vlgmr.msra.gmra.mxu0 %v997_v9  ;;  %v8134_v9 = vsub.s32 7, %v7822_v42 }
 0x711   :  { %v6839_v10 = vpop.f32.mrf.mxu1 }
 0x713   :  { %v1167_v11 = vpop.f32.mrf.mxu1 }
 0x714   :  { %v1176_v12 = vpack.c.bf16 %v6839_v10, %v1167_v11 }
 0x716   :  { %6857 = vmatmul.mubr.bf16.vlgmr.msra.gmra.mxu1 %v1176_v12  ;;  %v1392_v12 = vrot.slane %v7830_v44, %v8134_v9  ;;  %v7206_v44 = vld [vmem:[%s9411_s8 + $0x78] sm:$0xff]  }
 0x717   :  { %1495 = vmatprep.mubr.bf16.mxu1 %v7650_v0  ;;  %1472 = vmatpush1.bf16.msra.mxu1 %v7194_v59 }
 0x718   :  { %1473 = vmatprep.subr.bf16.mxu1 %v7199_v60  ;;  %6606 = vmatprep.subr.bf16.mxu0 %v7206_v44  ;;  %v1415_v60 = vrot.slane %v1405_v58, %v7833_v45 }
 0x71b   :  { %1474 = vmatpush1.bf16.msra.mxu1 %v7197_v61 }
 0x71c   :  { %1475 = vmatprep.subr.bf16.mxu1 %v7202_v33 }
 0x71f   :  { %1476 = vmatpush1.bf16.msra.mxu1 %v7200_v27 }
 0x720   :  { %1477 = vmatprep.subr.bf16.mxu1 %v7205_v62 }
 0x723   :  { %1478 = vmatpush1.bf16.msra.mxu1 %v7203_v63 }
 0x7ce   :  { %v1348_v13 = vpop.f32.mrf.mxu0 }
 0x7d0   :  { %v6878_v14 = vpop.f32.mrf.mxu0 }
 0x7d2   :  { %v1351_v15 = vpop.f32.mrf.mxu0 }
 0x7d4   :  { %v6879_v16 = vpop.f32.mrf.mxu0 }
 0x7d6   :  { %v1259_v18 = vpop.f32.mrf.mxu1 }
 0x7d7   :  { %v1349_v19 = vadd.f32 %v1348_v13, %v1259_v18  ;;  %v8141_v13 = vld [vmem:[%s9434_s24 + $0x8] sm:$0xff] }
 0x7d8   :  { %v6858_v21 = vpop.f32.mrf.mxu1 }
 0x7d9   :  { %v1359_v22 = vadd.f32 %v1358_v17, %v1349_v19 }
 0x7da   :  { %v1262_v25 = vpop.f32.mrf.mxu1 }
 0x7db   :  { %v8096_v26 = vadd.f32 %v1359_v22, %v7839_v52  ;;  %v1352_v28 = vadd.f32 %v1351_v15, %v1262_v25  ;;  %v7207_v25 = vld [vmem:[%s9411_s8 + $0x38] sm:$0xff]  }
 0x7dc   :  { %v6859_v29 = vpop.f32.mrf.mxu1  ;;  %6607 = vmatpush3.bf16.msra.mxu0 %v7207_v25 }
 0x7dd   :  { %v1360_v30 = vadd.f32 %v1358_v17, %v1352_v28  ;;  %v1363_v31 = vsel %vm172_vm0, %v8096_v26, 0.0  ;;  %v1398_v17 = vrot.slane %v8141_v13, %v7825_v43  ;;  %v7208_v28 = vld [vmem:[%s9411_s8 + $0x70] sm:$0xff]  }
 0x7de   :  { %1364 = vadd.xlane.f32.xlu0 %v1363_v31  ;;  %v7209_v29 = vld [vmem:[%s9411_s8 + $0x30] sm:$0xff]   ;;  %6608 = vmatprep.subr.bf16.mxu0 %v7208_v28  ;;  %v7211_v31 = vld [vmem:[%s9411_s8 + $0x28] sm:$0xff]  }
 0x7df   :  { %v8101_v32 = vadd.f32 %v1360_v30, %v7843_v56  ;;  %v7210_v30 = vld [vmem:[%s9411_s8 + $0x68] sm:$0xff]  }
 0x7e0   :  { %6609 = vmatpush3.bf16.msra.mxu0 %v7209_v29 }
 0x7e1   :  { %v1366_v36 = vsel %vm172_vm0, %v8101_v32, 0.0  ;;  %6610 = vmatprep.subr.bf16.mxu0 %v7210_v30 }
 0x7e2   :  { %1367 = vadd.xlane.f32.xlu1 %v1366_v36  ;;  %v7212_v36 = vld [vmem:[%s9411_s8 + $0x60] sm:$0xff]  }
 0x7e4   :  { %6611 = vmatpush3.bf16.msra.mxu0 %v7211_v31 }
 0x7e5   :  { %6612 = vmatprep.subr.bf16.mxu0 %v7212_v36 }
 0x867   :  { %v1365_v38 = vpop.xlane.xlu0 %1364 }
 0x868   :  { %v1369_v47 = vmul.f32 0.015625, %v1365_v38  ;;  %v7213_v38 = vld [vmem:[%s9411_s8 + $0x20] sm:$0xff]  }
 0x869   :  { %6613 = vmatpush3.bf16.msra.mxu0 %v7213_v38 }
 0x86a   :  { %v1371_v49 = vsub.f32 %v8096_v26, %v1369_v47  ;;  %v7214_v47 = vld [vmem:[%s9411_s8 + $0x58] sm:$0xff]  }
 0x86b   :  { %v1368_v52 = vpop.xlane.xlu1 %1367  ;;  %6614 = vmatprep.subr.bf16.mxu0 %v7214_v47 }
 0x86c   :  { %v1370_v50 = vmul.f32 0.015625, %v1368_v52  ;;  %v1373_v51 = vmul.f32 %v1371_v49, %v1371_v49  ;;  %v7216_v52 = vld [vmem:[%s9411_s8 + $0x50] sm:$0xff]  }
 0x86e   :  { %v1372_v53 = vsub.f32 %v8101_v32, %v1370_v50  ;;  %v1375_v55 = vsel %vm172_vm0, %v1373_v51, 0.0  ;;  %v7217_v50 = vld [vmem:[%s9411_s8 + $0x10] sm:$0xff]   ;;  %v7218_v51 = vld [vmem:[%s9411_s8 + $0x48] sm:$0xff]  }
 0x86f   :  { %1376 = vadd.xlane.f32.xlu0 %v1375_v55  ;;  %v7220_v55 = vld [vmem:[%s9411_s8 + $0x40] sm:$0xff]  }
 0x870   :  { %v1374_v57 = vmul.f32 %v1372_v53, %v1372_v53 }
 0x872   :  { %v1378_v56 = vsel %vm172_vm0, %v1374_v57, 0.0  ;;  %v7221_v57 = vld [vmem:[%s9411_s8] sm:$0xff]  }
 0x873   :  { %1379 = vadd.xlane.f32.xlu1 %v1378_v56  ;;  %v8196_v56 = vsub.s32 3, %v7822_v42 }
 0x875   :  { %v1409_v59 = vrot.slane %v7941_v54, %v8196_v56 }
 0x877   :  { %v1419_v61 = vrot.slane %v1409_v59, %v7833_v45 }
 0x8f8   :  { %v1377_v1 = vpop.xlane.xlu0 %1376 }
 0x8f9   :  { %v1381_v4 = vmul.f32 0.015625, %v1377_v1 }
 0x8fb   :  { %v1383_v5 = vadd.f32 1e-05, %v1381_v4 }
 0x8fc   :  { %v1380_v6 = vpop.xlane.xlu1 %1379 }
 0x8fd   :  { %7494 = vrsqrt.f32 %v1383_v5  ;;  %v1382_v7 = vmul.f32 0.015625, %v1380_v6 }
 0x8ff   :  { %v1384_v8 = vadd.f32 1e-05, %v1382_v7 }
 0x901   :  { %7496 = vrsqrt.f32 %v1384_v8 }
 0x90a   :  { %v7495_v10 = vpop.eup %7494 }
 0x90b   :  { %v1387_v11 = vmul.f32 %v7495_v10, %v1371_v49  ;;  %v7215_v49 = vld [vmem:[%s9411_s8 + $0x18] sm:$0xff]  }
 0x90c   :  { %6615 = vmatpush3.bf16.msra.mxu0 %v7215_v49 }
 0x90d   :  { %v1393_v16 = vmul.f32 %v1392_v12, %v1387_v11  ;;  %6616 = vmatprep.subr.bf16.mxu0 %v7216_v52 }
 0x90e   :  { %v7497_v14 = vpop.eup %7496 }
 0x90f   :  { %v1388_v15 = vmul.f32 %v7497_v14, %v1372_v53  ;;  %v1399_v19 = vadd.f32 %v1398_v17, %v1393_v16  ;;  %v7219_v53 = vld [vmem:[%s9411_s8 + $0x8] sm:$0xff]  }
 0x910   :  { %6617 = vmatpush3.bf16.msra.mxu0 %v7217_v50 }
 0x911   :  { %v1394_v18 = vmul.f32 %v1392_v12, %v1388_v15  ;;  %6618 = vmatprep.subr.bf16.mxu0 %v7218_v51 }
 0x913   :  { %v1400_v21 = vadd.f32 %v1398_v17, %v1394_v18 }
 0x914   :  { %6619 = vmatpush3.bf16.msra.mxu0 %v7219_v53 }
 0x915   :  { %v1401_v22 = vpack.c.bf16 %v1400_v21, %v1399_v19  ;;  %6620 = vmatprep.subr.bf16.mxu0 %v7220_v55 }
 0x917   :  { %6294 = vmatmul.mubr.msk.bf16.vlgmr.msra.gmra.mxu1 %vm172_vm0, %v1401_v22 }
 0x918   :  { %2011 = vmatprep.mubr.bf16.mxu1 %v7650_v0  ;;  %6621 = vmatpush3.bf16.msra.mxu0 %v7221_v57 }
 0x9d7   :  { %v1497_v33 = vpop.f32.mrf.mxu1 }
 0x9d8   :  { %v8204_v27 = vadd.f32 %v1497_v33, %v1415_v60 }
 0x9d9   :  { %v1499_v62 = vpop.f32.mrf.mxu1 }
 0x9da   :  { %v8207_v63 = vmul.f32 0.70710677, %v8204_v27  ;;  %v8209_v1 = vadd.f32 %v1499_v62, %v1419_v61 }
 0x9db   :  { %v1501_v4 = vpop.f32.mrf.mxu1 }
 0x9dc   :  { %v1514_v5 = vand.u32 2147483647, %v8207_v63  ;;  %v8213_v6 = vmul.f32 0.70710677, %v8209_v1  ;;  %v8215_v54 = vadd.f32 %v1501_v4, %v1415_v60  ;;  %vm1594_vm9 = vcmp.ge.f32.partialorder %v8207_v63, 0.0 }
 0x9dd   :  { %v1503_v7 = vpop.f32.mrf.mxu1 }
 0x9de   :  { %v1518_v8 = vmul.f32 0.3275911, %v1514_v5  ;;  %v1515_v10 = vand.u32 2147483647, %v8213_v6  ;;  %v8219_v11 = vmul.f32 0.70710677, %v8215_v54  ;;  %v8221_v12 = vadd.f32 %v1503_v7, %v1419_v61 }
 0x9df   :  { %v1570_v28 = vsub.f32 0.0, %v1514_v5  ;;  %vm1595_vm8 = vcmp.ge.f32.partialorder %v8213_v6, 0.0  ;;  %v1507_v6 = vmul.f32 0.5, %v8209_v1  ;;  %v1758_v1 = vrot.slane %v8141_v13, %v7833_v45 }
 0x9e0   :  { %v1522_v14 = vadd.f32 1.0, %v1518_v8  ;;  %v1519_v15 = vmul.f32 0.3275911, %v1515_v10  ;;  %v1516_v16 = vand.u32 2147483647, %v8219_v11  ;;  %v1571_v29 = vsub.f32 0.0, %v1515_v10 }
 0x9e1   :  { %v8225_v17 = vmul.f32 0.70710677, %v8221_v12  ;;  %v1574_v30 = vmul.f32 %v1570_v28, %v1514_v5  ;;  %vm1596_vm10 = vcmp.ge.f32.partialorder %v8219_v11, 0.0 }
 0x9e2   :  { %7498 = vrcp.f32 %v1522_v14  ;;  %v1523_v18 = vadd.f32 1.0, %v1519_v15  ;;  %v1520_v19 = vmul.f32 0.3275911, %v1516_v16  ;;  %v1572_v31 = vsub.f32 0.0, %v1516_v16 }
 0x9e3   :  { %v1517_v21 = vand.u32 2147483647, %v8225_v17  ;;  %v1575_v38 = vmul.f32 %v1571_v29, %v1515_v10  ;;  %v1578_v49 = vmul.f32 1.442695, %v1574_v30  ;;  %vm1597_vm11 = vcmp.ge.f32.partialorder %v8225_v17, 0.0 }
 0x9e4   :  { %7500 = vrcp.f32 %v1523_v18  ;;  %v1524_v22 = vadd.f32 1.0, %v1520_v19  ;;  %v1576_v50 = vmul.f32 %v1572_v31, %v1516_v16 }
 0x9e5   :  { %v1521_v44 = vmul.f32 0.3275911, %v1517_v21  ;;  %v1573_v52 = vsub.f32 0.0, %v1517_v21  ;;  %v1580_v57 = vmul.f32 1.442695, %v1575_v38 }
 0x9e6   :  { %7502 = vrcp.f32 %v1524_v22  ;;  %v1582_v62 = vmul.f32 1.442695, %v1576_v50 }
 0x9e7   :  { %v1525_v25 = vadd.f32 1.0, %v1521_v44  ;;  %v1577_v60 = vmul.f32 %v1573_v52, %v1517_v21 }
 0x9e9   :  { %7504 = vrcp.f32 %v1525_v25  ;;  %v1584_v15 = vmul.f32 1.442695, %v1577_v60 }
 0x9ea   :  { %7506 = vpow2.f32 %v1578_v49 }
 0x9eb   :  { %7508 = vpow2.f32 %v1580_v57 }
 0x9ec   :  { %7510 = vpow2.f32 %v1582_v62 }
 0x9ed   :  { %7512 = vpow2.f32 %v1584_v15 }
 0x9ef   :  { %v7499_v36 = vpop.eup %7498 }
 0x9f0   :  { %v1534_v47 = vmul.f32 1.0614054, %v7499_v36 }
 0x9f1   :  { %v7501_v51 = vpop.eup %7500 }
 0x9f2   :  { %v6295_v53 = vadd.f32 -1.4531521, %v1534_v47  ;;  %v1535_v55 = vmul.f32 1.0614054, %v7501_v51 }
 0x9f3   :  { %v7503_v58 = vpop.eup %7502 }
 0x9f4   :  { %v1542_v59 = vmul.f32 %v7499_v36, %v6295_v53  ;;  %v6296_v61 = vadd.f32 -1.4531521, %v1535_v55  ;;  %v1536_v33 = vmul.f32 1.0614054, %v7503_v58 }
 0x9f6   :  { %v1546_v4 = vadd.f32 1.4214138, %v1542_v59  ;;  %v7505_v5 = vpop.eup %7504  ;;  %v1543_v7 = vmul.f32 %v7501_v51, %v6296_v61  ;;  %v6297_v8 = vadd.f32 -1.4531521, %v1536_v33 }
 0x9f7   :  { %v1537_v14 = vmul.f32 1.0614054, %v7505_v5  ;;  %v7507_v53 = vpop.eup %7506 }
 0x9f8   :  { %v1550_v10 = vmul.f32 %v7499_v36, %v1546_v4  ;;  %v1547_v16 = vadd.f32 1.4214138, %v1543_v7  ;;  %v1544_v18 = vmul.f32 %v7503_v58, %v6297_v8  ;;  %v7509_v62 = vpop.eup %7508 }
 0x9f9   :  { %v6298_v22 = vadd.f32 -1.4531521, %v1537_v14  ;;  %v7511_v14 = vpop.eup %7510 }
 0x9fa   :  { %v6299_v19 = vadd.f32 -0.28449672, %v1550_v10  ;;  %v1551_v44 = vmul.f32 %v7501_v51, %v1547_v16  ;;  %v1548_v25 = vadd.f32 1.4214138, %v1544_v18 }
 0x9fb   :  { %v1545_v21 = vmul.f32 %v7505_v5, %v6298_v22  ;;  %v7513_v22 = vpop.eup %7512 }
 0x9fc   :  { %v1558_v28 = vmul.f32 %v7499_v36, %v6299_v19  ;;  %v6300_v29 = vadd.f32 -0.28449672, %v1551_v44  ;;  %v1552_v30 = vmul.f32 %v7503_v58, %v1548_v25 }
 0x9fd   :  { %v1549_v38 = vadd.f32 1.4214138, %v1545_v21 }
 0x9fe   :  { %v1562_v31 = vadd.f32 0.2548296, %v1558_v28  ;;  %v1559_v47 = vmul.f32 %v7501_v51, %v6300_v29  ;;  %v6301_v49 = vadd.f32 -0.28449672, %v1552_v30 }
 0x9ff   :  { %v1553_v50 = vmul.f32 %v7505_v5, %v1549_v38 }
 0xa00   :  { %v1566_v52 = vmul.f32 %v7499_v36, %v1562_v31  ;;  %v1563_v55 = vadd.f32 0.2548296, %v1559_v47  ;;  %v1560_v57 = vmul.f32 %v7503_v58, %v6301_v49  ;;  %v1508_v49 = vmul.f32 0.5, %v8215_v54 }
 0xa01   :  { %v6302_v60 = vadd.f32 -0.28449672, %v1553_v50  ;;  %v1509_v50 = vmul.f32 0.5, %v8221_v12 }
 0xa02   :  { %v1586_v59 = vmul.f32 %v7507_v53, %v1566_v52  ;;  %v1567_v61 = vmul.f32 %v7501_v51, %v1563_v55  ;;  %v1564_v33 = vadd.f32 0.2548296, %v1560_v57  ;;  %v1506_v53 = vmul.f32 0.5, %v8204_v27 }
 0xa03   :  { %v1561_v4 = vmul.f32 %v7505_v5, %v6302_v60 }
 0xa04   :  { %v1590_v7 = vsub.f32 1.0, %v1586_v59  ;;  %v1587_v8 = vmul.f32 %v7509_v62, %v1567_v61  ;;  %v1568_v10 = vmul.f32 %v7503_v58, %v1564_v33 }
 0xa05   :  { %v1565_v15 = vadd.f32 0.2548296, %v1561_v4 }
 0xa06   :  { %v1591_v16 = vsub.f32 1.0, %v1587_v8  ;;  %v1588_v18 = vmul.f32 %v7511_v14, %v1568_v10  ;;  %v1598_v36 = vsub.f32 0.0, %v1590_v7 }
 0xa07   :  { %v1569_v19 = vmul.f32 %v7505_v5, %v1565_v15 }
 0xa08   :  { %v1599_v44 = vsub.f32 0.0, %v1591_v16  ;;  %v1592_v25 = vsub.f32 1.0, %v1588_v18  ;;  %v1602_v58 = vsel %vm1594_vm9, %v1590_v7, %v1598_v36 }
 0xa09   :  { %v1589_v28 = vmul.f32 %v7513_v22, %v1569_v19  ;;  %v1606_v5 = vadd.f32 1.0, %v1602_v58  ;;  %v7225_v58 = vld [vmem:[%s9407_s5 + $0x160] ss:$24 sps:$4 sm:$0xff]  }
 0xa0a   :  { %v1600_v21 = vsub.f32 0.0, %v1592_v25  ;;  %v1603_v51 = vsel %vm1595_vm8, %v1591_v16, %v1599_v44 }
 0xa0b   :  { %v1593_v29 = vsub.f32 1.0, %v1589_v28  ;;  %v1607_v47 = vadd.f32 1.0, %v1603_v51  ;;  %v1610_v59 = vmul.f32 %v1606_v5, %v1506_v53  ;;  %v7222_v51 = vld [vmem:[%s9407_s5 + $0x150] ss:$24 sps:$4 sm:$0xff]   ;;  %v7236_v5 = vld [vmem:[%s9407_s5 + $0xf4] ss:$24 sps:$4 sm:$0xff]  }
 0xa0c   :  { %v1604_v30 = vsel %vm1596_vm10, %v1592_v25, %v1600_v21  ;;  %v7224_v21 = vld [vmem:[%s9407_s5 + $0x154] ss:$24 sps:$4 sm:$0xff]   ;;  %v7243_v53 = vld [vmem:[%s9407_s5 + $0xd0] ss:$24 sps:$4 sm:$0xff]  }
 0xa0d   :  { %v1608_v31 = vadd.f32 1.0, %v1604_v30  ;;  %v1601_v38 = vsub.f32 0.0, %v1593_v29  ;;  %v1611_v55 = vmul.f32 %v1607_v47, %v1507_v6  ;;  %1987 = vmatprep.subr.bf16.mxu1 %v7224_v21  ;;  %v7230_v30 = vld [vmem:[%s9407_s5 + $0x124] ss:$24 sps:$4 sm:$0xff]   ;;  %v7231_v47 = vld [vmem:[%s9407_s5 + $0x130] ss:$24 sps:$4 sm:$0xff]  }
 0xa0e   :  { %1988 = vmatpush1.bf16.msra.mxu1 %v7222_v51  ;;  %v7237_v6 = vld [vmem:[%s9407_s5 + $0x100] ss:$24 sps:$4 sm:$0xff]   ;;  %v278_v21 = vld [vmem:[%s9408_s4 + $0x14] sm:$0xf] }
 0xa0f   :  { %v1605_v52 = vsel %vm1597_vm11, %v1593_v29, %v1601_v38  ;;  %v1612_v11 = vmul.f32 %v1608_v31, %v1508_v49  ;;  %v7227_v29 = vld [vmem:[%s9407_s5 + $0x164] ss:$24 sps:$4 sm:$0xff]   ;;  %v7228_v31 = vld [vmem:[%s9407_s5 + $0x120] ss:$24 sps:$4 sm:$0xff]   ;;  %v7233_v38 = vld [vmem:[%s9407_s5 + $0x134] ss:$24 sps:$4 sm:$0xff]   ;;  %1989 = vmatprep.subr.bf16.mxu1 %v7230_v30  ;;  %v1825_v51 = vrot.slane %v278_v21, %v7952_v3 }
 0xa10   :  { %v1609_v63 = vadd.f32 1.0, %v1605_v52  ;;  %2073 = vmatprep.subr.bf16.mxu0 %v7227_v29  ;;  %v7234_v49 = vld [vmem:[%s9407_s5 + $0xf0] ss:$24 sps:$4 sm:$0xff]   ;;  %v7239_v52 = vld [vmem:[%s9407_s5 + $0x104] ss:$24 sps:$4 sm:$0xff]  }
 0xa11   :  { %v1614_v61 = vpack.c.bf16 %v1612_v11, %v1610_v59  ;;  %v7245_v11 = vld [vmem:[%s9407_s5 + $0xd4] ss:$24 sps:$4 sm:$0xff]   ;;  %v1855_v30 = vrot.slane %v1825_v51, %v7825_v43 }
 0xa12   :  { %v1613_v57 = vmul.f32 %v1609_v63, %v1509_v50  ;;  %1990 = vmatpush1.bf16.msra.mxu1 %v7228_v31  ;;  %v7240_v50 = vld [vmem:[%s9407_s5 + $0xc0] ss:$24 sps:$4 sm:$0xff]   ;;  %v7242_v63 = vld [vmem:[%s9407_s5 + $0xc4] ss:$24 sps:$4 sm:$0xff]  }
 0xa13   :  { %1991 = vmatprep.subr.bf16.mxu1 %v7236_v5 }
 0xa14   :  { %v1615_v60 = vpack.c.bf16 %v1613_v57, %v1611_v55  ;;  %v7248_v55 = vld [vmem:[%s9407_s5 + $0x15c] ss:$24 sps:$4 sm:$0xff]  }
 0xa16   :  { %1744 = vmatprep.mubr.bf16.mxu0 %v1615_v60  ;;  %1992 = vmatpush1.bf16.msra.mxu1 %v7234_v49 }
 0xa17   :  { %1745 = vmatmul.mubr.bf16.vlgmr.msra.gmra.mxu0 %v1614_v61  ;;  %1993 = vmatprep.subr.bf16.mxu1 %v7242_v63 }
 0xa18   :  { %2097 = vmatprep.mubr.bf16.mxu0 %v7650_v0  ;;  %2074 = vmatpush1.bf16.msra.mxu0 %v7225_v58  ;;  %v1821_v58 = vrot.slane %v278_v21, %v7825_v43 }
 0xa19   :  { %2075 = vmatprep.subr.bf16.mxu0 %v7233_v38 }
 0xa1a   :  { %1994 = vmatpush1.bf16.msra.mxu1 %v7240_v50  ;;  %v1851_v49 = vrot.slane %v1821_v58, %v7825_v43 }
 0xa1b   :  { %2030 = vmatprep.subr.bf16.mxu1 %v7248_v55 }
 0xa1c   :  { %2076 = vmatpush1.bf16.msra.mxu0 %v7231_v47 }
 0xa1d   :  { %2077 = vmatprep.subr.bf16.mxu0 %v7239_v52 }
 0xa20   :  { %2078 = vmatpush1.bf16.msra.mxu0 %v7237_v6 }
 0xa21   :  { %2079 = vmatprep.subr.bf16.mxu0 %v7245_v11 }
 0xa24   :  { %2080 = vmatpush1.bf16.msra.mxu0 %v7243_v53 }
 0xad7   :  { %v6622_v17 = vpop.f32.mrf.mxu0 }
 0xad9   :  { %v6623_v54 = vpop.f32.mrf.mxu0 }
 0xada   :  { %v6624_v33 = vadd.f32 %v6623_v54, %v6622_v17 }
 0xadb   :  { %v6625_v12 = vpop.f32.mrf.mxu0 }
 0xadc   :  { %v1753_v62 = vadd.f32 %v6624_v33, %v8096_v26 }
 0xadd   :  { %v6626_v27 = vpop.f32.mrf.mxu0 }
 0xade   :  { %v8240_v4 = vadd.f32 %v1758_v1, %v1753_v62  ;;  %v6627_v7 = vadd.f32 %v6626_v27, %v6625_v12  ;;  %v1790_v12 = vrot.slane %v8141_v13, %v7952_v3 }
 0xae0   :  { %v1754_v8 = vadd.f32 %v6627_v7, %v8101_v32  ;;  %v1761_v10 = vsel %vm172_vm0, %v8240_v4, 0.0 }
 0xae1   :  { %1762 = vadd.xlane.f32.xlu0 %v1761_v10 }
 0xae2   :  { %v8245_v14 = vadd.f32 %v1758_v1, %v1754_v8  ;;  %v1796_v8 = vrot.slane %v8141_v13, %v8196_v56  ;;  %v7249_v13 = vld [vmem:[%s9407_s5 + $0x128] ss:$24 sps:$4 sm:$0xff]  }
 0xae4   :  { %v1764_v15 = vsel %vm172_vm0, %v8245_v14, 0.0 }
 0xae5   :  { %1765 = vadd.xlane.f32.xlu1 %v1764_v15 }
 0xb6a   :  { %v1763_v16 = vpop.xlane.xlu0 %1762 }
 0xb6b   :  { %v1767_v18 = vmul.f32 0.015625, %v1763_v16 }
 0xb6d   :  { %v1769_v26 = vsub.f32 %v8240_v4, %v1767_v18  ;;  %v7246_v18 = vld [vmem:[%s9407_s5 + $0x158] ss:$24 sps:$4 sm:$0xff]  }
 0xb6e   :  { %v1766_v19 = vpop.xlane.xlu1 %1765 }
 0xb6f   :  { %v1768_v22 = vmul.f32 0.015625, %v1766_v19  ;;  %v1771_v36 = vmul.f32 %v1769_v26, %v1769_v26 }
 0xb71   :  { %v1770_v44 = vsub.f32 %v8245_v14, %v1768_v22  ;;  %v1773_v32 = vsel %vm172_vm0, %v1771_v36, 0.0  ;;  %v7254_v22 = vld [vmem:[%s9407_s5 + $0xfc] ss:$24 sps:$4 sm:$0xff]   ;;  %v7252_v36 = vld [vmem:[%s9407_s5 + $0xf8] ss:$24 sps:$4 sm:$0xff]  }
 0xb72   :  { %1774 = vadd.xlane.f32.xlu0 %v1773_v32  ;;  %v7255_v32 = vld [vmem:[%s9407_s5 + $0xc8] ss:$24 sps:$4 sm:$0xff]  }
 0xb73   :  { %v1772_v25 = vmul.f32 %v1770_v44, %v1770_v44 }
 0xb75   :  { %v1776_v28 = vsel %vm172_vm0, %v1772_v25, 0.0  ;;  %v8336_v25 = vld [vmem:[%s9408_s4 + $0xc] sm:$0xff] }
 0xb76   :  { %1777 = vadd.xlane.f32.xlu1 %v1776_v28  ;;  %v1805_v28 = vrot.slane %v8336_v25, %v7825_v43 }
 0xb78   :  { %v1835_v29 = vrot.slane %v1805_v28, %v7825_v43 }
 0xbfb   :  { %v1775_v57 = vpop.xlane.xlu0 %1774 }
 0xbfc   :  { %v1779_v59 = vmul.f32 0.015625, %v1775_v57 }
 0xbfe   :  { %v1781_v60 = vadd.f32 1e-05, %v1779_v59 }
 0xbff   :  { %v1778_v61 = vpop.xlane.xlu1 %1777 }
 0xc00   :  { %7514 = vrsqrt.f32 %v1781_v60  ;;  %v1780_v17 = vmul.f32 0.015625, %v1778_v61  ;;  %v1813_v60 = vrot.slane %v8336_v25, %v7879_v20 }
 0xc02   :  { %v1782_v54 = vadd.f32 1e-05, %v1780_v17 }
 0xc04   :  { %7516 = vrsqrt.f32 %v1782_v54  ;;  %v1843_v54 = vrot.slane %v1813_v60, %v7825_v43 }
 0xc0d   :  { %v7515_v33 = vpop.eup %7514 }
 0xc0e   :  { %v1785_v1 = vmul.f32 %v7515_v33, %v1769_v26  ;;  %v7251_v26 = vld [vmem:[%s9407_s5 + $0x12c] ss:$24 sps:$4 sm:$0xff]  }
 0xc10   :  { %v1791_v7 = vmul.f32 %v1790_v12, %v1785_v1  ;;  %v1817_v1 = vrot.slane %v8336_v25, %v7949_v2 }
 0xc11   :  { %v7517_v62 = vpop.eup %7516 }
 0xc12   :  { %v1786_v27 = vmul.f32 %v7517_v62, %v1770_v44  ;;  %v1797_v15 = vadd.f32 %v1796_v8, %v1791_v7  ;;  %v7257_v44 = vld [vmem:[%s9407_s5 + $0xcc] ss:$24 sps:$4 sm:$0xff]   ;;  %v1809_v62 = vrot.slane %v8336_v25, %v7952_v3 }
 0xc14   :  { %v1792_v10 = vmul.f32 %v1790_v12, %v1786_v27 }
 0xc16   :  { %v1798_v16 = vadd.f32 %v1796_v8, %v1792_v10  ;;  %v1847_v8 = vrot.slane %v1817_v1, %v7825_v43  ;;  %v1839_v10 = vrot.slane %v1809_v62, %v7825_v43  ;;  %v7258_v62 = vld [vmem:[%s9409_s6 + $0xb8] sm:$0xff]  }
 0xc18   :  { %v1799_v19 = vpack.c.bf16 %v1798_v16, %v1797_v15 }
 0xc1a   :  { %6343 = vmatmul.mubr.msk.bf16.vlgmr.msra.gmra.mxu1 %vm172_vm0, %v1799_v19  ;;  %6345 = vmatmul.mubr.msk.bf16.vlgmr.msra.gmra.mxu0 %vm172_vm0, %v1799_v19 }
 0xc1b   :  { %2031 = vmatpush1.bf16.msra.mxu1 %v7246_v18  ;;  %2054 = vmatprep.mubr.bf16.mxu1 %v7650_v0 }
 0xc1c   :  { %2032 = vmatprep.subr.bf16.mxu1 %v7251_v26 }
 0xc1f   :  { %2033 = vmatpush1.bf16.msra.mxu1 %v7249_v13 }
 0xc20   :  { %2034 = vmatprep.subr.bf16.mxu1 %v7254_v22 }
 0xc23   :  { %2035 = vmatpush1.bf16.msra.mxu1 %v7252_v36 }
 0xc24   :  { %2036 = vmatprep.subr.bf16.mxu1 %v7257_v44 }
 0xc27   :  { %2037 = vmatpush1.bf16.msra.mxu1 %v7255_v32 }
 0xc2a   :  { %6344 = vmatmul.mubr.msk.bf16.vlgmr.msra.gmra.mxu1 %vm172_vm0, %v1799_v19 }
 0xcda   :  { %v2013_v31 = vpop.f32.mrf.mxu1  ;;  %v2099_v38 = vpop.f32.mrf.mxu0 }
 0xcdb   :  { %v2014_v47 = vadd.f32 %v2013_v31, %v1835_v29  ;;  %v2100_v11 = vadd.f32 %v2099_v38, %v1851_v49 }
 0xcdc   :  { %v2101_v5 = vpop.f32.mrf.mxu0  ;;  %v2015_v63 = vpop.f32.mrf.mxu1 }
 0xcdd   :  { %v8348_v52 = vadd.f32 %v2101_v5, %v1855_v30  ;;  %6884 = vmatprep.mubr.f32.mxu1 %v2014_v47  ;;  %v2016_v18 = vadd.f32 %v2015_v63, %v1839_v10 }
 0xcde   :  { %v2103_v6 = vpop.f32.mrf.mxu0  ;;  %v2017_v57 = vpop.f32.mrf.mxu1 }
 0xcdf   :  { %v2104_v50 = vadd.f32 %v2103_v6, %v1851_v49  ;;  %v2018_v16 = vadd.f32 %v2017_v57, %v1835_v29 }
 0xce0   :  { %v2105_v53 = vpop.f32.mrf.mxu0  ;;  %v2019_v59 = vpop.f32.mrf.mxu1 }
 0xce1   :  { %6887 = vmatprep.subr.mxu0 %v2104_v50  ;;  %v8350_v55 = vadd.f32 %v2105_v53, %v1855_v30  ;;  %v2020_v26 = vadd.f32 %v2019_v59, %v1839_v10  ;;  %v7265_v10 = vld [vmem:[%s9409_s6 + $0x98] sm:$0xff]  }
 0xce2   :  { %6888 = vmatpush3.msra.mxu0 %v2104_v50 }
 0xce3   :  { %6889 = vmatprep.subr.mxu0 %v2100_v11 }
 0xce4   :  { %6890 = vmatpush3.msra.mxu0 %v2100_v11 }
 0xce5   :  { %6901 = vmatprep.subr.mxu0 %v8350_v55 }
 0xcea   :  { %v2056_v61 = vpop.f32.mrf.mxu1 }
 0xceb   :  { %v2057_v27 = vadd.f32 %v2056_v61, %v1843_v54 }
 0xcec   :  { %v2058_v17 = vpop.f32.mrf.mxu1 }
 0xced   :  { %v2059_v19 = vadd.f32 %v2058_v17, %v1847_v8 }
 0xcee   :  { %v2060_v33 = vpop.f32.mrf.mxu1 }
 0xcef   :  { %v2061_v12 = vadd.f32 %v2060_v33, %v1843_v54 }
 0xcf0   :  { %v2062_v7 = vpop.f32.mrf.mxu1 }
 0xcf1   :  { %6880 = vmatprep.subr.mxu1 %v2061_v12  ;;  %v2063_v15 = vadd.f32 %v2062_v7, %v1847_v8  ;;  %v7261_v7 = vld [vmem:[%s9409_s6 + $0xa8] sm:$0xff]   ;;  %v7263_v8 = vld [vmem:[%s9409_s6 + $0xa0] sm:$0xff]  }
 0xcf2   :  { %6881 = vmatpush3.xpose.msra.mxu1 %v2061_v12 }
 0xcf3   :  { %6882 = vmatprep.subr.mxu1 %v2057_v27 }
 0xcf6   :  { %6883 = vmatpush3.xpose.msra.mxu1 %v2057_v27  ;;  %v7259_v27 = vld [vmem:[%s9409_s6 + $0xb0] sm:$0xff]  }
 0xcf7   :  { %6894 = vmatprep.subr.mxu1 %v2063_v15 }
 0xcf9   :  { %6885 = vmatmul.mubr.f32.vlgmr.msra.gmra.mxu1 %v2018_v16  ;;  %v7269_v16 = vld [vmem:[%s9409_s6 + $0x88] sm:$0xff]  }
 0xcfa   :  { %6895 = vmatpush3.xpose.msra.mxu1 %v2063_v15  ;;  %6898 = vmatprep.mubr.f32.mxu1 %v2016_v18  ;;  %v7267_v15 = vld [vmem:[%s9409_s6 + $0x90] sm:$0xff]  }
 0xcfb   :  { %6896 = vmatprep.subr.mxu1 %v2059_v19 }
 0xcfe   :  { %6897 = vmatpush3.xpose.msra.mxu1 %v2059_v19 }
 0xcff   :  { %6928 = vmatprep.subr.bf16.mxu1 %v7652_v23 }
 0xd01   :  { %6899 = vmatmul.mubr.f32.vlgmr.msra.gmra.mxu1 %v2020_v26 }
 0xd02   :  { %6944 = vmatprep.mubr.msk.bf16.mxu1 %vm7653_vm7, %v7652_v23  ;;  %6929 = vmatpush3.bf16.msra.mxu1 %v7258_v62 }
 0xd03   :  { %6930 = vmatprep.subr.bf16.mxu1 %v7652_v23 }
 0xd06   :  { %6931 = vmatpush3.bf16.msra.mxu1 %v7259_v27 }
 0xd07   :  { %6932 = vmatprep.subr.bf16.mxu1 %v7652_v23 }
 0xd0a   :  { %6933 = vmatpush3.bf16.msra.mxu1 %v7261_v7 }
 0xd0b   :  { %6934 = vmatprep.subr.bf16.mxu1 %v7652_v23 }
 0xd0e   :  { %6935 = vmatpush3.bf16.msra.mxu1 %v7263_v8 }
 0xd0f   :  { %6936 = vmatprep.subr.bf16.mxu1 %v7652_v23 }
 0xd12   :  { %6937 = vmatpush3.bf16.msra.mxu1 %v7265_v10 }
 0xd13   :  { %6938 = vmatprep.subr.bf16.mxu1 %v7652_v23 }
 0xd16   :  { %6939 = vmatpush3.bf16.msra.mxu1 %v7267_v15 }
 0xd17   :  { %6940 = vmatprep.subr.bf16.mxu1 %v7652_v23 }
 0xd1a   :  { %6941 = vmatpush3.bf16.msra.mxu1 %v7269_v16 }
 0xd1b   :  { %6942 = vmatprep.subr.bf16.mxu1 %v7652_v23 }
 0xdb9   :  { %v6886_v13 = vpop.f32.mrf.mxu1 }
 0xdba   :  { %v2180_v22 = vadd.f32 %v6886_v13, %v8000_v46 }
 0xdbb   :  { %v2174_v36 = vpop.f32.mrf.mxu1 }
 0xdbc   :  { %v2175_v44 = vadd.f32 %v2174_v36, %v8003_v48  ;;  %v2186_v32 = vsel %vm893_vm6, %v2180_v22, -inf }
 0xdbd   :  { %2187 = vmax.xlane.f32.xlu1 %v2186_v32 }
 0xdbe   :  { %v2183_v28 = vsel %vm893_vm6, %v2175_v44, -inf }
 0xdbf   :  { %2184 = vmax.xlane.f32.xlu0 %v2183_v28 }
 0xdc1   :  { %v6900_v21 = vpop.f32.mrf.mxu1 }
 0xdc2   :  { %v2359_v51 = vadd.f32 %v6900_v21, %v8000_v46 }
 0xdc3   :  { %v2353_v29 = vpop.f32.mrf.mxu1 }
 0xdc4   :  { %v2354_v58 = vadd.f32 %v2353_v29, %v8003_v48  ;;  %v2365_v30 = vsel %vm893_vm6, %v2359_v51, -inf  ;;  %v7260_v29 = vld [vmem:[%s9409_s6 + $0xf8] sm:$0xff]  }
 0xdc5   :  { %2366 = vmax.xlane.f32.xlu1 %v2365_v30  ;;  %v7266_v30 = vld [vmem:[%s9409_s6 + $0xe0] sm:$0xff]  }
 0xdc6   :  { %v2362_v31 = vsel %vm893_vm6, %v2354_v58, -inf }
 0xdc7   :  { %2363 = vmax.xlane.f32.xlu0 %v2362_v31  ;;  %v7268_v31 = vld [vmem:[%s9409_s6 + $0xd8] sm:$0xff]  }
 0xe46   :  { %v2188_v38 = vpop.xlane.xlu1 %2187 }
 0xe47   :  { %v2190_v47 = vsub.f32 %v2180_v22, %v2188_v38  ;;  %v7270_v38 = vld [vmem:[%s9409_s6 + $0xd0] sm:$0xff]  }
 0xe48   :  { %v2185_v5 = vpop.xlane.xlu0 %2184 }
 0xe49   :  { %v2193_v49 = vmul.f32 1.442695, %v2190_v47  ;;  %v2189_v6 = vsub.f32 %v2175_v44, %v2185_v5  ;;  %v7271_v47 = vld [vmem:[%s9409_s6 + $0x80] sm:$0xff]   ;;  %v7272_v5 = vld [vmem:[%s9409_s6 + $0xc8] sm:$0xff]  }
 0xe4a   :  { %6943 = vmatpush3.bf16.msra.mxu1 %v7271_v47 }
 0xe4b   :  { %7518 = vpow2.f32 %v2193_v49  ;;  %v2191_v50 = vmul.f32 1.442695, %v2189_v6  ;;  %v7273_v49 = vld [vmem:[%s9409_s6 + $0xc0] sm:$0xff]  }
 0xe4d   :  { %7520 = vpow2.f32 %v2191_v50 }
 0xe4e   :  { %v2367_v63 = vpop.xlane.xlu1 %2366 }
 0xe4f   :  { %v2369_v53 = vsub.f32 %v2359_v51, %v2367_v63 }
 0xe50   :  { %v2364_v46 = vpop.xlane.xlu0 %2363 }
 0xe51   :  { %v2372_v11 = vmul.f32 1.442695, %v2369_v53  ;;  %v2368_v57 = vsub.f32 %v2354_v58, %v2364_v46 }
 0xe53   :  { %7522 = vpow2.f32 %v2372_v11  ;;  %v2370_v48 = vmul.f32 1.442695, %v2368_v57 }
 0xe55   :  { %7524 = vpow2.f32 %v2370_v48 }
 0xe58   :  { %v7519_v59 = vpop.eup %7518 }
 0xe59   :  { %v2198_v60 = vsel %vm893_vm6, %v7519_v59, 0.0 }
 0xe5a   :  { %v7521_v61 = vpop.eup %7520  ;;  %2199 = vadd.xlane.f32.xlu1 %v2198_v60 }
 0xe5b   :  { %v2195_v17 = vsel %vm893_vm6, %v7521_v61, 0.0 }
 0xe5c   :  { %2196 = vadd.xlane.f32.xlu0 %v2195_v17 }
 0xe60   :  { %v7523_v54 = vpop.eup %7522 }
 0xe61   :  { %v2377_v33 = vsel %vm893_vm6, %v7523_v54, 0.0 }
 0xe62   :  { %v7525_v1 = vpop.eup %7524  ;;  %2378 = vadd.xlane.f32.xlu1 %v2377_v33 }
 0xe63   :  { %v2374_v12 = vsel %vm893_vm6, %v7525_v1, 0.0 }
 0xe64   :  { %2375 = vadd.xlane.f32.xlu0 %v2374_v12 }
 0xee3   :  { %v2200_v18 = vpop.xlane.xlu1 %2199 }
 0xee4   :  { %7526 = vrcp.f32 %v2200_v18 }
 0xee5   :  { %v2197_v19 = vpop.xlane.xlu0 %2196 }
 0xee6   :  { %7528 = vrcp.f32 %v2197_v19 }
 0xeeb   :  { %v2379_v26 = vpop.xlane.xlu1 %2378 }
 0xeec   :  { %7530 = vrcp.f32 %v2379_v26 }
 0xeed   :  { %v2376_v13 = vpop.xlane.xlu0 %2375 }
 0xeee   :  { %7532 = vrcp.f32 %v2376_v13 }
 0xef1   :  { %v7527_v22 = vpop.eup %7526 }
 0xef2   :  { %v2204_v32 = vmul.f32 %v7527_v22, %v7519_v59 }
 0xef3   :  { %v7529_v36 = vpop.eup %7528 }
 0xef4   :  { %v2203_v44 = vmul.f32 %v7529_v36, %v7521_v61  ;;  %v8453_v61 = vld [vmem:[%s9434_s24 + $0x8] sm:$0xff] }
 0xef5   :  { %v2647_v17 = vrot.slane %v8453_v61, %v7879_v20 }
 0xef6   :  { %6891 = vmatprep.mubr.msk.f32.mxu0 %vm893_vm6, %v2203_v44 }
 0xef7   :  { %6892 = vmatmul.mubr.msk.f32.vlgmr.msra.gmra.mxu0 %vm893_vm6, %v2204_v32 }
 0xef8   :  { %6902 = vmatpush3.msra.mxu0 %v8350_v55  ;;  %v7262_v55 = vld [vmem:[%s9409_s6 + $0xf0] sm:$0xff]  }
 0xef9   :  { %6903 = vmatprep.subr.mxu0 %v8348_v52  ;;  %v7531_v28 = vpop.eup %7530 }
 0xefa   :  { %6904 = vmatpush3.msra.mxu0 %v8348_v52  ;;  %v2383_v58 = vmul.f32 %v7531_v28, %v7523_v54  ;;  %v7264_v52 = vld [vmem:[%s9409_s6 + $0xe8] sm:$0xff]  }
 0xefb   :  { %v7533_v21 = vpop.eup %7532  ;;  %6908 = vmatprep.subr.bf16.mxu0 %v7652_v23 }
 0xefc   :  { %v2382_v51 = vmul.f32 %v7533_v21, %v7525_v1  ;;  %v7276_v21 = vld [vmem:[%s9410_s7 + $0x74] ss:$8 sps:$4 sm:$0xff]  }
 0xefe   :  { %6905 = vmatprep.mubr.msk.f32.mxu0 %vm893_vm6, %v2382_v51  ;;  %v7274_v51 = vld [vmem:[%s9410_s7 + $0x70] ss:$8 sps:$4 sm:$0xff]  }
 0xeff   :  { %6906 = vmatmul.mubr.msk.f32.vlgmr.msra.gmra.mxu0 %vm893_vm6, %v2383_v58  ;;  %v7277_v58 = vld [vmem:[%s9410_s7 + $0x60] ss:$8 sps:$4 sm:$0xff]  }
 0xf00   :  { %6909 = vmatpush3.bf16.msra.mxu0 %v7260_v29  ;;  %6924 = vmatprep.mubr.msk.bf16.mxu0 %vm7653_vm7, %v7652_v23  ;;  %v7279_v29 = vld [vmem:[%s9410_s7 + $0x64] ss:$8 sps:$4 sm:$0xff]  }
 0xf01   :  { %6910 = vmatprep.subr.bf16.mxu0 %v7652_v23 }
 0xf04   :  { %6911 = vmatpush3.bf16.msra.mxu0 %v7262_v55  ;;  %v7282_v55 = vld [vmem:[%s9410_s7 + $0x54] ss:$8 sps:$4 sm:$0xff]  }
 0xf05   :  { %6912 = vmatprep.subr.bf16.mxu0 %v7652_v23 }
 0xf08   :  { %6913 = vmatpush3.bf16.msra.mxu0 %v7264_v52  ;;  %v7280_v52 = vld [vmem:[%s9410_s7 + $0x50] ss:$8 sps:$4 sm:$0xff]  }
 0xf09   :  { %6914 = vmatprep.subr.bf16.mxu0 %v7652_v23 }
 0xf0c   :  { %6915 = vmatpush3.bf16.msra.mxu0 %v7266_v30  ;;  %v7285_v30 = vld [vmem:[%s9410_s7 + $0x44] ss:$8 sps:$4 sm:$0xff]  }
 0xf0d   :  { %6916 = vmatprep.subr.bf16.mxu0 %v7652_v23 }
 0xf10   :  { %6917 = vmatpush3.bf16.msra.mxu0 %v7268_v31  ;;  %v7283_v31 = vld [vmem:[%s9410_s7 + $0x40] ss:$8 sps:$4 sm:$0xff]  }
 0xf11   :  { %6918 = vmatprep.subr.bf16.mxu0 %v7652_v23 }
 0xf14   :  { %6919 = vmatpush3.bf16.msra.mxu0 %v7270_v38 }
 0xf15   :  { %6920 = vmatprep.subr.bf16.mxu0 %v7652_v23 }
 0xf18   :  { %6921 = vmatpush3.bf16.msra.mxu0 %v7272_v5 }
 0xf19   :  { %6922 = vmatprep.subr.bf16.mxu0 %v7652_v23 }
 0xf1c   :  { %6923 = vmatpush3.bf16.msra.mxu0 %v7273_v49 }
 0xf1d   :  { %2760 = vmatprep.subr.bf16.mxu0 %v7276_v21 }
 0xfb7   :  { %v6893_v6 = vpop.f32.mrf.mxu0 }
 0xfb9   :  { %v2277_v50 = vpop.f32.mrf.mxu0 }
 0xfba   :  { %v2286_v63 = vpack.c.bf16 %v6893_v6, %v2277_v50 }
 0xfbc   :  { %6945 = vmatmul.mubr.bf16.vlgmr.msra.gmra.mxu1 %v2286_v63 }
 0xfbf   :  { %v6907_v53 = vpop.f32.mrf.mxu0 }
 0xfc1   :  { %v2456_v46 = vpop.f32.mrf.mxu0 }
 0xfc2   :  { %v2465_v11 = vpack.c.bf16 %v6907_v53, %v2456_v46  ;;  %v2681_v46 = vrot.slane %v8453_v61, %v7884_v24 }
 0xfc4   :  { %6925 = vmatmul.mubr.bf16.vlgmr.msra.gmra.mxu0 %v2465_v11 }
 0xfc5   :  { %2784 = vmatprep.mubr.bf16.mxu0 %v7650_v0  ;;  %2761 = vmatpush1.bf16.msra.mxu0 %v7274_v51 }
 0xfc6   :  { %2762 = vmatprep.subr.bf16.mxu0 %v7279_v29 }
 0xfc9   :  { %2763 = vmatpush1.bf16.msra.mxu0 %v7277_v58 }
 0xfca   :  { %2764 = vmatprep.subr.bf16.mxu0 %v7282_v55 }
 0xfcd   :  { %2765 = vmatpush1.bf16.msra.mxu0 %v7280_v52 }
 0xfce   :  { %2766 = vmatprep.subr.bf16.mxu0 %v7285_v30 }
 0xfd1   :  { %2767 = vmatpush1.bf16.msra.mxu0 %v7283_v31 }
 0xfd2   :  { %6948 = vmatprep.subr.mxu0 %v7652_v23 }
0x107c   :  { %v2637_v57 = vpop.f32.mrf.mxu1 }
0x107e   :  { %v6946_v48 = vpop.f32.mrf.mxu1 }
0x1080   :  { %v2640_v59 = vpop.f32.mrf.mxu1 }
0x1082   :  { %v6947_v60 = vpop.f32.mrf.mxu1 }
0x1084   :  { %v2548_v54 = vpop.f32.mrf.mxu0 }
0x1085   :  { %v2638_v33 = vadd.f32 %v2637_v57, %v2548_v54 }
0x1086   :  { %v6926_v1 = vpop.f32.mrf.mxu0 }
0x1087   :  { %v2648_v12 = vadd.f32 %v2647_v17, %v2638_v33  ;;  %v7286_v1 = vld [vmem:[%s9411_s8 + $0xf8] sm:$0xff]  }
0x1088   :  { %v2551_v62 = vpop.f32.mrf.mxu0  ;;  %6662 = vmatprep.subr.bf16.mxu1 %v7286_v1 }
0x1089   :  { %v8458_v27 = vadd.f32 %v2648_v12, %v8240_v4  ;;  %v2641_v7 = vadd.f32 %v2640_v59, %v2551_v62  ;;  %v2687_v59 = vrot.slane %v8453_v61, %v7949_v2  ;;  %v7287_v12 = vld [vmem:[%s9411_s8 + $0xb8] sm:$0xff]   ;;  %v7288_v62 = vld [vmem:[%s9411_s8 + $0xf0] sm:$0xff]  }
0x108a   :  { %v6927_v8 = vpop.f32.mrf.mxu0  ;;  %6663 = vmatpush3.bf16.msra.mxu1 %v7287_v12 }
0x108b   :  { %v2649_v10 = vadd.f32 %v2647_v17, %v2641_v7  ;;  %v2652_v15 = vsel %vm172_vm0, %v8458_v27, 0.0  ;;  %v7289_v7 = vld [vmem:[%s9411_s8 + $0xb0] sm:$0xff]   ;;  %6664 = vmatprep.subr.bf16.mxu1 %v7288_v62  ;;  %v7290_v8 = vld [vmem:[%s9411_s8 + $0xe8] sm:$0xff]  }
0x108c   :  { %2653 = vadd.xlane.f32.xlu0 %v2652_v15  ;;  %v7292_v15 = vld [vmem:[%s9411_s8 + $0xe0] sm:$0xff]  }
0x108d   :  { %v8463_v16 = vadd.f32 %v2649_v10, %v8245_v14  ;;  %v7291_v10 = vld [vmem:[%s9411_s8 + $0xa8] sm:$0xff]  }
0x108e   :  { %6665 = vmatpush3.bf16.msra.mxu1 %v7289_v7 }
0x108f   :  { %v2655_v18 = vsel %vm172_vm0, %v8463_v16, 0.0  ;;  %6666 = vmatprep.subr.bf16.mxu1 %v7290_v8 }
0x1090   :  { %2656 = vadd.xlane.f32.xlu1 %v2655_v18  ;;  %v7293_v18 = vld [vmem:[%s9411_s8 + $0xa0] sm:$0xff]  }
0x1092   :  { %6667 = vmatpush3.bf16.msra.mxu1 %v7291_v10 }
0x1093   :  { %6668 = vmatprep.subr.bf16.mxu1 %v7292_v15 }
0x1096   :  { %6669 = vmatpush3.bf16.msra.mxu1 %v7293_v18 }
0x1115   :  { %v2654_v19 = vpop.xlane.xlu0 %2653 }
0x1116   :  { %v2658_v26 = vmul.f32 0.015625, %v2654_v19  ;;  %v7294_v19 = vld [vmem:[%s9411_s8 + $0xd8] sm:$0xff]  }
0x1117   :  { %6670 = vmatprep.subr.bf16.mxu1 %v7294_v19 }
0x1118   :  { %v2660_v13 = vsub.f32 %v8458_v27, %v2658_v26  ;;  %v7295_v26 = vld [vmem:[%s9411_s8 + $0x98] sm:$0xff]  }
0x1119   :  { %v2657_v4 = vpop.xlane.xlu1 %2656  ;;  %6671 = vmatpush3.bf16.msra.mxu1 %v7295_v26 }
0x111a   :  { %v2659_v22 = vmul.f32 0.015625, %v2657_v4  ;;  %v2662_v36 = vmul.f32 %v2660_v13, %v2660_v13  ;;  %v7297_v4 = vld [vmem:[%s9411_s8 + $0x90] sm:$0xff]  }
0x111c   :  { %v2661_v44 = vsub.f32 %v8463_v16, %v2659_v22  ;;  %v2664_v32 = vsel %vm172_vm0, %v2662_v36, 0.0  ;;  %v7298_v22 = vld [vmem:[%s9411_s8 + $0xc8] sm:$0xff]  }
0x111d   :  { %2665 = vadd.xlane.f32.xlu0 %v2664_v32  ;;  %v7299_v36 = vld [vmem:[%s9411_s8 + $0x88] sm:$0xff]   ;;  %v7301_v32 = vld [vmem:[%s9411_s8 + $0x80] sm:$0xff]  }
0x111e   :  { %v2663_v28 = vmul.f32 %v2661_v44, %v2661_v44 }
0x1120   :  { %v2667_v14 = vsel %vm172_vm0, %v2663_v28, 0.0  ;;  %v2694_v28 = vrot.slane %v8336_v25, %v7833_v45 }
0x1121   :  { %2668 = vadd.xlane.f32.xlu1 %v2667_v14  ;;  %v2698_v14 = vrot.slane %v8336_v25, %v8196_v56 }
0x1122   :  { %v2704_v21 = vrot.slane %v2694_v28, %v7833_v45 }
0x1123   :  { %v2708_v51 = vrot.slane %v2698_v14, %v7833_v45 }
0x11a6   :  { %v2666_v38 = vpop.xlane.xlu0 %2665 }
0x11a7   :  { %v2670_v47 = vmul.f32 0.015625, %v2666_v38 }
0x11a9   :  { %v2672_v5 = vadd.f32 1e-05, %v2670_v47 }
0x11aa   :  { %v2669_v49 = vpop.xlane.xlu1 %2668 }
0x11ab   :  { %7534 = vrsqrt.f32 %v2672_v5  ;;  %v2671_v6 = vmul.f32 0.015625, %v2669_v49 }
0x11ad   :  { %v2673_v50 = vadd.f32 1e-05, %v2671_v6 }
0x11af   :  { %7536 = vrsqrt.f32 %v2673_v50 }
0x11b8   :  { %v7535_v63 = vpop.eup %7534 }
0x11b9   :  { %v2676_v53 = vmul.f32 %v7535_v63, %v2660_v13  ;;  %v7296_v13 = vld [vmem:[%s9411_s8 + $0xd0] sm:$0xff]  }
0x11ba   :  { %6672 = vmatprep.subr.bf16.mxu1 %v7296_v13 }
0x11bb   :  { %v2682_v48 = vmul.f32 %v2681_v46, %v2676_v53  ;;  %6673 = vmatpush3.bf16.msra.mxu1 %v7297_v4 }
0x11bc   :  { %v7537_v11 = vpop.eup %7536  ;;  %6674 = vmatprep.subr.bf16.mxu1 %v7298_v22 }
0x11bd   :  { %v2677_v57 = vmul.f32 %v7537_v11, %v2661_v44  ;;  %v2688_v17 = vadd.f32 %v2687_v59, %v2682_v48  ;;  %v7300_v44 = vld [vmem:[%s9411_s8 + $0xc0] sm:$0xff]  }
0x11bf   :  { %v2683_v60 = vmul.f32 %v2681_v46, %v2677_v57  ;;  %6675 = vmatpush3.bf16.msra.mxu1 %v7299_v36 }
0x11c0   :  { %6676 = vmatprep.subr.bf16.mxu1 %v7300_v44 }
0x11c1   :  { %v2689_v54 = vadd.f32 %v2687_v59, %v2683_v60 }
0x11c3   :  { %v2690_v33 = vpack.c.bf16 %v2689_v54, %v2688_v17  ;;  %6677 = vmatpush3.bf16.msra.mxu1 %v7301_v32 }
0x11c5   :  { %6374 = vmatmul.mubr.msk.bf16.vlgmr.msra.gmra.mxu0 %vm172_vm0, %v2690_v33 }
0x11c6   :  { %6952 = vmatprep.mubr.msk.f32.mxu0 %vm7653_vm7, %v7652_v23 }
0x1285   :  { %v2786_v29 = vpop.f32.mrf.mxu0 }
0x1286   :  { %v8557_v58 = vadd.f32 %v2786_v29, %v2704_v21 }
0x1287   :  { %v2788_v55 = vpop.f32.mrf.mxu0 }
0x1288   :  { %v8560_v52 = vmul.f32 0.70710677, %v8557_v58  ;;  %v8562_v30 = vadd.f32 %v2788_v55, %v2708_v51 }
0x1289   :  { %v2790_v31 = vpop.f32.mrf.mxu0 }
0x128a   :  { %v2803_v38 = vand.u32 2147483647, %v8560_v52  ;;  %v8566_v47 = vmul.f32 0.70710677, %v8562_v30  ;;  %v8568_v25 = vadd.f32 %v2790_v31, %v2704_v21  ;;  %vm2883_vm13 = vcmp.ge.f32.partialorder %v8560_v52, 0.0 }
0x128b   :  { %v2792_v5 = vpop.f32.mrf.mxu0 }
0x128c   :  { %v2807_v49 = vmul.f32 0.3275911, %v2803_v38  ;;  %v2804_v6 = vand.u32 2147483647, %v8566_v47  ;;  %v8572_v50 = vmul.f32 0.70710677, %v8568_v25  ;;  %v8574_v63 = vadd.f32 %v2792_v5, %v2708_v51 }
0x128d   :  { %v2859_v1 = vsub.f32 0.0, %v2803_v38  ;;  %vm2884_vm12 = vcmp.ge.f32.partialorder %v8566_v47, 0.0  ;;  %v2796_v47 = vmul.f32 0.5, %v8562_v30 }
0x128e   :  { %v2811_v53 = vadd.f32 1.0, %v2807_v49  ;;  %v2808_v46 = vmul.f32 0.3275911, %v2804_v6  ;;  %v2805_v11 = vand.u32 2147483647, %v8572_v50  ;;  %v2860_v12 = vsub.f32 0.0, %v2804_v6 }
0x128f   :  { %v8578_v57 = vmul.f32 0.70710677, %v8574_v63  ;;  %v2863_v62 = vmul.f32 %v2859_v1, %v2803_v38  ;;  %vm2885_vm14 = vcmp.ge.f32.partialorder %v8572_v50, 0.0 }
0x1290   :  { %7538 = vrcp.f32 %v2811_v53  ;;  %v2812_v48 = vadd.f32 1.0, %v2808_v46  ;;  %v2809_v59 = vmul.f32 0.3275911, %v2805_v11  ;;  %v2861_v7 = vsub.f32 0.0, %v2805_v11 }
0x1291   :  { %v2806_v60 = vand.u32 2147483647, %v8578_v57  ;;  %v2864_v10 = vmul.f32 %v2860_v12, %v2804_v6  ;;  %v2867_v18 = vmul.f32 1.442695, %v2863_v62  ;;  %vm2886_vm15 = vcmp.ge.f32.partialorder %v8578_v57, 0.0 }
0x1292   :  { %7540 = vrcp.f32 %v2812_v48  ;;  %v2813_v17 = vadd.f32 1.0, %v2809_v59  ;;  %v2865_v26 = vmul.f32 %v2861_v7, %v2805_v11 }
0x1293   :  { %v2810_v54 = vmul.f32 0.3275911, %v2806_v60  ;;  %v2862_v19 = vsub.f32 0.0, %v2806_v60  ;;  %v2869_v36 = vmul.f32 1.442695, %v2864_v10 }
0x1294   :  { %7542 = vrcp.f32 %v2813_v17  ;;  %v2871_v51 = vmul.f32 1.442695, %v2865_v26 }
0x1295   :  { %v2814_v33 = vadd.f32 1.0, %v2810_v54  ;;  %v2866_v28 = vmul.f32 %v2862_v19, %v2806_v60 }
0x1297   :  { %7544 = vrcp.f32 %v2814_v33  ;;  %v2873_v6 = vmul.f32 1.442695, %v2866_v28 }
0x1298   :  { %7546 = vpow2.f32 %v2867_v18 }
0x1299   :  { %7548 = vpow2.f32 %v2869_v36 }
0x129a   :  { %7550 = vpow2.f32 %v2871_v51 }
0x129b   :  { %7552 = vpow2.f32 %v2873_v6 }
0x129d   :  { %v7539_v8 = vpop.eup %7538 }
0x129e   :  { %v2823_v15 = vmul.f32 1.0614054, %v7539_v8 }
0x129f   :  { %v7541_v13 = vpop.eup %7540 }
0x12a0   :  { %v6375_v4 = vadd.f32 -1.4531521, %v2823_v15  ;;  %v2824_v22 = vmul.f32 1.0614054, %v7541_v13 }
0x12a1   :  { %v7543_v44 = vpop.eup %7542 }
0x12a2   :  { %v2831_v32 = vmul.f32 %v7539_v8, %v6375_v4  ;;  %v6376_v14 = vadd.f32 -1.4531521, %v2824_v22  ;;  %v2825_v21 = vmul.f32 1.0614054, %v7543_v44 }
0x12a4   :  { %v2835_v29 = vadd.f32 1.4214138, %v2831_v32  ;;  %v7545_v55 = vpop.eup %7544  ;;  %v2832_v31 = vmul.f32 %v7541_v13, %v6376_v14  ;;  %v6377_v38 = vadd.f32 -1.4531521, %v2825_v21 }
0x12a5   :  { %v2826_v49 = vmul.f32 1.0614054, %v7545_v55  ;;  %v7547_v19 = vpop.eup %7546 }
0x12a6   :  { %v2839_v5 = vmul.f32 %v7539_v8, %v2835_v29  ;;  %v2836_v53 = vadd.f32 1.4214138, %v2832_v31  ;;  %v2833_v46 = vmul.f32 %v7543_v44, %v6377_v38  ;;  %v7549_v14 = vpop.eup %7548 }
0x12a7   :  { %v6378_v48 = vadd.f32 -1.4531521, %v2826_v49  ;;  %v7551_v38 = vpop.eup %7550 }
0x12a8   :  { %v6379_v11 = vadd.f32 -0.28449672, %v2839_v5  ;;  %v2840_v59 = vmul.f32 %v7541_v13, %v2836_v53  ;;  %v2837_v17 = vadd.f32 1.4214138, %v2833_v46  ;;  %v7553_v46 = vpop.eup %7552 }
0x12a9   :  { %v2834_v60 = vmul.f32 %v7545_v55, %v6378_v48 }
0x12aa   :  { %v2847_v54 = vmul.f32 %v7539_v8, %v6379_v11  ;;  %v6380_v33 = vadd.f32 -0.28449672, %v2840_v59  ;;  %v2841_v1 = vmul.f32 %v7543_v44, %v2837_v17 }
0x12ab   :  { %v2838_v62 = vadd.f32 1.4214138, %v2834_v60 }
0x12ac   :  { %v2851_v12 = vadd.f32 0.2548296, %v2847_v54  ;;  %v2848_v7 = vmul.f32 %v7541_v13, %v6380_v33  ;;  %v6381_v10 = vadd.f32 -0.28449672, %v2841_v1 }
0x12ad   :  { %v2842_v18 = vmul.f32 %v7545_v55, %v2838_v62  ;;  %v2797_v62 = vmul.f32 0.5, %v8568_v25  ;;  %v8593_v25 = vld [vmem:[%s9412_s10] sm:$0xff] }
0x12ae   :  { %v2855_v15 = vmul.f32 %v7539_v8, %v2851_v12  ;;  %v2852_v26 = vadd.f32 0.2548296, %v2848_v7  ;;  %v2849_v4 = vmul.f32 %v7543_v44, %v6381_v10  ;;  %v2798_v10 = vmul.f32 0.5, %v8574_v63 }
0x12af   :  { %v6382_v36 = vadd.f32 -0.28449672, %v2842_v18  ;;  %v3449_v30 = vsel %vm172_vm0, %v8593_v25, 0.0 }
0x12b0   :  { %v2875_v22 = vmul.f32 %v7547_v19, %v2855_v15  ;;  %v2856_v32 = vmul.f32 %v7541_v13, %v2852_v26  ;;  %v2853_v28 = vadd.f32 0.2548296, %v2849_v4  ;;  %v2795_v15 = vmul.f32 0.5, %v8557_v58  ;;  %3450 = vadd.xlane.f32.xlu1 %v3449_v30  ;;  %v7326_v30 = vld [vmem:[%s9414_s14 + $0xa4] ss:$24 sps:$4 sm:$0xff]  }
0x12b1   :  { %v2850_v21 = vmul.f32 %v7545_v55, %v6382_v36 }
0x12b2   :  { %v2879_v51 = vsub.f32 1.0, %v2875_v22  ;;  %v2876_v29 = vmul.f32 %v7549_v14, %v2856_v32  ;;  %v2857_v31 = vmul.f32 %v7543_v44, %v2853_v28  ;;  %v3050_v28 = vmul.u32 8, %v7822_v42 }
0x12b3   :  { %v2854_v5 = vadd.f32 0.2548296, %v2850_v21 }
0x12b4   :  { %v2880_v49 = vsub.f32 1.0, %v2876_v29  ;;  %v2877_v6 = vmul.f32 %v7551_v38, %v2857_v31  ;;  %v2887_v8 = vsub.f32 0.0, %v2879_v51  ;;  %vm3051_vm2 = vcmp.eq.s32.totalorder %v7977_v35, %v3050_v28 }
0x12b5   :  { %v2858_v53 = vmul.f32 %v7545_v55, %v2854_v5  ;;  %v6399_v5 = vsel %vm3051_vm2, 1.0, %v7652_v23 }
0x12b6   :  { %v2888_v11 = vsub.f32 0.0, %v2880_v49  ;;  %v2881_v48 = vsub.f32 1.0, %v2877_v6  ;;  %v2891_v44 = vsel %vm2883_vm13, %v2879_v51, %v2887_v8  ;;  %v3047_v51 = vrot.slane %v8453_v61, %v8134_v9 }
0x12b7   :  { %v2878_v59 = vmul.f32 %v7553_v46, %v2858_v53  ;;  %v2895_v55 = vadd.f32 1.0, %v2891_v44 }
0x12b8   :  { %v2889_v17 = vsub.f32 0.0, %v2881_v48  ;;  %v2892_v13 = vsel %vm2884_vm12, %v2880_v49, %v2888_v11  ;;  %v8615_v49 = vld [vmem:[%s9412_s10 + $0x8] sm:$0xff] }
0x12b9   :  { %v2882_v54 = vsub.f32 1.0, %v2878_v59  ;;  %v2896_v12 = vadd.f32 1.0, %v2892_v13  ;;  %v2899_v26 = vmul.f32 %v2895_v55, %v2795_v15  ;;  %v3452_v46 = vsel %vm172_vm0, %v8615_v49, 0.0  ;;  %v7302_v55 = vld [vmem:[%s9413_s9 + $0x18] sm:$0xff]   ;;  %v7310_v15 = vld [vmem:[%s9413_s9 + $0x8] sm:$0xff]  }
0x12ba   :  { %v2893_v60 = vsel %vm2885_vm14, %v2881_v48, %v2889_v17 }
0x12bb   :  { %v2897_v33 = vadd.f32 1.0, %v2893_v60  ;;  %v2890_v1 = vsub.f32 0.0, %v2882_v54  ;;  %v2900_v18 = vmul.f32 %v2896_v12, %v2796_v47  ;;  %v7306_v47 = vld [vmem:[%s9413_s9 + $0x10] sm:$0xff]  }
0x12bd   :  { %v2894_v7 = vsel %vm2886_vm15, %v2882_v54, %v2890_v1  ;;  %v2901_v50 = vmul.f32 %v2897_v33, %v2797_v62  ;;  %v7305_v62 = vld [vmem:[%s9414_s14 + $0x94] ss:$24 sps:$4 sm:$0xff]  }
0x12be   :  { %v2898_v52 = vadd.f32 1.0, %v2894_v7  ;;  %v7303_v7 = vld [vmem:[%s9414_s14 + $0x90] ss:$24 sps:$4 sm:$0xff]   ;;  %3675 = vmatprep.subr.bf16.mxu1 %v7305_v62  ;;  %v7329_v62 = vld [vmem:[%s9414_s14 + $0x3c] ss:$24 sps:$4 sm:$0xff]  }
0x12bf   :  { %v2903_v22 = vpack.c.bf16 %v2901_v50, %v2899_v26  ;;  %v7313_v50 = vld [vmem:[%s9414_s14 + $0x34] ss:$24 sps:$4 sm:$0xff]   ;;  %v7315_v26 = vld [vmem:[%s9414_s14] ss:$24 sps:$4 sm:$0xff]  }
0x12c0   :  { %v2902_v19 = vmul.f32 %v2898_v52, %v2798_v10  ;;  %v7309_v10 = vld [vmem:[%s9414_s14 + $0x64] ss:$24 sps:$4 sm:$0xff]   ;;  %v7307_v52 = vld [vmem:[%s9414_s14 + $0x60] ss:$24 sps:$4 sm:$0xff]  }
0x12c2   :  { %v2904_v4 = vpack.c.bf16 %v2902_v19, %v2900_v18  ;;  %v7311_v18 = vld [vmem:[%s9414_s14 + $0x30] ss:$24 sps:$4 sm:$0xff]   ;;  %v7314_v19 = vld [vmem:[%s9413_s9] sm:$0xff]  }
0x12c4   :  { %3033 = vmatprep.mubr.bf16.mxu1 %v2904_v4  ;;  %v7317_v4 = vld [vmem:[%s9414_s14 + $0x4] ss:$24 sps:$4 sm:$0xff]  }
0x12c5   :  { %3034 = vmatmul.mubr.bf16.vlgmr.msra.gmra.mxu1 %v2903_v22  ;;  %v7320_v22 = vld [vmem:[%s9414_s14 + $0x9c] ss:$24 sps:$4 sm:$0xff]  }
0x12c6   :  { %3699 = vmatprep.mubr.bf16.mxu1 %v7650_v0  ;;  %3676 = vmatpush1.bf16.msra.mxu1 %v7303_v7  ;;  %v7332_v7 = vld [vmem:[%s9414_s14 + $0x74] ss:$24 sps:$4 sm:$0xff]  }
0x12c7   :  { %3677 = vmatprep.subr.bf16.mxu1 %v7309_v10  ;;  %v7330_v10 = vld [vmem:[%s9414_s14 + $0x70] ss:$24 sps:$4 sm:$0xff]  }
0x12ca   :  { %3678 = vmatpush1.bf16.msra.mxu1 %v7307_v52  ;;  %v7335_v52 = vld [vmem:[%s9414_s14 + $0xc] ss:$24 sps:$4 sm:$0xff]  }
0x12cb   :  { %3679 = vmatprep.subr.bf16.mxu1 %v7313_v50  ;;  %v7333_v50 = vld [vmem:[%s9414_s14 + $0x8] ss:$24 sps:$4 sm:$0xff]  }
0x12ce   :  { %3680 = vmatpush1.bf16.msra.mxu1 %v7311_v18  ;;  %v7336_v18 = vld [vmem:[%s9414_s14 + $0x40] ss:$24 sps:$4 sm:$0xff]  }
0x12cf   :  { %3681 = vmatprep.subr.bf16.mxu1 %v7317_v4  ;;  %v8742_v4 = vld [vmem:[%s9416_s13] sm:$0xff] }
0x12d2   :  { %3682 = vmatpush1.bf16.msra.mxu1 %v7315_v26  ;;  %v7339_v26 = vld [vmem:[%s9414_s14 + $0x10] ss:$24 sps:$4 sm:$0xff]  }
0x12d3   :  { %3761 = vmatprep.subr.bf16.mxu1 %v7326_v30  ;;  %v3497_v30 = vrot.slane %v8742_v4, %v7952_v3 }
0x1339   :  { %v3451_v61 = vpop.xlane.xlu1 %3450 }
0x1385   :  { %v6678_v58 = vpop.f32.mrf.mxu1 }
0x1387   :  { %v6679_v63 = vpop.f32.mrf.mxu1 }
0x1388   :  { %v6680_v36 = vadd.f32 %v6679_v63, %v6678_v58 }
0x1389   :  { %v6681_v57 = vpop.f32.mrf.mxu1 }
0x138a   :  { %v3042_v21 = vadd.f32 %v6680_v36, %v8458_v27  ;;  %v3455_v27 = vmul.f32 0.015625, %v3451_v61 }
0x138b   :  { %v6682_v32 = vpop.f32.mrf.mxu1 }
0x138c   :  { %v6683_v14 = vadd.f32 %v6682_v32, %v6681_v57  ;;  %v3048_v38 = vadd.f32 %v3047_v51, %v3042_v21  ;;  %v8610_v35 = vsub.f32 %v8593_v25, %v3455_v27 }
0x138e   :  { %v3043_v29 = vadd.f32 %v6683_v14, %v8463_v16  ;;  %v3459_v8 = vmul.f32 %v8610_v35, %v8610_v35 }
0x1390   :  { %v3049_v31 = vadd.f32 %v3047_v51, %v3043_v29  ;;  %v3461_v11 = vsel %vm172_vm0, %v3459_v8, 0.0 }
0x1392   :  { %6949 = vmatpush3.msra.mxu0 %v3049_v31  ;;  %v8678_v31 = vld [vmem:[%s9415_s12] sm:$0xff] }
0x1393   :  { %6950 = vmatprep.subr.mxu0 %v7652_v23 }
0x1394   :  { %6951 = vmatpush3.msra.mxu0 %v3048_v38  ;;  %v7647_v38 = vld [vmem:[%s9434_s24] sm:$0xff] }
0x1395   :  { %6953 = vmatmul.mubr.msk.f32.vlgmr.msra.gmra.mxu0 %vm893_vm6, %v6399_v5  ;;  %6955 = vmatprep.subr.bf16.mxu0 %v7652_v23  ;;  %v3144_v5 = vrot.slane %v7647_v38, %v7952_v3 }
0x1396   :  { %6963 = vmatprep.mubr.msk.bf16.mxu0 %vm7653_vm7, %v7652_v23  ;;  %6956 = vmatpush3.bf16.msra.mxu0 %v7302_v55 }
0x1397   :  { %6957 = vmatprep.subr.bf16.mxu0 %v7652_v23 }
0x139a   :  { %6958 = vmatpush3.bf16.msra.mxu0 %v7306_v47  ;;  %v7327_v47 = vld [vmem:[%s9414_s14 + $0x38] ss:$24 sps:$4 sm:$0xff]  }
0x139b   :  { %6959 = vmatprep.subr.bf16.mxu0 %v7652_v23 }
0x139e   :  { %6960 = vmatpush3.bf16.msra.mxu0 %v7310_v15  ;;  %v7338_v15 = vld [vmem:[%s9414_s14 + $0x44] ss:$24 sps:$4 sm:$0xff]  }
0x139f   :  { %6961 = vmatprep.subr.bf16.mxu0 %v7652_v23 }
0x13a2   :  { %6962 = vmatpush3.bf16.msra.mxu0 %v7314_v19  ;;  %v7341_v19 = vld [vmem:[%s9414_s14 + $0x14] ss:$24 sps:$4 sm:$0xff]  }
0x13a3   :  { %3718 = vmatprep.subr.bf16.mxu0 %v7320_v22  ;;  %v3493_v22 = vrot.slane %v8742_v4, %v7825_v43 }
0x1455   :  { %v3123_v16 = vpop.f32.mrf.mxu0 }
0x1456   :  { %v3128_v6 = vsel %vm3127_vm4, %v3123_v16, 0.0 }
0x1457   :  { %3129 = vadd.xlane.f32.xlu0 %v3128_v6  ;;  %v6954_v53 = vpop.f32.mrf.mxu0  ;;  %v3149_v6 = vrot.slane %v7647_v38, %v8196_v56 }
0x1458   :  { %v3478_v53 = vrot.slane %v8678_v31, %v7952_v3 }
0x145b   :  { %3453 = vadd.xlane.f32.xlu0 %v3452_v46 }
0x145f   :  { %3462 = vadd.xlane.f32.xlu0 %v3461_v11 }
0x14e0   :  { %v3130_v48 = vpop.xlane.xlu0 %3129 }
0x14e1   :  { %v3131_v59 = vmul.f32 0.015625, %v3130_v48 }
0x14e3   :  { %v3132_v17 = vsub.f32 %v3123_v16, %v3131_v59 }
0x14e4   :  { %v3454_v13 = vpop.xlane.xlu0 %3453 }
0x14e5   :  { %v3456_v54 = vmul.f32 0.015625, %v3454_v13  ;;  %v3133_v44 = vmul.f32 %v3132_v17, %v3132_v17  ;;  %v3484_v13 = vrot.slane %v8678_v31, %v8196_v56 }
0x14e7   :  { %v8624_v60 = vsub.f32 %v8615_v49, %v3456_v54  ;;  %v3134_v33 = vsel %vm3127_vm4, %v3133_v44, 0.0  ;;  %v7318_v54 = vld [vmem:[%s9414_s14 + $0x98] ss:$24 sps:$4 sm:$0xff]  }
0x14e8   :  { %3135 = vadd.xlane.f32.xlu1 %v3134_v33  ;;  %v3463_v58 = vpop.xlane.xlu0 %3462 }
0x14e9   :  { %v3460_v1 = vmul.f32 %v8624_v60, %v8624_v60  ;;  %v3467_v63 = vmul.f32 0.015625, %v3463_v58 }
0x14eb   :  { %v3464_v12 = vsel %vm172_vm0, %v3460_v1, 0.0  ;;  %v3469_v57 = vadd.f32 1e-05, %v3467_v63  ;;  %v3523_v63 = vrot.slane %v3493_v22, %v7825_v43 }
0x14ec   :  { %3465 = vadd.xlane.f32.xlu1 %v3464_v12  ;;  %v7324_v12 = vld [vmem:[%s9414_s14 + $0xa0] ss:$24 sps:$4 sm:$0xff]  }
0x14ed   :  { %7554 = vrsqrt.f32 %v3469_v57 }
0x14fa   :  { %v7555_v29 = vpop.eup %7554 }
0x14fb   :  { %v3473_v27 = vmul.f32 %v7555_v29, %v8610_v35 }
0x14fd   :  { %v3479_v59 = vmul.f32 %v3478_v53, %v3473_v27 }
0x14ff   :  { %v3485_v33 = vadd.f32 %v3484_v13, %v3479_v59 }
0x1571   :  { %v3136_v36 = vpop.xlane.xlu1 %3135 }
0x1572   :  { %v3137_v32 = vmul.f32 0.015625, %v3136_v36  ;;  %v3527_v36 = vrot.slane %v3497_v30, %v7825_v43 }
0x1574   :  { %v3138_v28 = vadd.f32 1e-05, %v3137_v32 }
0x1575   :  { %v3466_v14 = vpop.xlane.xlu1 %3465 }
0x1576   :  { %7556 = vrsqrt.f32 %v3138_v28  ;;  %v3468_v21 = vmul.f32 0.015625, %v3466_v14 }
0x1578   :  { %v3470_v51 = vadd.f32 1e-05, %v3468_v21 }
0x157a   :  { %7558 = vrsqrt.f32 %v3470_v51 }
0x1583   :  { %v7557_v61 = vpop.eup %7556 }
0x1584   :  { %v3140_v16 = vmul.f32 %v7557_v61, %v3132_v17  ;;  %v7323_v17 = vld [vmem:[%s9414_s14 + $0x6c] ss:$24 sps:$4 sm:$0xff]   ;;  %v3501_v61 = vrot.slane %v8742_v4, %v7879_v20 }
0x1586   :  { %v3145_v46 = vmul.f32 %v3144_v5, %v3140_v16  ;;  %v3254_v5 = vld [vmem:[%s9416_s13 + $0x8] sm:$0xf] }
0x1587   :  { %v7559_v8 = vpop.eup %7558  ;;  %v3513_v27 = vrot.slane %v3254_v5, %v7952_v3 }
0x1588   :  { %v3474_v11 = vmul.f32 %v7559_v8, %v8624_v60  ;;  %v3150_v48 = vadd.f32 %v3149_v6, %v3145_v46  ;;  %v7321_v60 = vld [vmem:[%s9414_s14 + $0x68] ss:$24 sps:$4 sm:$0xff]   ;;  %v3505_v6 = vrot.slane %v8742_v4, %v7949_v2  ;;  %v3531_v8 = vrot.slane %v3501_v61, %v7825_v43 }
0x158a   :  { %v3151_v35 = vpack.c.bf16 %v3150_v48, %v3150_v48  ;;  %v3480_v44 = vmul.f32 %v3478_v53, %v3474_v11  ;;  %v3543_v11 = vrot.slane %v3513_v27, %v7825_v43 }
0x158c   :  { %6964 = vmatmul.mubr.msk.bf16.vlgmr.msra.gmra.mxu0 %vm172_vm0, %v3151_v35  ;;  %v3486_v1 = vadd.f32 %v3484_v13, %v3480_v44  ;;  %v3535_v13 = vrot.slane %v3505_v6, %v7825_v43  ;;  %v3509_v35 = vrot.slane %v3254_v5, %v7825_v43 }
0x158d   :  { %3719 = vmatpush1.bf16.msra.mxu0 %v7318_v54  ;;  %3742 = vmatprep.mubr.bf16.mxu0 %v7650_v0 }
0x158e   :  { %3720 = vmatprep.subr.bf16.mxu0 %v7323_v17  ;;  %v3487_v55 = vpack.c.bf16 %v3486_v1, %v3485_v33 }
0x1590   :  { %6430 = vmatmul.mubr.msk.bf16.vlgmr.msra.gmra.mxu1 %vm172_vm0, %v3487_v55 }
0x1591   :  { %3721 = vmatpush1.bf16.msra.mxu0 %v7321_v60  ;;  %3762 = vmatpush1.bf16.msra.mxu1 %v7324_v12 }
0x1592   :  { %3722 = vmatprep.subr.bf16.mxu0 %v7329_v62  ;;  %3763 = vmatprep.subr.bf16.mxu1 %v7332_v7  ;;  %v3539_v62 = vrot.slane %v3509_v35, %v7825_v43 }
0x1593   :  { %3785 = vmatprep.mubr.bf16.mxu1 %v7650_v0 }
0x1595   :  { %3723 = vmatpush1.bf16.msra.mxu0 %v7327_v47  ;;  %3764 = vmatpush1.bf16.msra.mxu1 %v7330_v10 }
0x1596   :  { %3724 = vmatprep.subr.bf16.mxu0 %v7335_v52  ;;  %3765 = vmatprep.subr.bf16.mxu1 %v7338_v15 }
0x1599   :  { %3725 = vmatpush1.bf16.msra.mxu0 %v7333_v50  ;;  %3766 = vmatpush1.bf16.msra.mxu1 %v7336_v18  ;;  %v3246_v18 = vand.u32 7, %v7974_v34 }
0x159a   :  { %3767 = vmatprep.subr.bf16.mxu1 %v7341_v19  ;;  %v3245_v19 = vand.u32 7, %v7822_v42 }
0x159b   :  { %vm3248_vm5 = vcmp.le.s32.totalorder %v7982_v37, %v3246_v18 }
0x159c   :  { %6431 = vmatmul.mubr.msk.bf16.vlgmr.msra.gmra.mxu0 %vm172_vm0, %v3487_v55  ;;  %vm3247_vm8 = vcmp.le.s32.totalorder %v7982_v37, %v3245_v19  ;;  %vm3250_vm9 = vmand %vm7986_vm1, %vm3248_vm5 }
0x159d   :  { %3768 = vmatpush1.bf16.msra.mxu1 %v7339_v26  ;;  %vm3249_vm10 = vmand %vm7991_vm3, %vm3247_vm8  ;;  %v8782_v26 = vsel %vm3250_vm9, 0.0, %v7651_v40 }
0x159e   :  { %v8785_v30 = vsel %vm3249_vm10, 0.0, %v7651_v40 }
0x15a0   :  { %6432 = vmatmul.mubr.msk.bf16.vlgmr.msra.gmra.mxu1 %vm172_vm0, %v3487_v55 }
0x164c   :  { %v8748_v58 = vpop.f32.mrf.mxu0 }
0x164e   :  { %v6965_v57 = vpop.f32.mrf.mxu0 }
0x1650   :  { %v3224_v32 = vpop.f32.mrf.mxu0  ;;  %v3701_v28 = vpop.f32.mrf.mxu1 }
0x1651   :  { %v3702_v14 = vadd.f32 %v3701_v28, %v3523_v63 }
0x1652   :  { %v6966_v21 = vpop.f32.mrf.mxu0  ;;  %v3703_v51 = vpop.f32.mrf.mxu1 }
0x1653   :  { %v3704_v29 = vadd.f32 %v3703_v51, %v3527_v36  ;;  %6971 = vmatprep.mubr.f32.mxu0 %v3702_v14 }
0x1654   :  { %v3705_v38 = vpop.f32.mrf.mxu1 }
0x1655   :  { %6985 = vmatprep.mubr.f32.mxu1 %v3704_v29  ;;  %v3706_v47 = vadd.f32 %v3705_v38, %v3523_v63 }
0x1656   :  { %v3707_v53 = vpop.f32.mrf.mxu1 }
0x1657   :  { %v3708_v52 = vadd.f32 %v3707_v53, %v3527_v36 }
0x165c   :  { %v3744_v16 = vpop.f32.mrf.mxu0 }
0x165d   :  { %v3745_v33 = vadd.f32 %v3744_v16, %v3531_v8 }
0x165e   :  { %v3746_v46 = vpop.f32.mrf.mxu0 }
0x165f   :  { %v3747_v55 = vadd.f32 %v3746_v46, %v3535_v13 }
0x1660   :  { %v3748_v48 = vpop.f32.mrf.mxu0  ;;  %v3787_v59 = vpop.f32.mrf.mxu1 }
0x1661   :  { %v3749_v54 = vadd.f32 %v3748_v48, %v3531_v8  ;;  %v3788_v15 = vadd.f32 %v3787_v59, %v3539_v62 }
0x1662   :  { %v3750_v17 = vpop.f32.mrf.mxu0  ;;  %v3789_v44 = vpop.f32.mrf.mxu1 }
0x1663   :  { %v3751_v1 = vadd.f32 %v3750_v17, %v3535_v13  ;;  %v8764_v60 = vadd.f32 %v3789_v44, %v3543_v11  ;;  %6967 = vmatprep.subr.mxu0 %v3749_v54  ;;  %v7342_v44 = vld [vmem:[%s9417_s15 + $0x38] sm:$0xff]  }
0x1664   :  { %v3791_v12 = vpop.f32.mrf.mxu1  ;;  %6968 = vmatpush3.xpose.msra.mxu0 %v3749_v54 }
0x1665   :  { %6969 = vmatprep.subr.mxu0 %v3745_v33  ;;  %6981 = vmatprep.subr.mxu1 %v3751_v1  ;;  %v3792_v7 = vadd.f32 %v3791_v12, %v3539_v62  ;;  %v7348_v12 = vld [vmem:[%s9417_s15 + $0x20] sm:$0xff]   ;;  %v7352_v62 = vld [vmem:[%s9417_s15 + $0x10] sm:$0xff]  }
0x1666   :  { %6982 = vmatpush3.xpose.msra.mxu1 %v3751_v1  ;;  %v3793_v10 = vpop.f32.mrf.mxu1  ;;  %v7346_v1 = vld [vmem:[%s9417_s15 + $0x28] sm:$0xff]  }
0x1667   :  { %6983 = vmatprep.subr.mxu1 %v3747_v55  ;;  %v8768_v50 = vadd.f32 %v3793_v10, %v3543_v11 }
0x1668   :  { %6970 = vmatpush3.xpose.msra.mxu0 %v3745_v33  ;;  %v7344_v33 = vld [vmem:[%s9417_s15 + $0x30] sm:$0xff]  }
0x1669   :  { %6974 = vmatprep.subr.mxu0 %v3792_v7 }
0x166a   :  { %6984 = vmatpush3.xpose.msra.mxu1 %v3747_v55  ;;  %v7350_v55 = vld [vmem:[%s9417_s15 + $0x18] sm:$0xff]  }
0x166b   :  { %6972 = vmatmul.mubr.f32.vlgmr.msra.gmra.mxu0 %v3706_v47  ;;  %7015 = vmatprep.subr.bf16.mxu1 %v7652_v23 }
0x166c   :  { %6975 = vmatpush3.msra.mxu0 %v3792_v7  ;;  %v7354_v7 = vld [vmem:[%s9417_s15 + $0x8] sm:$0xff]  }
0x166d   :  { %6976 = vmatprep.subr.mxu0 %v3788_v15  ;;  %6986 = vmatmul.mubr.f32.vlgmr.msra.gmra.mxu1 %v3708_v52 }
0x166e   :  { %6977 = vmatpush3.msra.mxu0 %v3788_v15  ;;  %7031 = vmatprep.mubr.msk.bf16.mxu1 %vm7653_vm7, %v7652_v23 }
0x166f   :  { %6988 = vmatprep.subr.mxu0 %v8768_v50  ;;  %7016 = vmatpush3.bf16.msra.mxu1 %v7342_v44 }
0x1670   :  { %7017 = vmatprep.subr.bf16.mxu1 %v7652_v23 }
0x1673   :  { %7018 = vmatpush3.bf16.msra.mxu1 %v7344_v33 }
0x1674   :  { %7019 = vmatprep.subr.bf16.mxu1 %v7652_v23 }
0x1677   :  { %7020 = vmatpush3.bf16.msra.mxu1 %v7346_v1 }
0x1678   :  { %7021 = vmatprep.subr.bf16.mxu1 %v7652_v23 }
0x167b   :  { %7022 = vmatpush3.bf16.msra.mxu1 %v7348_v12 }
0x167c   :  { %7023 = vmatprep.subr.bf16.mxu1 %v7652_v23 }
0x167f   :  { %7024 = vmatpush3.bf16.msra.mxu1 %v7350_v55 }
0x1680   :  { %7025 = vmatprep.subr.bf16.mxu1 %v7652_v23 }
0x1683   :  { %7026 = vmatpush3.bf16.msra.mxu1 %v7352_v62 }
0x1684   :  { %7027 = vmatprep.subr.bf16.mxu1 %v7652_v23 }
0x1687   :  { %7028 = vmatpush3.bf16.msra.mxu1 %v7354_v7 }
0x1688   :  { %7029 = vmatprep.subr.bf16.mxu1 %v7652_v23 }
0x172b   :  { %v6973_v22 = vpop.f32.mrf.mxu0 }
0x172c   :  { %v3868_v34 = vadd.f32 %v6973_v22, %v8782_v26 }
0x172d   :  { %v3862_v42 = vpop.f32.mrf.mxu0  ;;  %v6987_v63 = vpop.f32.mrf.mxu1 }
0x172e   :  { %v3863_v57 = vadd.f32 %v3862_v42, %v8785_v30  ;;  %v4047_v37 = vadd.f32 %v6987_v63, %v8782_v26  ;;  %v3874_v39 = vsel %vm893_vm6, %v3868_v34, -inf }
0x172f   :  { %v4041_v36 = vpop.f32.mrf.mxu1  ;;  %3875 = vmax.xlane.f32.xlu1 %v3874_v39 }
0x1730   :  { %v4042_v41 = vadd.f32 %v4041_v36, %v8785_v30  ;;  %v3871_v32 = vsel %vm893_vm6, %v3863_v57, -inf  ;;  %v4053_v40 = vsel %vm893_vm6, %v4047_v37, -inf  ;;  %v7349_v36 = vld [vmem:[%s9417_s15 + $0x60] sm:$0xff]  }
0x1731   :  { %3872 = vmax.xlane.f32.xlu0 %v3871_v32  ;;  %v7353_v32 = vld [vmem:[%s9417_s15 + $0x50] sm:$0xff]  }
0x1732   :  { %v4050_v28 = vsel %vm893_vm6, %v4042_v41, -inf }
0x1733   :  { %4054 = vmax.xlane.f32.xlu1 %v4053_v40  ;;  %v7355_v40 = vld [vmem:[%s9417_s15 + $0x48] sm:$0xff]  }
0x1735   :  { %4051 = vmax.xlane.f32.xlu0 %v4050_v28  ;;  %v7356_v28 = vld [vmem:[%s9417_s15] sm:$0xff]  }
0x1736   :  { %7030 = vmatpush3.bf16.msra.mxu1 %v7356_v28 }
0x17b8   :  { %v3876_v14 = vpop.xlane.xlu1 %3875 }
0x17b9   :  { %v3878_v21 = vsub.f32 %v3868_v34, %v3876_v14  ;;  %v7357_v14 = vld [vmem:[%s9417_s15 + $0x40] sm:$0xff]  }
0x17ba   :  { %v3873_v51 = vpop.xlane.xlu0 %3872 }
0x17bb   :  { %v3881_v29 = vmul.f32 1.442695, %v3878_v21  ;;  %v3877_v38 = vsub.f32 %v3863_v57, %v3873_v51 }
0x17bc   :  { %v4055_v5 = vpop.xlane.xlu1 %4054 }
0x17bd   :  { %7560 = vpow2.f32 %v3881_v29  ;;  %v3879_v61 = vmul.f32 1.442695, %v3877_v38  ;;  %v4057_v27 = vsub.f32 %v4047_v37, %v4055_v5  ;;  %v7343_v37 = vld [vmem:[%s9417_s15 + $0x78] sm:$0xff]  }
0x17be   :  { %v4052_v16 = vpop.xlane.xlu0 %4051 }
0x17bf   :  { %7562 = vpow2.f32 %v3879_v61  ;;  %v4060_v6 = vmul.f32 1.442695, %v4057_v27  ;;  %v4056_v53 = vsub.f32 %v4042_v41, %v4052_v16  ;;  %v7351_v41 = vld [vmem:[%s9417_s15 + $0x58] sm:$0xff]  }
0x17c1   :  { %7564 = vpow2.f32 %v4060_v6  ;;  %v4058_v46 = vmul.f32 1.442695, %v4056_v53  ;;  %v4335_v6 = vrot.slane %v8678_v31, %v7879_v20 }
0x17c3   :  { %7566 = vpow2.f32 %v4058_v46 }
0x17ca   :  { %v7561_v8 = vpop.eup %7560 }
0x17cb   :  { %v3886_v11 = vsel %vm893_vm6, %v7561_v8, 0.0 }
0x17cc   :  { %v7563_v48 = vpop.eup %7562  ;;  %3887 = vadd.xlane.f32.xlu1 %v3886_v11 }
0x17cd   :  { %v3883_v59 = vsel %vm893_vm6, %v7563_v48, 0.0 }
0x17ce   :  { %v7565_v13 = vpop.eup %7564  ;;  %3884 = vadd.xlane.f32.xlu0 %v3883_v59 }
0x17cf   :  { %v4065_v54 = vsel %vm893_vm6, %v7565_v13, 0.0 }
0x17d0   :  { %v7567_v35 = vpop.eup %7566  ;;  %4066 = vadd.xlane.f32.xlu1 %v4065_v54 }
0x17d1   :  { %v4062_v17 = vsel %vm893_vm6, %v7567_v35, 0.0 }
0x17d2   :  { %4063 = vadd.xlane.f32.xlu0 %v4062_v17 }
0x1855   :  { %v3888_v47 = vpop.xlane.xlu1 %3887 }
0x1856   :  { %7568 = vrcp.f32 %v3888_v47 }
0x1857   :  { %v3885_v10 = vpop.xlane.xlu0 %3884 }
0x1858   :  { %7570 = vrcp.f32 %v3885_v10 }
0x1859   :  { %v4067_v52 = vpop.xlane.xlu1 %4066 }
0x185a   :  { %7572 = vrcp.f32 %v4067_v52 }
0x185b   :  { %v4064_v15 = vpop.xlane.xlu0 %4063 }
0x185c   :  { %7574 = vrcp.f32 %v4064_v15 }
0x1863   :  { %v7569_v18 = vpop.eup %7568 }
0x1864   :  { %v3892_v34 = vmul.f32 %v7569_v18, %v7561_v8 }
0x1865   :  { %v7571_v19 = vpop.eup %7570 }
0x1866   :  { %v3891_v22 = vmul.f32 %v7571_v19, %v7563_v48  ;;  %v7360_v19 = vld [vmem:[%s9418_s16 + $0x34] ss:$8 sps:$4 sm:$0xff]  }
0x1867   :  { %v7573_v42 = vpop.eup %7572 }
0x1868   :  { %6978 = vmatprep.mubr.msk.f32.mxu0 %vm893_vm6, %v3891_v22  ;;  %v4071_v39 = vmul.f32 %v7573_v42, %v7565_v13  ;;  %v7358_v22 = vld [vmem:[%s9418_s16 + $0x30] ss:$8 sps:$4 sm:$0xff]   ;;  %v7361_v42 = vld [vmem:[%s9418_s16 + $0x20] ss:$8 sps:$4 sm:$0xff]  }
0x1869   :  { %v7575_v63 = vpop.eup %7574  ;;  %6979 = vmatmul.mubr.msk.f32.vlgmr.msra.gmra.mxu0 %vm893_vm6, %v3892_v34  ;;  %v7363_v34 = vld [vmem:[%s9418_s16 + $0x24] ss:$8 sps:$4 sm:$0xff]  }
0x186a   :  { %6989 = vmatpush3.msra.mxu0 %v8768_v50  ;;  %v4070_v57 = vmul.f32 %v7575_v63, %v7567_v35  ;;  %v7345_v50 = vld [vmem:[%s9417_s15 + $0x70] sm:$0xff]  }
0x186b   :  { %6990 = vmatprep.subr.mxu0 %v8764_v60  ;;  %v7366_v63 = vld [vmem:[%s9418_s16 + $0x14] ss:$8 sps:$4 sm:$0xff]  }
0x186c   :  { %6991 = vmatpush3.msra.mxu0 %v8764_v60  ;;  %6992 = vmatprep.mubr.msk.f32.mxu0 %vm893_vm6, %v4070_v57  ;;  %v7347_v60 = vld [vmem:[%s9417_s15 + $0x68] sm:$0xff]   ;;  %v7364_v57 = vld [vmem:[%s9418_s16 + $0x10] ss:$8 sps:$4 sm:$0xff]  }
0x186d   :  { %6993 = vmatmul.mubr.msk.f32.vlgmr.msra.gmra.mxu0 %vm893_vm6, %v4071_v39  ;;  %6995 = vmatprep.subr.bf16.mxu0 %v7652_v23  ;;  %v7367_v39 = vld [vmem:[%s9418_s16] ss:$8 sps:$4 sm:$0xff]  }
0x186e   :  { %6996 = vmatpush3.bf16.msra.mxu0 %v7343_v37  ;;  %7011 = vmatprep.mubr.msk.bf16.mxu0 %vm7653_vm7, %v7652_v23  ;;  %v7369_v37 = vld [vmem:[%s9418_s16 + $0x4] ss:$8 sps:$4 sm:$0xff]  }
0x186f   :  { %6997 = vmatprep.subr.bf16.mxu0 %v7652_v23 }
0x1872   :  { %6998 = vmatpush3.bf16.msra.mxu0 %v7345_v50 }
0x1873   :  { %6999 = vmatprep.subr.bf16.mxu0 %v7652_v23 }
0x1876   :  { %7000 = vmatpush3.bf16.msra.mxu0 %v7347_v60 }
0x1877   :  { %7001 = vmatprep.subr.bf16.mxu0 %v7652_v23 }
0x187a   :  { %7002 = vmatpush3.bf16.msra.mxu0 %v7349_v36 }
0x187b   :  { %7003 = vmatprep.subr.bf16.mxu0 %v7652_v23 }
0x187e   :  { %7004 = vmatpush3.bf16.msra.mxu0 %v7351_v41 }
0x187f   :  { %7005 = vmatprep.subr.bf16.mxu0 %v7652_v23 }
0x1882   :  { %7006 = vmatpush3.bf16.msra.mxu0 %v7353_v32 }
0x1883   :  { %7007 = vmatprep.subr.bf16.mxu0 %v7652_v23 }
0x1886   :  { %7008 = vmatpush3.bf16.msra.mxu0 %v7355_v40 }
0x1887   :  { %7009 = vmatprep.subr.bf16.mxu0 %v7652_v23 }
0x188a   :  { %7010 = vmatpush3.bf16.msra.mxu0 %v7357_v14 }
0x188b   :  { %4448 = vmatprep.subr.bf16.mxu0 %v7360_v19 }
0x1929   :  { %v6980_v21 = vpop.f32.mrf.mxu0 }
0x192b   :  { %v3965_v51 = vpop.f32.mrf.mxu0 }
0x192c   :  { %v3974_v29 = vpack.c.bf16 %v6980_v21, %v3965_v51  ;;  %v4369_v21 = vrot.slane %v8678_v31, %v7884_v24 }
0x192d   :  { %v6994_v38 = vpop.f32.mrf.mxu0 }
0x192e   :  { %7032 = vmatmul.mubr.bf16.vlgmr.msra.gmra.mxu1 %v3974_v29 }
0x192f   :  { %v4144_v5 = vpop.f32.mrf.mxu0 }
0x1930   :  { %v4153_v61 = vpack.c.bf16 %v6994_v38, %v4144_v5  ;;  %v4375_v5 = vrot.slane %v8678_v31, %v7949_v2  ;;  %v7372_v31 = vld [vmem:[%s9419_s17 + $0x70] sm:$0xff]  }
0x1932   :  { %7012 = vmatmul.mubr.bf16.vlgmr.msra.gmra.mxu0 %v4153_v61 }
0x1933   :  { %4472 = vmatprep.mubr.bf16.mxu0 %v7650_v0  ;;  %4449 = vmatpush1.bf16.msra.mxu0 %v7358_v22 }
0x1934   :  { %4450 = vmatprep.subr.bf16.mxu0 %v7363_v34 }
0x1937   :  { %4451 = vmatpush1.bf16.msra.mxu0 %v7361_v42 }
0x1938   :  { %4452 = vmatprep.subr.bf16.mxu0 %v7366_v63 }
0x193b   :  { %4453 = vmatpush1.bf16.msra.mxu0 %v7364_v57 }
0x193c   :  { %4454 = vmatprep.subr.bf16.mxu0 %v7369_v37 }
0x193f   :  { %4455 = vmatpush1.bf16.msra.mxu0 %v7367_v39 }
0x19ee   :  { %v4325_v27 = vpop.f32.mrf.mxu1 }
0x19f0   :  { %v7033_v16 = vpop.f32.mrf.mxu1 }
0x19f2   :  { %v4236_v53 = vpop.f32.mrf.mxu0  ;;  %v4328_v46 = vpop.f32.mrf.mxu1 }
0x19f3   :  { %v4326_v8 = vadd.f32 %v4325_v27, %v4236_v53  ;;  %v7370_v53 = vld [vmem:[%s9419_s17 + $0x78] sm:$0xff]  }
0x19f4   :  { %v7013_v11 = vpop.f32.mrf.mxu0  ;;  %v7034_v48 = vpop.f32.mrf.mxu1  ;;  %6726 = vmatprep.subr.bf16.mxu1 %v7370_v53 }
0x19f5   :  { %v4336_v59 = vadd.f32 %v4335_v6, %v4326_v8  ;;  %v7373_v8 = vld [vmem:[%s9419_s17 + $0x30] sm:$0xff]   ;;  %v7374_v11 = vld [vmem:[%s9419_s17 + $0x68] sm:$0xff]  }
0x19f6   :  { %v4239_v13 = vpop.f32.mrf.mxu0  ;;  %v7375_v48 = vld [vmem:[%s9419_s17 + $0x28] sm:$0xff]  }
0x19f7   :  { %v8875_v54 = vadd.f32 %v4336_v59, %v8593_v25  ;;  %v4329_v35 = vadd.f32 %v4328_v46, %v4239_v13  ;;  %v7371_v46 = vld [vmem:[%s9419_s17 + $0x38] sm:$0xff]   ;;  %v7376_v59 = vld [vmem:[%s9419_s17 + $0x60] sm:$0xff]  }
0x19f8   :  { %v7014_v17 = vpop.f32.mrf.mxu0  ;;  %6727 = vmatpush3.bf16.msra.mxu1 %v7371_v46  ;;  %v7377_v13 = vld [vmem:[%s9419_s17 + $0x20] sm:$0xff]  }
0x19f9   :  { %v4337_v44 = vadd.f32 %v4335_v6, %v4329_v35  ;;  %v4340_v33 = vsel %vm172_vm0, %v8875_v54, 0.0  ;;  %6728 = vmatprep.subr.bf16.mxu1 %v7372_v31  ;;  %v7378_v35 = vld [vmem:[%s9419_s17 + $0x58] sm:$0xff]  }
0x19fa   :  { %4341 = vadd.xlane.f32.xlu0 %v4340_v33  ;;  %v7379_v17 = vld [vmem:[%s9419_s17 + $0x18] sm:$0xff]   ;;  %v7381_v33 = vld [vmem:[%s9419_s17 + $0x10] sm:$0xff]  }
0x19fb   :  { %v8880_v1 = vadd.f32 %v4337_v44, %v8615_v49  ;;  %v7380_v44 = vld [vmem:[%s9419_s17 + $0x50] sm:$0xff]  }
0x19fc   :  { %6729 = vmatpush3.bf16.msra.mxu1 %v7373_v8 }
0x19fd   :  { %v4343_v12 = vsel %vm172_vm0, %v8880_v1, 0.0  ;;  %6730 = vmatprep.subr.bf16.mxu1 %v7374_v11 }
0x19fe   :  { %4344 = vadd.xlane.f32.xlu1 %v4343_v12  ;;  %v7382_v12 = vld [vmem:[%s9419_s17 + $0x48] sm:$0xff]  }
0x1a00   :  { %6731 = vmatpush3.bf16.msra.mxu1 %v7375_v48 }
0x1a01   :  { %6732 = vmatprep.subr.bf16.mxu1 %v7376_v59 }
0x1a04   :  { %6733 = vmatpush3.bf16.msra.mxu1 %v7377_v13 }
0x1a05   :  { %6734 = vmatprep.subr.bf16.mxu1 %v7378_v35 }
0x1a08   :  { %6735 = vmatpush3.bf16.msra.mxu1 %v7379_v17 }
0x1a09   :  { %6736 = vmatprep.subr.bf16.mxu1 %v7380_v44 }
0x1a0c   :  { %6737 = vmatpush3.bf16.msra.mxu1 %v7381_v33 }
0x1a0d   :  { %6738 = vmatprep.subr.bf16.mxu1 %v7382_v12 }
0x1a83   :  { %v4342_v55 = vpop.xlane.xlu0 %4341 }
0x1a84   :  { %v4346_v62 = vmul.f32 0.015625, %v4342_v55  ;;  %v7383_v55 = vld [vmem:[%s9419_s17 + $0x8] sm:$0xff]  }
0x1a85   :  { %6739 = vmatpush3.bf16.msra.mxu1 %v7383_v55 }
0x1a86   :  { %v4348_v7 = vsub.f32 %v8875_v54, %v4346_v62  ;;  %v7384_v62 = vld [vmem:[%s9419_s17 + $0x40] sm:$0xff]  }
0x1a87   :  { %v4345_v25 = vpop.xlane.xlu1 %4344  ;;  %6740 = vmatprep.subr.bf16.mxu1 %v7384_v62 }
0x1a88   :  { %v4347_v47 = vmul.f32 0.015625, %v4345_v25  ;;  %v4350_v10 = vmul.f32 %v4348_v7, %v4348_v7  ;;  %v4382_v25 = vrot.slane %v8742_v4, %v7833_v45 }
0x1a8a   :  { %v4349_v52 = vsub.f32 %v8880_v1, %v4347_v47  ;;  %v4352_v15 = vsel %vm172_vm0, %v4350_v10, 0.0  ;;  %v4386_v47 = vrot.slane %v8742_v4, %v8196_v56  ;;  %v4392_v10 = vrot.slane %v4382_v25, %v7833_v45 }
0x1a8b   :  { %4353 = vadd.xlane.f32.xlu0 %v4352_v15 }
0x1a8c   :  { %v4351_v18 = vmul.f32 %v4349_v52, %v4349_v52 }
0x1a8e   :  { %v4355_v49 = vsel %vm172_vm0, %v4351_v18, 0.0 }
0x1a8f   :  { %4356 = vadd.xlane.f32.xlu1 %v4355_v49 }
0x1b14   :  { %v4354_v50 = vpop.xlane.xlu0 %4353 }
0x1b15   :  { %v4358_v60 = vmul.f32 0.015625, %v4354_v50 }
0x1b17   :  { %v4360_v36 = vadd.f32 1e-05, %v4358_v60 }
0x1b18   :  { %v4357_v41 = vpop.xlane.xlu1 %4356 }
0x1b19   :  { %7576 = vrsqrt.f32 %v4360_v36  ;;  %v4359_v32 = vmul.f32 0.015625, %v4357_v41 }
0x1b1b   :  { %v4361_v40 = vadd.f32 1e-05, %v4359_v32 }
0x1b1d   :  { %7578 = vrsqrt.f32 %v4361_v40 }
0x1b26   :  { %v7577_v28 = vpop.eup %7576 }
0x1b27   :  { %v4364_v14 = vmul.f32 %v7577_v28, %v4348_v7  ;;  %v7385_v7 = vld [vmem:[%s9419_s17] sm:$0xff]  }
0x1b28   :  { %6741 = vmatpush3.bf16.msra.mxu1 %v7385_v7 }
0x1b29   :  { %v4370_v38 = vmul.f32 %v4369_v21, %v4364_v14 }
0x1b2a   :  { %v7579_v51 = vpop.eup %7578 }
0x1b2b   :  { %v4365_v29 = vmul.f32 %v7579_v51, %v4349_v52  ;;  %v4376_v27 = vadd.f32 %v4375_v5, %v4370_v38  ;;  %v4396_v52 = vrot.slane %v4386_v47, %v7833_v45 }
0x1b2d   :  { %v4371_v61 = vmul.f32 %v4369_v21, %v4365_v29 }
0x1b2f   :  { %v4377_v16 = vadd.f32 %v4375_v5, %v4371_v61 }
0x1b31   :  { %v4378_v6 = vpack.c.bf16 %v4377_v16, %v4376_v27 }
0x1b33   :  { %6461 = vmatmul.mubr.msk.bf16.vlgmr.msra.gmra.mxu0 %vm172_vm0, %v4378_v6 }
0x1b34   :  { %4988 = vmatprep.mubr.bf16.mxu0 %v7650_v0 }
0x1bf3   :  { %v4474_v15 = vpop.f32.mrf.mxu0 }
0x1bf4   :  { %v8972_v18 = vadd.f32 %v4474_v15, %v4392_v10 }
0x1bf5   :  { %v4476_v49 = vpop.f32.mrf.mxu0 }
0x1bf6   :  { %v8975_v19 = vmul.f32 0.70710677, %v8972_v18  ;;  %v8977_v22 = vadd.f32 %v4476_v49, %v4396_v52 }
0x1bf7   :  { %v4478_v34 = vpop.f32.mrf.mxu0 }
0x1bf8   :  { %v4491_v42 = vand.u32 2147483647, %v8975_v19  ;;  %v8981_v63 = vmul.f32 0.70710677, %v8977_v22  ;;  %v8983_v4 = vadd.f32 %v4478_v34, %v4392_v10  ;;  %vm4571_vm3 = vcmp.ge.f32.partialorder %v8975_v19, 0.0 }
0x1bf9   :  { %v4480_v57 = vpop.f32.mrf.mxu0 }
0x1bfa   :  { %v4495_v37 = vmul.f32 0.3275911, %v4491_v42  ;;  %v4492_v39 = vand.u32 2147483647, %v8981_v63  ;;  %v8987_v50 = vmul.f32 0.70710677, %v8983_v4  ;;  %v8989_v60 = vadd.f32 %v4480_v57, %v4396_v52 }
0x1bfb   :  { %v4547_v5 = vsub.f32 0.0, %v4491_v42  ;;  %vm4572_vm1 = vcmp.ge.f32.partialorder %v8981_v63, 0.0  ;;  %v4484_v63 = vmul.f32 0.5, %v8977_v22  ;;  %v7648_v22 = vld [vmem:[%s9415_s12] sm:$0xff] }
0x1bfc   :  { %v4499_v36 = vadd.f32 1.0, %v4495_v37  ;;  %v4496_v41 = vmul.f32 0.3275911, %v4492_v39  ;;  %v4493_v32 = vand.u32 2147483647, %v8987_v50  ;;  %v4548_v61 = vsub.f32 0.0, %v4492_v39 }
0x1bfd   :  { %v8993_v40 = vmul.f32 0.70710677, %v8989_v60  ;;  %v4551_v27 = vmul.f32 %v4547_v5, %v4491_v42  ;;  %vm4573_vm11 = vcmp.ge.f32.partialorder %v8987_v50, 0.0 }
0x1bfe   :  { %7580 = vrcp.f32 %v4499_v36  ;;  %v4500_v28 = vadd.f32 1.0, %v4496_v41  ;;  %v4497_v14 = vmul.f32 0.3275911, %v4493_v32  ;;  %v4549_v16 = vsub.f32 0.0, %v4493_v32 }
0x1bff   :  { %v4494_v21 = vand.u32 2147483647, %v8993_v40  ;;  %v4552_v53 = vmul.f32 %v4548_v61, %v4492_v39  ;;  %v4555_v31 = vmul.f32 1.442695, %v4551_v27  ;;  %vm4574_vm12 = vcmp.ge.f32.partialorder %v8993_v40, 0.0 }
0x1c00   :  { %7582 = vrcp.f32 %v4500_v28  ;;  %v4501_v51 = vadd.f32 1.0, %v4497_v14  ;;  %v4553_v11 = vmul.f32 %v4549_v16, %v4493_v32 }
0x1c01   :  { %v4498_v29 = vmul.f32 0.3275911, %v4494_v21  ;;  %v4550_v8 = vsub.f32 0.0, %v4494_v21  ;;  %v4557_v35 = vmul.f32 1.442695, %v4552_v53 }
0x1c02   :  { %7584 = vrcp.f32 %v4501_v51  ;;  %v4559_v62 = vmul.f32 1.442695, %v4553_v11 }
0x1c03   :  { %v4502_v38 = vadd.f32 1.0, %v4498_v29  ;;  %v4554_v33 = vmul.f32 %v4550_v8, %v4494_v21 }
0x1c05   :  { %7586 = vrcp.f32 %v4502_v38  ;;  %v4561_v49 = vmul.f32 1.442695, %v4554_v33 }
0x1c06   :  { %7588 = vpow2.f32 %v4555_v31 }
0x1c07   :  { %7590 = vpow2.f32 %v4557_v35 }
0x1c08   :  { %7592 = vpow2.f32 %v4559_v62 }
0x1c09   :  { %7594 = vpow2.f32 %v4561_v49 }
0x1c0b   :  { %v7581_v6 = vpop.eup %7580 }
0x1c0c   :  { %v4511_v46 = vmul.f32 1.0614054, %v7581_v6 }
0x1c0d   :  { %v7583_v48 = vpop.eup %7582 }
0x1c0e   :  { %v6462_v59 = vadd.f32 -1.4531521, %v4511_v46  ;;  %v4512_v13 = vmul.f32 1.0614054, %v7583_v48 }
0x1c0f   :  { %v7585_v17 = vpop.eup %7584 }
0x1c10   :  { %v4519_v44 = vmul.f32 %v7581_v6, %v6462_v59  ;;  %v6463_v12 = vadd.f32 -1.4531521, %v4512_v13  ;;  %v4513_v55 = vmul.f32 1.0614054, %v7585_v17 }
0x1c12   :  { %v4523_v7 = vadd.f32 1.4214138, %v4519_v44  ;;  %v7587_v25 = vpop.eup %7586  ;;  %v4520_v47 = vmul.f32 %v7583_v48, %v6463_v12  ;;  %v6464_v10 = vadd.f32 -1.4531521, %v4513_v55 }
0x1c13   :  { %v4514_v15 = vmul.f32 1.0614054, %v7587_v25  ;;  %v7589_v27 = vpop.eup %7588 }
0x1c14   :  { %v4527_v52 = vmul.f32 %v7581_v6, %v4523_v7  ;;  %v4524_v34 = vadd.f32 1.4214138, %v4520_v47  ;;  %v4521_v42 = vmul.f32 %v7585_v17, %v6464_v10  ;;  %v7591_v59 = vpop.eup %7590 }
0x1c15   :  { %v6465_v37 = vadd.f32 -1.4531521, %v4514_v15  ;;  %v7593_v12 = vpop.eup %7592 }
0x1c16   :  { %v6466_v57 = vadd.f32 -0.28449672, %v4527_v52  ;;  %v4528_v39 = vmul.f32 %v7583_v48, %v4524_v34  ;;  %v4525_v36 = vadd.f32 1.4214138, %v4521_v42  ;;  %v7595_v10 = vpop.eup %7594 }
0x1c17   :  { %v4522_v32 = vmul.f32 %v7587_v25, %v6465_v37 }
0x1c18   :  { %v4535_v41 = vmul.f32 %v7581_v6, %v6466_v57  ;;  %v6467_v28 = vadd.f32 -0.28449672, %v4528_v39  ;;  %v4529_v14 = vmul.f32 %v7585_v17, %v4525_v36 }
0x1c19   :  { %v4526_v51 = vadd.f32 1.4214138, %v4522_v32 }
0x1c1a   :  { %v4539_v21 = vadd.f32 0.2548296, %v4535_v41  ;;  %v4536_v29 = vmul.f32 %v7583_v48, %v6467_v28  ;;  %v6468_v38 = vadd.f32 -0.28449672, %v4529_v14  ;;  %v4485_v41 = vmul.f32 0.5, %v8983_v4 }
0x1c1b   :  { %v4530_v61 = vmul.f32 %v7587_v25, %v4526_v51  ;;  %v4486_v28 = vmul.f32 0.5, %v8989_v60  ;;  %v4483_v14 = vmul.f32 0.5, %v8972_v18  ;;  %v4735_v60 = vrot.slane %v7648_v22, %v8134_v9 }
0x1c1c   :  { %v4543_v5 = vmul.f32 %v7581_v6, %v4539_v21  ;;  %v4540_v16 = vadd.f32 0.2548296, %v4536_v29  ;;  %v4537_v53 = vmul.f32 %v7585_v17, %v6468_v38 }
0x1c1d   :  { %v6469_v31 = vadd.f32 -0.28449672, %v4530_v61 }
0x1c1e   :  { %v4563_v46 = vmul.f32 %v7589_v27, %v4543_v5  ;;  %v4544_v8 = vmul.f32 %v7583_v48, %v4540_v16  ;;  %v4541_v11 = vadd.f32 0.2548296, %v4537_v53 }
0x1c1f   :  { %v4538_v13 = vmul.f32 %v7587_v25, %v6469_v31 }
0x1c20   :  { %v4567_v35 = vsub.f32 1.0, %v4563_v46  ;;  %v4564_v44 = vmul.f32 %v7591_v59, %v4544_v8  ;;  %v4545_v33 = vmul.f32 %v7585_v17, %v4541_v11 }
0x1c21   :  { %v4542_v55 = vadd.f32 0.2548296, %v4538_v13 }
0x1c22   :  { %v4568_v62 = vsub.f32 1.0, %v4564_v44  ;;  %v4565_v7 = vmul.f32 %v7593_v12, %v4545_v33  ;;  %v4575_v6 = vsub.f32 0.0, %v4567_v35 }
0x1c23   :  { %v4546_v47 = vmul.f32 %v7587_v25, %v4542_v55 }
0x1c24   :  { %v4576_v52 = vsub.f32 0.0, %v4568_v62  ;;  %v4569_v15 = vsub.f32 1.0, %v4565_v7  ;;  %v4579_v17 = vsel %vm4571_vm3, %v4567_v35, %v4575_v6  ;;  %v7388_v7 = vld [vmem:[%s9414_s14 + $0x154] ss:$24 sps:$4 sm:$0xff]   ;;  %v7389_v6 = vld [vmem:[%s9414_s14 + $0x160] ss:$24 sps:$4 sm:$0xff]  }
0x1c25   :  { %v4566_v49 = vmul.f32 %v7595_v10, %v4546_v47  ;;  %v4583_v25 = vadd.f32 1.0, %v4579_v17  ;;  %v7386_v47 = vld [vmem:[%s9414_s14 + $0x150] ss:$24 sps:$4 sm:$0xff]   ;;  %v7391_v10 = vld [vmem:[%s9414_s14 + $0x164] ss:$24 sps:$4 sm:$0xff]   ;;  %4964 = vmatprep.subr.bf16.mxu0 %v7388_v7 }
0x1c26   :  { %v4577_v34 = vsub.f32 0.0, %v4569_v15  ;;  %v4580_v48 = vsel %vm4572_vm1, %v4568_v62, %v4576_v52  ;;  %4965 = vmatpush1.bf16.msra.mxu0 %v7386_v47  ;;  %5050 = vmatprep.subr.bf16.mxu1 %v7391_v10  ;;  %v7394_v52 = vld [vmem:[%s9414_s14 + $0x124] ss:$24 sps:$4 sm:$0xff]  }
0x1c27   :  { %v4570_v42 = vsub.f32 1.0, %v4566_v49  ;;  %v4584_v36 = vadd.f32 1.0, %v4580_v48  ;;  %v4587_v29 = vmul.f32 %v4583_v25, %v4483_v14  ;;  %v7397_v49 = vld [vmem:[%s9414_s14 + $0x134] ss:$24 sps:$4 sm:$0xff]   ;;  %4966 = vmatprep.subr.bf16.mxu0 %v7394_v52  ;;  %v7403_v17 = vld [vmem:[%s9414_s14 + $0x104] ss:$24 sps:$4 sm:$0xff]  }
0x1c28   :  { %v4581_v57 = vsel %vm4573_vm11, %v4569_v15, %v4577_v34  ;;  %v7392_v15 = vld [vmem:[%s9414_s14 + $0x120] ss:$24 sps:$4 sm:$0xff]   ;;  %v7395_v34 = vld [vmem:[%s9414_s14 + $0x130] ss:$24 sps:$4 sm:$0xff]   ;;  %v7400_v48 = vld [vmem:[%s9414_s14 + $0xf4] ss:$24 sps:$4 sm:$0xff]  }
0x1c29   :  { %v4585_v37 = vadd.f32 1.0, %v4581_v57  ;;  %v4578_v39 = vsub.f32 0.0, %v4570_v42  ;;  %v4588_v21 = vmul.f32 %v4584_v36, %v4484_v63  ;;  %v7401_v57 = vld [vmem:[%s9414_s14 + $0x100] ss:$24 sps:$4 sm:$0xff]   ;;  %v7407_v36 = vld [vmem:[%s9414_s14 + $0xd0] ss:$24 sps:$4 sm:$0xff]  }
0x1c2a   :  { %4967 = vmatpush1.bf16.msra.mxu0 %v7392_v15  ;;  %v7409_v25 = vld [vmem:[%s9414_s14 + $0xd4] ss:$24 sps:$4 sm:$0xff]  }
0x1c2b   :  { %v4582_v32 = vsel %vm4574_vm12, %v4570_v42, %v4578_v39  ;;  %v4589_v50 = vmul.f32 %v4585_v37, %v4485_v41  ;;  %v7398_v42 = vld [vmem:[%s9414_s14 + $0xf0] ss:$24 sps:$4 sm:$0xff]   ;;  %4968 = vmatprep.subr.bf16.mxu0 %v7400_v48  ;;  %v7404_v37 = vld [vmem:[%s9414_s14 + $0xc0] ss:$24 sps:$4 sm:$0xff]   ;;  %v7406_v39 = vld [vmem:[%s9414_s14 + $0xc4] ss:$24 sps:$4 sm:$0xff]  }
0x1c2c   :  { %v4586_v19 = vadd.f32 1.0, %v4582_v32  ;;  %v7412_v41 = vld [vmem:[%s9414_s14 + $0x15c] ss:$24 sps:$4 sm:$0xff]  }
0x1c2d   :  { %v4591_v5 = vpack.c.bf16 %v4589_v50, %v4587_v29 }
0x1c2e   :  { %v4590_v51 = vmul.f32 %v4586_v19, %v4486_v28  ;;  %4969 = vmatpush1.bf16.msra.mxu0 %v7398_v42 }
0x1c2f   :  { %4970 = vmatprep.subr.bf16.mxu0 %v7406_v39 }
0x1c30   :  { %v4592_v38 = vpack.c.bf16 %v4590_v51, %v4588_v21  ;;  %v9077_v21 = vld [vmem:[%s9415_s12 + $0x8] sm:$0x3f] }
0x1c32   :  { %4721 = vmatprep.mubr.bf16.mxu1 %v4592_v38  ;;  %4971 = vmatpush1.bf16.msra.mxu0 %v7404_v37  ;;  %v4767_v38 = vrot.slane %v9077_v21, %v7825_v43 }
0x1c33   :  { %4722 = vmatmul.mubr.bf16.vlgmr.msra.gmra.mxu1 %v4591_v5  ;;  %5007 = vmatprep.subr.bf16.mxu0 %v7412_v41 }
0x1c34   :  { %5074 = vmatprep.mubr.bf16.mxu1 %v7650_v0  ;;  %5051 = vmatpush1.bf16.msra.mxu1 %v7389_v6 }
0x1c35   :  { %5052 = vmatprep.subr.bf16.mxu1 %v7397_v49 }
0x1c38   :  { %5053 = vmatpush1.bf16.msra.mxu1 %v7395_v34 }
0x1c39   :  { %5054 = vmatprep.subr.bf16.mxu1 %v7403_v17 }
0x1c3c   :  { %5055 = vmatpush1.bf16.msra.mxu1 %v7401_v57 }
0x1c3d   :  { %5056 = vmatprep.subr.bf16.mxu1 %v7409_v25 }
0x1c40   :  { %5057 = vmatpush1.bf16.msra.mxu1 %v7407_v36 }
0x1cf3   :  { %v6742_v40 = vpop.f32.mrf.mxu1 }
0x1cf5   :  { %v6743_v4 = vpop.f32.mrf.mxu1 }
0x1cf6   :  { %v6744_v61 = vadd.f32 %v6743_v4, %v6742_v40 }
0x1cf7   :  { %v6745_v18 = vpop.f32.mrf.mxu1 }
0x1cf8   :  { %v4730_v27 = vadd.f32 %v6744_v61, %v8875_v54  ;;  %v4773_v61 = vrot.slane %v9077_v21, %v7833_v45 }
0x1cf9   :  { %v6746_v16 = vpop.f32.mrf.mxu1 }
0x1cfa   :  { %v9010_v53 = vadd.f32 %v4735_v60, %v4730_v27  ;;  %v6747_v46 = vadd.f32 %v6746_v16, %v6745_v18  ;;  %v7410_v27 = vld [vmem:[%s9414_s14 + $0x158] ss:$24 sps:$4 sm:$0xff]  }
0x1cfc   :  { %v4731_v31 = vadd.f32 %v6747_v46, %v8880_v1  ;;  %v4738_v8 = vsel %vm172_vm0, %v9010_v53, 0.0  ;;  %v7415_v46 = vld [vmem:[%s9414_s14 + $0x12c] ss:$24 sps:$4 sm:$0xff]  }
0x1cfd   :  { %4739 = vadd.xlane.f32.xlu0 %v4738_v8  ;;  %v7418_v8 = vld [vmem:[%s9414_s14 + $0xfc] ss:$24 sps:$4 sm:$0xff]  }
0x1cfe   :  { %v9015_v11 = vadd.f32 %v4735_v60, %v4731_v31  ;;  %v7413_v31 = vld [vmem:[%s9414_s14 + $0x128] ss:$24 sps:$4 sm:$0xff]  }
0x1d00   :  { %v4741_v59 = vsel %vm172_vm0, %v9015_v11, 0.0 }
0x1d01   :  { %4742 = vadd.xlane.f32.xlu1 %v4741_v59  ;;  %v7416_v59 = vld [vmem:[%s9414_s14 + $0xf8] ss:$24 sps:$4 sm:$0xff]  }
0x1d86   :  { %v4740_v9 = vpop.xlane.xlu0 %4739 }
0x1d87   :  { %v4744_v13 = vmul.f32 0.015625, %v4740_v9  ;;  %v7421_v9 = vld [vmem:[%s9414_s14 + $0xcc] ss:$24 sps:$4 sm:$0xff]  }
0x1d89   :  { %v4746_v54 = vsub.f32 %v9010_v53, %v4744_v13  ;;  %v7419_v13 = vld [vmem:[%s9414_s14 + $0xc8] ss:$24 sps:$4 sm:$0xff]  }
0x1d8a   :  { %v4743_v35 = vpop.xlane.xlu1 %4742 }
0x1d8b   :  { %v4745_v44 = vmul.f32 0.015625, %v4743_v35  ;;  %v4748_v33 = vmul.f32 %v4746_v54, %v4746_v54 }
0x1d8d   :  { %v4747_v12 = vsub.f32 %v9015_v11, %v4745_v44  ;;  %v4750_v1 = vsel %vm172_vm0, %v4748_v33, 0.0  ;;  %v3256_v44 = vld [vmem:[%s9416_s13 + $0x14] sm:$0xf] }
0x1d8e   :  { %4751 = vadd.xlane.f32.xlu0 %v4750_v1  ;;  %v4802_v33 = vrot.slane %v3256_v44, %v7952_v3  ;;  %v4798_v1 = vrot.slane %v3256_v44, %v7825_v43 }
0x1d8f   :  { %v4749_v55 = vmul.f32 %v4747_v12, %v4747_v12 }
0x1d90   :  { %v4828_v6 = vrot.slane %v4798_v1, %v7825_v43 }
0x1d91   :  { %v4753_v62 = vsel %vm172_vm0, %v4749_v55, 0.0  ;;  %v4832_v55 = vrot.slane %v4802_v33, %v7825_v43 }
0x1d92   :  { %4754 = vadd.xlane.f32.xlu1 %v4753_v62 }
0x1e17   :  { %v4752_v32 = vpop.xlane.xlu0 %4751 }
0x1e18   :  { %v4756_v63 = vmul.f32 0.015625, %v4752_v32 }
0x1e1a   :  { %v4758_v28 = vadd.f32 1e-05, %v4756_v63 }
0x1e1b   :  { %v4755_v19 = vpop.xlane.xlu1 %4754 }
0x1e1c   :  { %7596 = vrsqrt.f32 %v4758_v28  ;;  %v4757_v14 = vmul.f32 0.015625, %v4755_v19 }
0x1e1e   :  { %v4759_v50 = vadd.f32 1e-05, %v4757_v14 }
0x1e20   :  { %7598 = vrsqrt.f32 %v4759_v50 }
0x1e29   :  { %v7597_v51 = vpop.eup %7596 }
0x1e2a   :  { %v4762_v29 = vmul.f32 %v7597_v51, %v4746_v54  ;;  %v9111_v54 = vld [vmem:[%s9416_s13 + $0xc] sm:$0xff] }
0x1e2b   :  { %v4782_v35 = vrot.slane %v9111_v54, %v7825_v43  ;;  %v4790_v39 = vrot.slane %v9111_v54, %v7879_v20  ;;  %v4794_v63 = vrot.slane %v9111_v54, %v7949_v2  ;;  %v4786_v19 = vrot.slane %v9111_v54, %v7952_v3 }
0x1e2c   :  { %v4768_v4 = vmul.f32 %v4767_v38, %v4762_v29 }
0x1e2d   :  { %v7599_v5 = vpop.eup %7598  ;;  %v4820_v41 = vrot.slane %v4790_v39, %v7825_v43  ;;  %v4824_v51 = vrot.slane %v4794_v63, %v7825_v43  ;;  %v4816_v29 = vrot.slane %v4786_v19, %v7825_v43  ;;  %v7422_v39 = vld [vmem:[%s9417_s15 + $0xb8] sm:$0xff]   ;;  %v7431_v63 = vld [vmem:[%s9417_s15 + $0x90] sm:$0xff]  }
0x1e2e   :  { %v4763_v40 = vmul.f32 %v7599_v5, %v4747_v12  ;;  %v4774_v60 = vadd.f32 %v4773_v61, %v4768_v4  ;;  %v4812_v12 = vrot.slane %v4782_v35, %v7825_v43 }
0x1e30   :  { %v4769_v22 = vmul.f32 %v4767_v38, %v4763_v40 }
0x1e32   :  { %v4775_v18 = vadd.f32 %v4773_v61, %v4769_v22 }
0x1e34   :  { %v4776_v16 = vpack.c.bf16 %v4775_v18, %v4774_v60 }
0x1e36   :  { %6510 = vmatmul.mubr.msk.bf16.vlgmr.msra.gmra.mxu0 %vm172_vm0, %v4776_v16  ;;  %6512 = vmatmul.mubr.msk.bf16.vlgmr.msra.gmra.mxu1 %vm172_vm0, %v4776_v16 }
0x1e37   :  { %5008 = vmatpush1.bf16.msra.mxu0 %v7410_v27  ;;  %5031 = vmatprep.mubr.bf16.mxu0 %v7650_v0 }
0x1e38   :  { %5009 = vmatprep.subr.bf16.mxu0 %v7415_v46 }
0x1e3b   :  { %5010 = vmatpush1.bf16.msra.mxu0 %v7413_v31 }
0x1e3c   :  { %5011 = vmatprep.subr.bf16.mxu0 %v7418_v8 }
0x1e3f   :  { %5012 = vmatpush1.bf16.msra.mxu0 %v7416_v59 }
0x1e40   :  { %5013 = vmatprep.subr.bf16.mxu0 %v7421_v9 }
0x1e43   :  { %5014 = vmatpush1.bf16.msra.mxu0 %v7419_v13 }
0x1e46   :  { %6511 = vmatmul.mubr.msk.bf16.vlgmr.msra.gmra.mxu0 %vm172_vm0, %v4776_v16 }
0x1ef6   :  { %v4990_v62 = vpop.f32.mrf.mxu0  ;;  %v5076_v7 = vpop.f32.mrf.mxu1 }
0x1ef7   :  { %v4991_v47 = vadd.f32 %v4990_v62, %v4812_v12  ;;  %v5077_v42 = vadd.f32 %v5076_v7, %v4828_v6 }
0x1ef8   :  { %v5078_v10 = vpop.f32.mrf.mxu1  ;;  %v4992_v34 = vpop.f32.mrf.mxu0 }
0x1ef9   :  { %v9123_v52 = vadd.f32 %v5078_v10, %v4832_v55  ;;  %7039 = vmatprep.mubr.f32.mxu0 %v4991_v47  ;;  %v4993_v40 = vadd.f32 %v4992_v34, %v4816_v29 }
0x1efa   :  { %v5080_v15 = vpop.f32.mrf.mxu1  ;;  %v4994_v57 = vpop.f32.mrf.mxu0 }
0x1efb   :  { %v5081_v49 = vadd.f32 %v5080_v15, %v4828_v6  ;;  %v4995_v5 = vadd.f32 %v4994_v57, %v4812_v12 }
0x1efc   :  { %v5082_v48 = vpop.f32.mrf.mxu1  ;;  %v4996_v37 = vpop.f32.mrf.mxu0 }
0x1efd   :  { %7042 = vmatprep.subr.mxu1 %v5081_v49  ;;  %v9125_v17 = vadd.f32 %v5082_v48, %v4832_v55  ;;  %v4997_v2 = vadd.f32 %v4996_v37, %v4816_v29 }
0x1efe   :  { %7043 = vmatpush3.msra.mxu1 %v5081_v49 }
0x1eff   :  { %7044 = vmatprep.subr.mxu1 %v5077_v42 }
0x1f00   :  { %7045 = vmatpush3.msra.mxu1 %v5077_v42 }
0x1f01   :  { %7056 = vmatprep.subr.mxu1 %v9125_v17 }
0x1f06   :  { %v5033_v36 = vpop.f32.mrf.mxu0 }
0x1f07   :  { %v5034_v14 = vadd.f32 %v5033_v36, %v4820_v41  ;;  %v7423_v36 = vld [vmem:[%s9417_s15 + $0xb0] sm:$0xff]  }
0x1f08   :  { %v5035_v25 = vpop.f32.mrf.mxu0 }
0x1f09   :  { %v5036_v4 = vadd.f32 %v5035_v25, %v4824_v51  ;;  %v7425_v25 = vld [vmem:[%s9417_s15 + $0xa8] sm:$0xff]  }
0x1f0a   :  { %v5037_v32 = vpop.f32.mrf.mxu0 }
0x1f0b   :  { %v5038_v28 = vadd.f32 %v5037_v32, %v4820_v41  ;;  %v7427_v41 = vld [vmem:[%s9417_s15 + $0xa0] sm:$0xff]   ;;  %v7429_v32 = vld [vmem:[%s9417_s15 + $0x98] sm:$0xff]  }
0x1f0c   :  { %v5039_v50 = vpop.f32.mrf.mxu0 }
0x1f0d   :  { %7035 = vmatprep.subr.mxu0 %v5038_v28  ;;  %v5040_v38 = vadd.f32 %v5039_v50, %v4824_v51 }
0x1f0e   :  { %7036 = vmatpush3.xpose.msra.mxu0 %v5038_v28  ;;  %v7433_v28 = vld [vmem:[%s9417_s15 + $0x88] sm:$0xff]  }
0x1f0f   :  { %7037 = vmatprep.subr.mxu0 %v5034_v14 }
0x1f12   :  { %7038 = vmatpush3.xpose.msra.mxu0 %v5034_v14 }
0x1f13   :  { %7049 = vmatprep.subr.mxu0 %v5040_v38 }
0x1f15   :  { %7040 = vmatmul.mubr.f32.vlgmr.msra.gmra.mxu0 %v4995_v5 }
0x1f16   :  { %7050 = vmatpush3.xpose.msra.mxu0 %v5040_v38  ;;  %7053 = vmatprep.mubr.f32.mxu0 %v4993_v40 }
0x1f17   :  { %7051 = vmatprep.subr.mxu0 %v5036_v4 }
0x1f1a   :  { %7052 = vmatpush3.xpose.msra.mxu0 %v5036_v4 }
0x1f1b   :  { %7083 = vmatprep.subr.bf16.mxu0 %v7652_v23 }
0x1f1d   :  { %7054 = vmatmul.mubr.f32.vlgmr.msra.gmra.mxu0 %v4997_v2 }
0x1f1e   :  { %7099 = vmatprep.mubr.msk.bf16.mxu0 %vm7653_vm7, %v7652_v23  ;;  %7084 = vmatpush3.bf16.msra.mxu0 %v7422_v39 }
0x1f1f   :  { %7085 = vmatprep.subr.bf16.mxu0 %v7652_v23 }
0x1f22   :  { %7086 = vmatpush3.bf16.msra.mxu0 %v7423_v36 }
0x1f23   :  { %7087 = vmatprep.subr.bf16.mxu0 %v7652_v23 }
0x1f26   :  { %7088 = vmatpush3.bf16.msra.mxu0 %v7425_v25 }
0x1f27   :  { %7089 = vmatprep.subr.bf16.mxu0 %v7652_v23 }
0x1f2a   :  { %7090 = vmatpush3.bf16.msra.mxu0 %v7427_v41 }
0x1f2b   :  { %7091 = vmatprep.subr.bf16.mxu0 %v7652_v23 }
0x1f2e   :  { %7092 = vmatpush3.bf16.msra.mxu0 %v7429_v32 }
0x1f2f   :  { %7093 = vmatprep.subr.bf16.mxu0 %v7652_v23 }
0x1f32   :  { %7094 = vmatpush3.bf16.msra.mxu0 %v7431_v63 }
0x1f33   :  { %7095 = vmatprep.subr.bf16.mxu0 %v7652_v23 }
0x1f36   :  { %7096 = vmatpush3.bf16.msra.mxu0 %v7433_v28  ;;  %v7440_v28 = vld [vmem:[%s9418_s16 + $0x74] ss:$8 sps:$4 sm:$0xff]  }
0x1f37   :  { %7097 = vmatprep.subr.bf16.mxu0 %v7652_v23 }
0x1fd5   :  { %v7041_v61 = vpop.f32.mrf.mxu0 }
0x1fd6   :  { %v5157_v22 = vadd.f32 %v7041_v61, %v8782_v26 }
0x1fd7   :  { %v5151_v60 = vpop.f32.mrf.mxu0 }
0x1fd8   :  { %v5152_v18 = vadd.f32 %v5151_v60, %v8785_v30  ;;  %v5163_v27 = vsel %vm893_vm6, %v5157_v22, -inf }
0x1fd9   :  { %5164 = vmax.xlane.f32.xlu1 %v5163_v27  ;;  %v7432_v27 = vld [vmem:[%s9417_s15 + $0xd8] sm:$0xff]  }
0x1fda   :  { %v5160_v16 = vsel %vm893_vm6, %v5152_v18, -inf }
0x1fdb   :  { %5161 = vmax.xlane.f32.xlu0 %v5160_v16  ;;  %v7434_v16 = vld [vmem:[%s9417_s15 + $0xd0] sm:$0xff]  }
0x1fdd   :  { %v7055_v46 = vpop.f32.mrf.mxu0 }
0x1fde   :  { %v5336_v31 = vadd.f32 %v7055_v46, %v8782_v26  ;;  %v7435_v46 = vld [vmem:[%s9417_s15 + $0x80] sm:$0xff]  }
0x1fdf   :  { %v5330_v8 = vpop.f32.mrf.mxu0  ;;  %7098 = vmatpush3.bf16.msra.mxu0 %v7435_v46 }
0x1fe0   :  { %v5331_v59 = vadd.f32 %v5330_v8, %v8785_v30  ;;  %v5342_v9 = vsel %vm893_vm6, %v5336_v31, -inf  ;;  %v7437_v8 = vld [vmem:[%s9417_s15 + $0xc0] sm:$0xff]  }
0x1fe1   :  { %5343 = vmax.xlane.f32.xlu1 %v5342_v9 }
0x1fe2   :  { %v5339_v13 = vsel %vm893_vm6, %v5331_v59, -inf }
0x1fe3   :  { %5340 = vmax.xlane.f32.xlu0 %v5339_v13 }
0x2062   :  { %v5165_v35 = vpop.xlane.xlu1 %5164 }
0x2063   :  { %v5167_v44 = vsub.f32 %v5157_v22, %v5165_v35  ;;  %v7424_v22 = vld [vmem:[%s9417_s15 + $0xf8] sm:$0xff]  }
0x2064   :  { %v5162_v33 = vpop.xlane.xlu0 %5161 }
0x2065   :  { %v5170_v12 = vmul.f32 1.442695, %v5167_v44  ;;  %v5166_v1 = vsub.f32 %v5152_v18, %v5162_v33  ;;  %v7430_v18 = vld [vmem:[%s9417_s15 + $0xe0] sm:$0xff]  }
0x2067   :  { %7600 = vpow2.f32 %v5170_v12  ;;  %v5168_v55 = vmul.f32 1.442695, %v5166_v1 }
0x2069   :  { %7602 = vpow2.f32 %v5168_v55 }
0x206a   :  { %v5344_v62 = vpop.xlane.xlu1 %5343 }
0x206b   :  { %v5346_v7 = vsub.f32 %v5336_v31, %v5344_v62  ;;  %v7436_v31 = vld [vmem:[%s9417_s15 + $0xc8] sm:$0xff]  }
0x206c   :  { %v5341_v26 = vpop.xlane.xlu0 %5340 }
0x206d   :  { %v5349_v47 = vmul.f32 1.442695, %v5346_v7  ;;  %v5345_v10 = vsub.f32 %v5331_v59, %v5341_v26  ;;  %v5624_v7 = vrot.slane %v9077_v21, %v7952_v3 }
0x206f   :  { %7604 = vpow2.f32 %v5349_v47  ;;  %v5347_v30 = vmul.f32 1.442695, %v5345_v10 }
0x2071   :  { %7606 = vpow2.f32 %v5347_v30 }
0x2074   :  { %v7601_v6 = vpop.eup %7600 }
0x2075   :  { %v5175_v15 = vsel %vm893_vm6, %v7601_v6, 0.0 }
0x2076   :  { %v7603_v49 = vpop.eup %7602  ;;  %5176 = vadd.xlane.f32.xlu1 %v5175_v15 }
0x2077   :  { %v5172_v34 = vsel %vm893_vm6, %v7603_v49, 0.0 }
0x2078   :  { %5173 = vadd.xlane.f32.xlu0 %v5172_v34 }
0x207c   :  { %v7605_v48 = vpop.eup %7604 }
0x207d   :  { %v5354_v42 = vsel %vm893_vm6, %v7605_v48, 0.0 }
0x207e   :  { %v7607_v57 = vpop.eup %7606  ;;  %5355 = vadd.xlane.f32.xlu1 %v5354_v42 }
0x207f   :  { %v5351_v37 = vsel %vm893_vm6, %v7607_v57, 0.0 }
0x2080   :  { %5352 = vadd.xlane.f32.xlu0 %v5351_v37 }
0x20ff   :  { %v5177_v19 = vpop.xlane.xlu1 %5176 }
0x2100   :  { %7608 = vrcp.f32 %v5177_v19  ;;  %v7438_v19 = vld [vmem:[%s9418_s16 + $0x70] ss:$8 sps:$4 sm:$0xff]  }
0x2101   :  { %v5174_v14 = vpop.xlane.xlu0 %5173 }
0x2102   :  { %7610 = vrcp.f32 %v5174_v14  ;;  %v7443_v14 = vld [vmem:[%s9418_s16 + $0x64] ss:$8 sps:$4 sm:$0xff]  }
0x2107   :  { %v5356_v50 = vpop.xlane.xlu1 %5355 }
0x2108   :  { %7612 = vrcp.f32 %v5356_v50  ;;  %v7441_v50 = vld [vmem:[%s9418_s16 + $0x60] ss:$8 sps:$4 sm:$0xff]  }
0x2109   :  { %v5353_v51 = vpop.xlane.xlu0 %5352 }
0x210a   :  { %7614 = vrcp.f32 %v5353_v51  ;;  %v7446_v51 = vld [vmem:[%s9418_s16 + $0x54] ss:$8 sps:$4 sm:$0xff]  }
0x210d   :  { %v7609_v29 = vpop.eup %7608 }
0x210e   :  { %v5181_v40 = vmul.f32 %v7609_v29, %v7601_v6  ;;  %v7444_v29 = vld [vmem:[%s9418_s16 + $0x50] ss:$8 sps:$4 sm:$0xff]  }
0x210f   :  { %v7611_v38 = vpop.eup %7610 }
0x2110   :  { %v5180_v5 = vmul.f32 %v7611_v38, %v7603_v49  ;;  %v7449_v38 = vld [vmem:[%s9418_s16 + $0x44] ss:$8 sps:$4 sm:$0xff]  }
0x2112   :  { %7046 = vmatprep.mubr.msk.f32.mxu1 %vm893_vm6, %v5180_v5  ;;  %v7447_v5 = vld [vmem:[%s9418_s16 + $0x40] ss:$8 sps:$4 sm:$0xff]  }
0x2113   :  { %7047 = vmatmul.mubr.msk.f32.vlgmr.msra.gmra.mxu1 %vm893_vm6, %v5181_v40 }
0x2114   :  { %7057 = vmatpush3.msra.mxu1 %v9125_v17  ;;  %v7426_v17 = vld [vmem:[%s9417_s15 + $0xf0] sm:$0xff]  }
0x2115   :  { %7058 = vmatprep.subr.mxu1 %v9123_v52  ;;  %v7613_v4 = vpop.eup %7612 }
0x2116   :  { %7059 = vmatpush3.msra.mxu1 %v9123_v52  ;;  %v5360_v60 = vmul.f32 %v7613_v4, %v7605_v48  ;;  %v7428_v52 = vld [vmem:[%s9417_s15 + $0xe8] sm:$0xff]  }
0x2117   :  { %v7615_v2 = vpop.eup %7614  ;;  %7063 = vmatprep.subr.bf16.mxu1 %v7652_v23 }
0x2118   :  { %v5359_v61 = vmul.f32 %v7615_v2, %v7607_v57 }
0x211a   :  { %7060 = vmatprep.mubr.msk.f32.mxu1 %vm893_vm6, %v5359_v61 }
0x211b   :  { %7061 = vmatmul.mubr.msk.f32.vlgmr.msra.gmra.mxu1 %vm893_vm6, %v5360_v60 }
0x211c   :  { %7064 = vmatpush3.bf16.msra.mxu1 %v7424_v22  ;;  %7079 = vmatprep.mubr.msk.bf16.mxu1 %vm7653_vm7, %v7652_v23 }
0x211d   :  { %7065 = vmatprep.subr.bf16.mxu1 %v7652_v23 }
0x2120   :  { %7066 = vmatpush3.bf16.msra.mxu1 %v7426_v17 }
0x2121   :  { %7067 = vmatprep.subr.bf16.mxu1 %v7652_v23 }
0x2124   :  { %7068 = vmatpush3.bf16.msra.mxu1 %v7428_v52 }
0x2125   :  { %7069 = vmatprep.subr.bf16.mxu1 %v7652_v23 }
0x2128   :  { %7070 = vmatpush3.bf16.msra.mxu1 %v7430_v18  ;;  %v5658_v18 = vrot.slane %v9077_v21, %v8196_v56 }
0x2129   :  { %7071 = vmatprep.subr.bf16.mxu1 %v7652_v23 }
0x212c   :  { %7072 = vmatpush3.bf16.msra.mxu1 %v7432_v27 }
0x212d   :  { %7073 = vmatprep.subr.bf16.mxu1 %v7652_v23 }
0x2130   :  { %7074 = vmatpush3.bf16.msra.mxu1 %v7434_v16 }
0x2131   :  { %7075 = vmatprep.subr.bf16.mxu1 %v7652_v23 }
0x2134   :  { %7076 = vmatpush3.bf16.msra.mxu1 %v7436_v31  ;;  %v5664_v31 = vrot.slane %v9077_v21, %v7879_v20  ;;  %v7452_v20 = vld [vmem:[%s9419_s17 + $0xf0] sm:$0xff]  }
0x2135   :  { %7077 = vmatprep.subr.bf16.mxu1 %v7652_v23 }
0x2138   :  { %7078 = vmatpush3.bf16.msra.mxu1 %v7437_v8 }
0x2139   :  { %5737 = vmatprep.subr.bf16.mxu1 %v7440_v28 }
0x21d3   :  { %v7048_v59 = vpop.f32.mrf.mxu1 }
0x21d5   :  { %v5254_v9 = vpop.f32.mrf.mxu1 }
0x21d6   :  { %v5263_v13 = vpack.c.bf16 %v7048_v59, %v5254_v9 }
0x21d8   :  { %7100 = vmatmul.mubr.bf16.vlgmr.msra.gmra.mxu0 %v5263_v13 }
0x21db   :  { %v7062_v35 = vpop.f32.mrf.mxu1 }
0x21dd   :  { %v5433_v44 = vpop.f32.mrf.mxu1 }
0x21de   :  { %v5442_v33 = vpack.c.bf16 %v7062_v35, %v5433_v44  ;;  %v7450_v35 = vld [vmem:[%s9419_s17 + $0xf8] sm:$0xff]  }
0x21df   :  { %v7451_v44 = vld [vmem:[%s9419_s17 + $0xb8] sm:$0xff]   ;;  %6782 = vmatprep.subr.bf16.mxu0 %v7450_v35 }
0x21e0   :  { %7080 = vmatmul.mubr.bf16.vlgmr.msra.gmra.mxu1 %v5442_v33  ;;  %6783 = vmatpush3.bf16.msra.mxu0 %v7451_v44  ;;  %v7453_v33 = vld [vmem:[%s9419_s17 + $0xb0] sm:$0xff]  }
0x21e1   :  { %5761 = vmatprep.mubr.bf16.mxu1 %v7650_v0  ;;  %5738 = vmatpush1.bf16.msra.mxu1 %v7438_v19 }
0x21e2   :  { %5739 = vmatprep.subr.bf16.mxu1 %v7443_v14  ;;  %6784 = vmatprep.subr.bf16.mxu0 %v7452_v20 }
0x21e4   :  { %6785 = vmatpush3.bf16.msra.mxu0 %v7453_v33 }
0x21e5   :  { %5740 = vmatpush1.bf16.msra.mxu1 %v7441_v50 }
0x21e6   :  { %5741 = vmatprep.subr.bf16.mxu1 %v7446_v51 }
0x21e9   :  { %5742 = vmatpush1.bf16.msra.mxu1 %v7444_v29 }
0x21ea   :  { %5743 = vmatprep.subr.bf16.mxu1 %v7449_v38 }
0x21ed   :  { %5744 = vmatpush1.bf16.msra.mxu1 %v7447_v5 }
0x21ee   :  { %7103 = vmatprep.subr.mxu1 %v7652_v23 }
0x2298   :  { %v5614_v12 = vpop.f32.mrf.mxu0 }
0x229a   :  { %v7101_v1 = vpop.f32.mrf.mxu0 }
0x229b   :  { %v7455_v1 = vld [vmem:[%s9419_s17 + $0xa8] sm:$0xff]  }
0x229c   :  { %v5617_v55 = vpop.f32.mrf.mxu0 }
0x229e   :  { %v7102_v62 = vpop.f32.mrf.mxu0 }
0x229f   :  { %v7457_v62 = vld [vmem:[%s9419_s17 + $0xa0] sm:$0xff]  }
0x22a0   :  { %v5525_v26 = vpop.f32.mrf.mxu1 }
0x22a1   :  { %v5615_v47 = vadd.f32 %v5614_v12, %v5525_v26  ;;  %v7454_v12 = vld [vmem:[%s9419_s17 + $0xe8] sm:$0xff]   ;;  %v7459_v26 = vld [vmem:[%s9419_s17 + $0x98] sm:$0xff]  }
0x22a2   :  { %v7081_v10 = vpop.f32.mrf.mxu1  ;;  %6786 = vmatprep.subr.bf16.mxu0 %v7454_v12 }
0x22a3   :  { %v5625_v30 = vadd.f32 %v5624_v7, %v5615_v47  ;;  %6787 = vmatpush3.bf16.msra.mxu0 %v7455_v1  ;;  %v7460_v47 = vld [vmem:[%s9419_s17 + $0xd0] sm:$0xff]  }
0x22a4   :  { %v5528_v6 = vpop.f32.mrf.mxu1  ;;  %v7461_v10 = vld [vmem:[%s9419_s17 + $0x90] sm:$0xff]  }
0x22a5   :  { %v9228_v15 = vadd.f32 %v5625_v30, %v9010_v53  ;;  %v5618_v49 = vadd.f32 %v5617_v55, %v5528_v6  ;;  %v7456_v55 = vld [vmem:[%s9419_s17 + $0xe0] sm:$0xff]   ;;  %v7462_v30 = vld [vmem:[%s9419_s17 + $0xc8] sm:$0xff]  }
0x22a6   :  { %v7082_v34 = vpop.f32.mrf.mxu1  ;;  %6788 = vmatprep.subr.bf16.mxu0 %v7456_v55  ;;  %v7463_v6 = vld [vmem:[%s9419_s17 + $0x88] sm:$0xff]  }
0x22a7   :  { %v5626_v48 = vadd.f32 %v5624_v7, %v5618_v49  ;;  %v5629_v0 = vsel %vm172_vm0, %v9228_v15, 0.0  ;;  %6789 = vmatpush3.bf16.msra.mxu0 %v7457_v62  ;;  %v7458_v7 = vld [vmem:[%s9419_s17 + $0xd8] sm:$0xff]   ;;  %v7464_v49 = vld [vmem:[%s9419_s17 + $0xc0] sm:$0xff]  }
0x22a8   :  { %5630 = vadd.xlane.f32.xlu0 %v5629_v0  ;;  %6790 = vmatprep.subr.bf16.mxu0 %v7458_v7  ;;  %v7465_v34 = vld [vmem:[%s9419_s17 + $0x80] sm:$0xff]   ;;  %v5675_v0 = vrot.slane %v9111_v54, %v8196_v56 }
0x22a9   :  { %v9233_v42 = vadd.f32 %v5626_v48, %v9015_v11  ;;  %v5671_v48 = vrot.slane %v9111_v54, %v7833_v45 }
0x22ab   :  { %v5632_v3 = vsel %vm172_vm0, %v9233_v42, 0.0  ;;  %6791 = vmatpush3.bf16.msra.mxu0 %v7459_v26 }
0x22ac   :  { %5633 = vadd.xlane.f32.xlu1 %v5632_v3  ;;  %6792 = vmatprep.subr.bf16.mxu0 %v7460_v47  ;;  %v5681_v3 = vrot.slane %v5671_v48, %v7833_v45 }
0x22af   :  { %6793 = vmatpush3.bf16.msra.mxu0 %v7461_v10 }
0x22b0   :  { %6794 = vmatprep.subr.bf16.mxu0 %v7462_v30 }
0x22b3   :  { %6795 = vmatpush3.bf16.msra.mxu0 %v7463_v6 }
0x22b4   :  { %6796 = vmatprep.subr.bf16.mxu0 %v7464_v49 }
0x22b7   :  { %6797 = vmatpush3.bf16.msra.mxu0 %v7465_v34 }
0x2331   :  { %v5631_v57 = vpop.xlane.xlu0 %5630 }
0x2332   :  { %v5635_v37 = vmul.f32 0.015625, %v5631_v57  ;;  %v5685_v57 = vrot.slane %v5675_v0, %v7833_v45 }
0x2334   :  { %v5637_v39 = vsub.f32 %v9228_v15, %v5635_v37 }
0x2335   :  { %v5634_v53 = vpop.xlane.xlu1 %5633 }
0x2336   :  { %v5636_v36 = vmul.f32 0.015625, %v5634_v53  ;;  %v5639_v25 = vmul.f32 %v5637_v39, %v5637_v39 }
0x2338   :  { %v5638_v41 = vsub.f32 %v9233_v42, %v5636_v36  ;;  %v5641_v32 = vsel %vm172_vm0, %v5639_v25, 0.0 }
0x2339   :  { %5642 = vadd.xlane.f32.xlu0 %v5641_v32 }
0x233a   :  { %v5640_v63 = vmul.f32 %v5638_v41, %v5638_v41 }
0x233c   :  { %v5644_v11 = vsel %vm172_vm0, %v5640_v63, 0.0 }
0x233d   :  { %5645 = vadd.xlane.f32.xlu1 %v5644_v11 }
0x23c2   :  { %v5643_v40 = vpop.xlane.xlu0 %5642 }
0x23c3   :  { %v5647_v4 = vmul.f32 0.015625, %v5643_v40 }
0x23c5   :  { %v5649_v2 = vadd.f32 1e-05, %v5647_v4 }
0x23c6   :  { %v5646_v61 = vpop.xlane.xlu1 %5645 }
0x23c7   :  { %7616 = vrsqrt.f32 %v5649_v2  ;;  %v5648_v22 = vmul.f32 0.015625, %v5646_v61 }
0x23c9   :  { %v5650_v60 = vadd.f32 1e-05, %v5648_v22 }
0x23cb   :  { %7618 = vrsqrt.f32 %v5650_v60 }
0x23d4   :  { %v7617_v17 = vpop.eup %7616 }
0x23d5   :  { %v5653_v52 = vmul.f32 %v7617_v17, %v5637_v39 }
0x23d7   :  { %v5659_v46 = vmul.f32 %v5658_v18, %v5653_v52 }
0x23d8   :  { %v7619_v27 = vpop.eup %7618 }
0x23d9   :  { %v5654_v16 = vmul.f32 %v7619_v27, %v5638_v41  ;;  %v5665_v59 = vadd.f32 %v5664_v31, %v5659_v46 }
0x23db   :  { %v5660_v8 = vmul.f32 %v5658_v18, %v5654_v16 }
0x23dd   :  { %v5666_v9 = vadd.f32 %v5664_v31, %v5660_v8 }
0x23df   :  { %v5667_v13 = vpack.c.bf16 %v5666_v9, %v5665_v59 }
0x23e1   :  { %6541 = vmatmul.mubr.msk.bf16.vlgmr.msra.gmra.mxu1 %vm172_vm0, %v5667_v13 }
0x23e2   :  { %7107 = vmatprep.mubr.msk.f32.mxu1 %vm7653_vm7, %v7652_v23 }
0x24a1   :  { %v5763_v37 = vpop.f32.mrf.mxu1 }
0x24a2   :  { %v9327_v39 = vadd.f32 %v5763_v37, %v5681_v3 }
0x24a3   :  { %v5765_v53 = vpop.f32.mrf.mxu1 }
0x24a4   :  { %v9330_v36 = vmul.f32 0.70710677, %v9327_v39  ;;  %v9332_v25 = vadd.f32 %v5765_v53, %v5685_v57 }
0x24a5   :  { %v5767_v41 = vpop.f32.mrf.mxu1 }
0x24a6   :  { %v5780_v32 = vand.u32 2147483647, %v9330_v36  ;;  %v9336_v63 = vmul.f32 0.70710677, %v9332_v25  ;;  %v9338_v56 = vadd.f32 %v5767_v41, %v5681_v3  ;;  %vm5860_vm14 = vcmp.ge.f32.partialorder %v9330_v36, 0.0 }
0x24a7   :  { %v5769_v54 = vpop.f32.mrf.mxu1 }
0x24a8   :  { %v5784_v11 = vmul.f32 0.3275911, %v5780_v32  ;;  %v5781_v28 = vand.u32 2147483647, %v9336_v63  ;;  %v9342_v19 = vmul.f32 0.70710677, %v9338_v56  ;;  %v9344_v14 = vadd.f32 %v5769_v54, %v5685_v57 }
0x24a9   :  { %v5836_v60 = vsub.f32 0.0, %v5780_v32  ;;  %vm5861_vm13 = vcmp.ge.f32.partialorder %v9336_v63, 0.0  ;;  %v5773_v63 = vmul.f32 0.5, %v9332_v25 }
0x24aa   :  { %v5788_v50 = vadd.f32 1.0, %v5784_v11  ;;  %v5785_v51 = vmul.f32 0.3275911, %v5781_v28  ;;  %v5782_v29 = vand.u32 2147483647, %v9342_v19  ;;  %v5837_v17 = vsub.f32 0.0, %v5781_v28 }
0x24ab   :  { %v9348_v38 = vmul.f32 0.70710677, %v9344_v14  ;;  %v5840_v52 = vmul.f32 %v5836_v60, %v5780_v32  ;;  %vm5862_vm15 = vcmp.ge.f32.partialorder %v9342_v19, 0.0 }
0x24ac   :  { %7620 = vrcp.f32 %v5788_v50  ;;  %v5789_v5 = vadd.f32 1.0, %v5785_v51  ;;  %v5786_v40 = vmul.f32 0.3275911, %v5782_v29  ;;  %v5838_v18 = vsub.f32 0.0, %v5782_v29 }
0x24ad   :  { %v5783_v4 = vand.u32 2147483647, %v9348_v38  ;;  %v5841_v16 = vmul.f32 %v5837_v17, %v5781_v28  ;;  %v5844_v31 = vmul.f32 1.442695, %v5840_v52  ;;  %vm5863_vm2 = vcmp.ge.f32.partialorder %v9348_v38, 0.0 }
0x24ae   :  { %7622 = vrcp.f32 %v5789_v5  ;;  %v5790_v2 = vadd.f32 1.0, %v5786_v40  ;;  %v5842_v59 = vmul.f32 %v5838_v18, %v5782_v29 }
0x24af   :  { %v5787_v61 = vmul.f32 0.3275911, %v5783_v4  ;;  %v5839_v8 = vsub.f32 0.0, %v5783_v4  ;;  %v5846_v44 = vmul.f32 1.442695, %v5841_v16 }
0x24b0   :  { %7624 = vrcp.f32 %v5790_v2  ;;  %v5848_v62 = vmul.f32 1.442695, %v5842_v59 }
0x24b1   :  { %v5791_v22 = vadd.f32 1.0, %v5787_v61  ;;  %v5843_v12 = vmul.f32 %v5839_v8, %v5783_v4 }
0x24b3   :  { %7626 = vrcp.f32 %v5791_v22  ;;  %v5850_v49 = vmul.f32 1.442695, %v5843_v12 }
0x24b4   :  { %7628 = vpow2.f32 %v5844_v31 }
0x24b5   :  { %7630 = vpow2.f32 %v5846_v44 }
0x24b6   :  { %7632 = vpow2.f32 %v5848_v62 }
0x24b7   :  { %7634 = vpow2.f32 %v5850_v49  ;;  %v5774_v49 = vmul.f32 0.5, %v9338_v56 }
0x24b9   :  { %v7621_v27 = vpop.eup %7620 }
0x24ba   :  { %v5800_v46 = vmul.f32 1.0614054, %v7621_v27 }
0x24bb   :  { %v7623_v9 = vpop.eup %7622 }
0x24bc   :  { %v6542_v13 = vadd.f32 -1.4531521, %v5800_v46  ;;  %v5801_v35 = vmul.f32 1.0614054, %v7623_v9 }
0x24bd   :  { %v7625_v20 = vpop.eup %7624 }
0x24be   :  { %v5808_v33 = vmul.f32 %v7621_v27, %v6542_v13  ;;  %v6543_v1 = vadd.f32 -1.4531521, %v5801_v35  ;;  %v5802_v55 = vmul.f32 1.0614054, %v7625_v20 }
0x24c0   :  { %v5812_v7 = vadd.f32 1.4214138, %v5808_v33  ;;  %v7627_v26 = vpop.eup %7626  ;;  %v5809_v47 = vmul.f32 %v7623_v9, %v6543_v1  ;;  %v6544_v10 = vadd.f32 -1.4531521, %v5802_v55 }
0x24c1   :  { %v5803_v6 = vmul.f32 1.0614054, %v7627_v26  ;;  %v7629_v40 = vpop.eup %7628 }
0x24c2   :  { %v5816_v30 = vmul.f32 %v7621_v27, %v5812_v7  ;;  %v5813_v34 = vadd.f32 1.4214138, %v5809_v47  ;;  %v5810_v48 = vmul.f32 %v7625_v20, %v6544_v10  ;;  %v7631_v52 = vpop.eup %7630 }
0x24c3   :  { %v6545_v3 = vadd.f32 -1.4531521, %v5803_v6  ;;  %v7633_v8 = vpop.eup %7632 }
0x24c4   :  { %v6546_v0 = vadd.f32 -0.28449672, %v5816_v30  ;;  %v5817_v57 = vmul.f32 %v7623_v9, %v5813_v34  ;;  %v5814_v37 = vadd.f32 1.4214138, %v5810_v48  ;;  %v7635_v33 = vpop.eup %7634  ;;  %v5775_v48 = vmul.f32 0.5, %v9344_v14 }
0x24c5   :  { %v5811_v41 = vmul.f32 %v7627_v26, %v6545_v3  ;;  %v6024_v14 = vrot.slane %v9077_v21, %v7884_v24 }
0x24c6   :  { %v5824_v53 = vmul.f32 %v7621_v27, %v6546_v0  ;;  %v6547_v32 = vadd.f32 -0.28449672, %v5817_v57  ;;  %v5818_v54 = vmul.f32 %v7625_v20, %v5814_v37  ;;  %v5772_v0 = vmul.f32 0.5, %v9327_v39 }
0x24c7   :  { %v5815_v28 = vadd.f32 1.4214138, %v5811_v41 }
0x24c8   :  { %v5828_v11 = vadd.f32 0.2548296, %v5824_v53  ;;  %v5825_v50 = vmul.f32 %v7623_v9, %v6547_v32  ;;  %v6548_v51 = vadd.f32 -0.28449672, %v5818_v54 }
0x24c9   :  { %v5819_v5 = vmul.f32 %v7627_v26, %v5815_v28 }
0x24ca   :  { %v5832_v29 = vmul.f32 %v7621_v27, %v5828_v11  ;;  %v5829_v4 = vadd.f32 0.2548296, %v5825_v50  ;;  %v5826_v2 = vmul.f32 %v7625_v20, %v6548_v51 }
0x24cb   :  { %v6549_v22 = vadd.f32 -0.28449672, %v5819_v5 }
0x24cc   :  { %v5852_v61 = vmul.f32 %v7629_v40, %v5832_v29  ;;  %v5833_v60 = vmul.f32 %v7623_v9, %v5829_v4  ;;  %v5830_v17 = vadd.f32 0.2548296, %v5826_v2  ;;  %v6027_v29 = vld [vmem:[%s9420_s11] sm:$0x3]  ;;  %v3227_v2 = vmul.f32 %v8748_v58, %v8748_v58 }
0x24cd   :  { %v5827_v18 = vmul.f32 %v7627_v26, %v6549_v22 }
0x24ce   :  { %v5856_v16 = vsub.f32 1.0, %v5852_v61  ;;  %v5853_v46 = vmul.f32 %v7631_v52, %v5833_v60  ;;  %v5834_v31 = vmul.f32 %v7625_v20, %v5830_v17  ;;  %v3228_v22 = vsel %vm3127_vm4, %v3227_v2, 0.0  ;;  %v7466_v60 = vld [vmem:[%s9421_s18 + $0x18] sm:$0xff]   ;;  %v7467_v17 = vld [vmem:[%s9421_s18 + $0x10] sm:$0xff]   ;;  %v7468_v52 = vld [vmem:[%s9421_s18 + $0x8] sm:$0xff]  }
0x24cf   :  { %v5831_v59 = vadd.f32 0.2548296, %v5827_v18  ;;  %v7469_v18 = vld [vmem:[%s9421_s18] sm:$0xff]  }
0x24d0   :  { %v5857_v13 = vsub.f32 1.0, %v5853_v46  ;;  %v5854_v35 = vmul.f32 %v7633_v8, %v5834_v31  ;;  %v5864_v27 = vsub.f32 0.0, %v5856_v16  ;;  %v7649_v8 = vld [vmem:[%s9415_s12] sm:$0xff]  ;;  %s7654_s12 = smov 64  }
0x24d1   :  { %v5835_v44 = vmul.f32 %v7627_v26, %v5831_v59  ;;  %v6117_v59 = vrot.slane %v7649_v8, %v7825_v43 }
0x24d2   :  { %v5865_v12 = vsub.f32 0.0, %v5857_v13  ;;  %v5858_v1 = vsub.f32 1.0, %v5854_v35  ;;  %v5868_v20 = vsel %vm5860_vm14, %v5856_v16, %v5864_v27 }
0x24d3   :  { %v5855_v55 = vmul.f32 %v7635_v33, %v5835_v44  ;;  %v5872_v26 = vadd.f32 1.0, %v5868_v20  ;;  %v6122_v44 = vrot.slane %v7649_v8, %v7833_v45 }
0x24d4   :  { %v5866_v62 = vsub.f32 0.0, %v5858_v1  ;;  %v5869_v9 = vsel %vm5861_vm13, %v5857_v13, %v5865_v12 }
0x24d5   :  { %v5859_v7 = vsub.f32 1.0, %v5855_v55  ;;  %v5873_v6 = vadd.f32 1.0, %v5869_v9  ;;  %v5876_v37 = vmul.f32 %v5872_v26, %v5772_v0 }
0x24d6   :  { %v5870_v47 = vsel %vm5862_vm15, %v5858_v1, %v5866_v62 }
0x24d7   :  { %v5874_v10 = vadd.f32 1.0, %v5870_v47  ;;  %v5867_v30 = vsub.f32 0.0, %v5859_v7  ;;  %v5877_v3 = vmul.f32 %v5873_v6, %v5773_v63 }
0x24d9   :  { %v5871_v34 = vsel %vm5863_vm2, %v5859_v7, %v5867_v30  ;;  %v5878_v19 = vmul.f32 %v5874_v10, %v5774_v49 }
0x24da   :  { %v5875_v36 = vadd.f32 1.0, %v5871_v34 }
0x24db   :  { %v5880_v41 = vpack.c.bf16 %v5878_v19, %v5876_v37 }
0x24dc   :  { %v5879_v57 = vmul.f32 %v5875_v36, %v5775_v48 }
0x24de   :  { %v5881_v53 = vpack.c.bf16 %v5879_v57, %v5877_v3 }
0x24e0   :  { %6010 = vmatprep.mubr.bf16.mxu0 %v5881_v53 }
0x24e1   :  { %6011 = vmatmul.mubr.bf16.vlgmr.msra.gmra.mxu0 %v5880_v41 }
0x25a1   :  { %v6798_v38 = vpop.f32.mrf.mxu0 }
0x25a3   :  { %v6799_v32 = vpop.f32.mrf.mxu0 }
0x25a4   :  { %v6800_v56 = vadd.f32 %v6799_v32, %v6798_v38 }
0x25a5   :  { %v6801_v54 = vpop.f32.mrf.mxu0 }
0x25a6   :  { %v6019_v25 = vadd.f32 %v6800_v56, %v9228_v15 }
0x25a7   :  { %v6802_v11 = vpop.f32.mrf.mxu0 }
0x25a8   :  { %v6803_v28 = vadd.f32 %v6802_v11, %v6801_v54  ;;  %v6025_v51 = vadd.f32 %v6024_v14, %v6019_v25 }
0x25aa   :  { %v6020_v39 = vadd.f32 %v6803_v28, %v9233_v42 }
0x25ac   :  { %v6026_v50 = vadd.f32 %v6024_v14, %v6020_v39 }
0x25ae   :  { %7104 = vmatpush3.msra.mxu1 %v6026_v50 }
0x25af   :  { %7105 = vmatprep.subr.mxu1 %v7652_v23 }
0x25b0   :  { %7106 = vmatpush3.msra.mxu1 %v6025_v51 }
0x25b1   :  { %7108 = vmatmul.mubr.msk.f32.vlgmr.msra.gmra.mxu1 %vm893_vm6, %v6027_v29  ;;  %7110 = vmatprep.subr.bf16.mxu1 %v7652_v23 }
0x25b2   :  { %7118 = vmatprep.mubr.msk.bf16.mxu1 %vm7653_vm7, %v7652_v23  ;;  %7111 = vmatpush3.bf16.msra.mxu1 %v7466_v60 }
0x25b3   :  { %7112 = vmatprep.subr.bf16.mxu1 %v7652_v23 }
0x25b6   :  { %7113 = vmatpush3.bf16.msra.mxu1 %v7467_v17 }
0x25b7   :  { %7114 = vmatprep.subr.bf16.mxu1 %v7652_v23 }
0x25ba   :  { %7115 = vmatpush3.bf16.msra.mxu1 %v7468_v52 }
0x25bb   :  { %7116 = vmatprep.subr.bf16.mxu1 %v7652_v23 }
0x25be   :  { %7117 = vmatpush3.bf16.msra.mxu1 %v7469_v18 }
0x2671   :  { %v6097_v24 = vpop.f32.mrf.mxu1 }
0x2672   :  { %v6101_v21 = vsel %vm3127_vm4, %v6097_v24, 0.0 }
0x2673   :  { %6102 = vadd.xlane.f32.xlu0 %v6101_v21  ;;  %v7109_v15 = vpop.f32.mrf.mxu1 }
0x26fc   :  { %v6103_v42 = vpop.xlane.xlu0 %6102 }
0x26fd   :  { %v6104_v5 = vmul.f32 0.015625, %v6103_v42 }
0x26ff   :  { %v6105_v40 = vsub.f32 %v6097_v24, %v6104_v5 }
0x2701   :  { %v6106_v4 = vmul.f32 %v6105_v40, %v6105_v40 }
0x2703   :  { %v6107_v61 = vsel %vm3127_vm4, %v6106_v4, 0.0 }
0x2704   :  { %6108 = vadd.xlane.f32.xlu1 %v6107_v61 }
0x2708   :  { %3229 = vadd.xlane.f32.xlu1 %v3228_v22 }
0x278d   :  { %v6109_v16 = vpop.xlane.xlu1 %6108 }
0x278e   :  { %v6110_v46 = vmul.f32 0.015625, %v6109_v16 }
0x2790   :  { %v6111_v31 = vadd.f32 1e-05, %v6110_v46 }
0x2791   :  { %v3230_v34 = vpop.xlane.xlu1 %3229 }
0x2792   :  { %7636 = vrsqrt.f32 %v6111_v31  ;;  %v3236_v0 = vand.u32 2147483648, %v3230_v34  ;;  %vm3235_vm5 = vcmp.eq.f32.partialorder %v3230_v34, 0.0 }
0x279f   :  { %v7637_v13 = vpop.eup %7636 }
0x27a0   :  { %v6113_v35 = vmul.f32 %v7637_v13, %v6105_v40 }
0x27a2   :  { %v6118_v23 = vmul.f32 %v6117_v59, %v6113_v35 }
0x27a4   :  { %v6123_v33 = vadd.f32 %v6122_v44, %v6118_v23 }
0x27a6   :  { %v6124_v27 = vpack.c.bf16 %v6123_v33, %v6123_v33 }
0x27a8   :  { %7119 = vmatmul.mubr.msk.bf16.vlgmr.msra.gmra.mxu1 %vm172_vm0, %v6124_v27 }
0x2868   :  { %v6194_v12 = vpop.f32.mrf.mxu1 }
0x2869   :  { %v6200_v1 = vmul.f32 %v6194_v12, %v6194_v12 }
0x286a   :  { %v7120_v55 = vpop.f32.mrf.mxu1 }
0x286b   :  { %v6201_v62 = vsel %vm3127_vm4, %v6200_v1, 0.0  ;;  %vm3233_vm4 = vcmp.eq.f32.partialorder %v3230_v34, inf }
0x286c   :  { %6202 = vadd.xlane.f32.xlu0 %v6201_v62  ;;  %v6197_v9 = vpop.f32.mrf.mxu1 }
0x286e   :  { %v7121_v7 = vpop.f32.mrf.mxu1 }
0x28f5   :  { %v6203_v20 = vpop.xlane.xlu0 %6202 }
0x28f6   :  { %7638 = vrsqrt.f32 %v6203_v20  ;;  %vm6206_vm6 = vcmp.eq.f32.partialorder %v6203_v20, inf  ;;  %v6209_v10 = vand.u32 2147483648, %v6203_v20  ;;  %vm6208_vm7 = vcmp.eq.f32.partialorder %v6203_v20, 0.0 }
0x2903   :  { %v7639_v43 = vpop.eup %7638 }
0x2904   :  { %v6205_v47 = vmul.f32 %v7639_v43, %v6203_v20 }
0x2906   :  { %v6207_v45 = vsel %vm6206_vm6, %v6203_v20, %v6205_v47 }
0x2907   :  { %v6210_v30 = vsel %vm6208_vm7, %v6209_v10, %v6207_v45 }
0x2908   :  { %v6211_v6 = vmax.f32 %v6210_v30, 1e-12 }
0x290a   :  { %7640 = vrcp.f32 %v6211_v6 }
0x290b   :  { %7642 = vrsqrt.f32 %v3230_v34 }
0x2917   :  { %v7641_v26 = vpop.eup %7640 }
0x2918   :  { %v6213_v49 = vmul.f32 %v7641_v26, %v6194_v12  ;;  %v7643_v63 = vpop.eup %7642 }
0x2919   :  { %v3232_v48 = vmul.f32 %v7643_v63, %v3230_v34 }
0x291a   :  { %6215 = vrot.lane.b32.xlu0 %v6213_v49, %s7654_s12 }
0x291b   :  { %v3234_v36 = vsel %vm3233_vm4, %v3230_v34, %v3232_v48 }
0x291c   :  { %v3237_v19 = vsel %vm3235_vm5, %v3236_v0, %v3234_v36 }
0x291d   :  { %v3238_v3 = vmax.f32 %v3237_v19, 1e-12 }
0x291f   :  { %7644 = vrcp.f32 %v3238_v3 }
0x292c   :  { %v7645_v57 = vpop.eup %7644 }
0x292d   :  { %v3240_v37 = vmul.f32 %v7645_v57, %v8748_v58 }
0x298c   :  { %v6216_v53 = vpop.permute.xlu0 %6215 }
0x298d   :  { %v6218_v41 = vsel %vm172_vm0, %v3240_v37, %v6216_v53 }
0x298e   :  { %6219 = vst [vmem:[%s9422_s19] sm:$0x3] %v6218_v41 }

</bundles_post_ra>
